<compile_context>
chip_gen: v6e
topology: v6e:2x2x1
jax: 0.10.0
libtpu: 0.0.40
codegen_flags: <defaults>
</compile_context>

<pallas_src>
import functools

import numpy as np
import jax
import jax.numpy as jnp
from jax.experimental import pallas as pl
from jax.experimental.pallas import tpu as pltpu


# ----------------------------------------------------------------------------
# Pallas dense (conv-as-matmul) kernel: y = act(x @ w + b), single full block
# ----------------------------------------------------------------------------
def _dense_kernel(x_ref, w_ref, b_ref, o_ref, *, act):
    y = jnp.dot(x_ref[...], w_ref[...], preferred_element_type=jnp.float32)
    y = y + b_ref[...]
    if act == "leaky_relu":
        y = jnp.where(y > 0, y, 0.2 * y)
    o_ref[...] = y


def dense(x, w, b, act="none"):
    """x: (M, K), w: (K, N), b: (N,) -> (M, N) float32.

    No grid (single full-block call -> no pipeline-step overhead; the 2-way
    row split was pure overhead on single-TC v5e/v6e).  Operands cast to bf16
    (MXU native fast path), accumulation in f32.
    """
    M, K = x.shape
    N = w.shape[1]
    return pl.pallas_call(
        functools.partial(_dense_kernel, act=act),
        out_shape=jax.ShapeDtypeStruct((M, N), jnp.float32),
    )(x.astype(jnp.bfloat16), w.astype(jnp.bfloat16),
      b.reshape(1, N).astype(jnp.float32))


# ----------------------------------------------------------------------------
# Image encoder: NHWC im2col (JAX strided slices) + Pallas matmul per layer
# ----------------------------------------------------------------------------
def im2col_nhwc(x, k, s, p):
    """x: (N, H, W, C) -> (N*Ho*Wo, k*k*C), patch features ordered (kh, kw, C)."""
    if p > 0:
        x = jnp.pad(x, ((0, 0), (p, p), (p, p), (0, 0)))
    N, H, W, C = x.shape
    Ho = (H - k) // s + 1
    Wo = (W - k) // s + 1
    cols = []
    for di in range(k):
        for dj in range(k):
            cols.append(x[:, di:di + s * Ho:s, dj:dj + s * Wo:s, :])  # (N,Ho,Wo,C)
    patches = jnp.stack(cols, axis=3)                  # (N, Ho, Wo, k*k, C)
    return patches.reshape(N * Ho * Wo, k * k * C), Ho, Wo


def image_encoder(enc_layers, x_nchw):
    """DDPAE-style ImageEncoder. x: (N, C, H, W) NCHW -> (N, image_latent_size)."""
    x = x_nchw.transpose(0, 2, 3, 1)  # single relayout to NHWC; stays NHWC after
    N = x.shape[0]
    for layer in enc_layers:
        patches, Ho, Wo = im2col_nhwc(x, layer["k"], layer["s"], layer["p"])
        y = dense(patches, layer["w"], layer["b"], act=layer["act"])
        x = y.reshape(N, Ho, Wo, layer["w"].shape[1])
        # BatchNorm2d (eval mode, deterministic init) is the identity -> folded.
    return x.reshape(N, -1)


# ----------------------------------------------------------------------------
# Fused RNN kernel: encode LSTM + initial-pose LSTM + predict LSTM + heads
# ----------------------------------------------------------------------------
def _pose_rnn_kernel(
        # ---- inputs (all resident in VMEM for the whole kernel) ----
        reprs_ref,                                   # (T_in*B, latent), rows (t, b)
        enc_wx_ref, enc_wh_ref, enc_whh_ref, enc_b_ref,
        pred_wah_ref, pred_wb_ref, pred_b_ref,
        ip_wih_ref, ip_whh_ref, ip_b_ref,
        beta_w_ref, beta_b_ref,                      # (H, 2*out), (1, 2*out)
        ipp_w_ref, ipp_b_ref,                        # (H, 2*out), (1, 2*out)
        # ---- outputs ----
        beta_ref,                                    # (n_comp*(T_in+T_out)*B, 2*out)
        init_pose_ref,                               # (n_comp*B, 2*out)
        # ---- scratch ----
        h_sc,                                        # (n_comp*(T_in+T_out)*B, H)
        fh_sc,                                       # (n_comp*B, H)  first hidden states
        ip_h_sc,                                     # (n_comp*B, H)
        *, B, T_in, T_out, n_comp, H, out_size, independent):
    f32 = jnp.float32

    # Constants for the fused gate activation (hoisted out of all loops):
    # sigmoid(x) = 0.5 * tanh(x/2) + 0.5, tanh on the g lanes -> ONE tanh/step.
    lane = jax.lax.broadcasted_iota(jnp.int32, (B, 4 * H), 1)
    is_g = jnp.logical_and(lane >= 2 * H, lane < 3 * H)
    g_scale = jnp.where(is_g, 1.0, 0.5).astype(f32)
    g_off = jnp.where(is_g, 0.0, 0.5).astype(f32)

    def lstm_cell(pre, c_prev):
        # PyTorch gate order (i, f, g, o); pre is (B, 4H) == one 128-lane span.
        th = jnp.tanh(pre * g_scale)
        act = th * g_scale + g_off          # sigmoid on i/f/o lanes, tanh on g lanes
        i_g = act[:, 0 * H:1 * H]
        f_g = act[:, 1 * H:2 * H]
        g_g = act[:, 2 * H:3 * H]
        o_g = act[:, 3 * H:4 * H]
        c_new = f_g * c_prev + i_g * g_g
        h_new = o_g * jnp.tanh(c_new)
        return h_new, c_new

    # Recurrent weights loaded once; stay resident for all unrolled steps.
    enc_w_h = enc_wh_ref[...]        # (H, 4H)  prev-component-hidden part of enc W_ih
    enc_u = enc_whh_ref[...]         # (H, 4H)  enc W_hh
    pred_wah = pred_wah_ref[...]     # (H, 4H)  pred (W_ih part A + W_hh) pre-summed
    pred_b = pred_b_ref[...]         # (1, 4H)
    ip_u = ip_whh_ref[...]           # (H, 4H)

    # ---- hoisted input projection (identical for every component) ----
    x_proj = (jnp.dot(reprs_ref[...], enc_wx_ref[...], preferred_element_type=f32)
              + enc_b_ref[...])                       # (T_in*B, 4H), rows (t, b)

    # ------------------------- encode RNN -------------------------
    final_h, final_c = [], []
    for comp in range(n_comp):
        if comp == 0:
            term = x_proj                             # prev_hidden is all-zero
        else:
            # prev-component hidden states (rows ordered (t, b)) were written
            # into h_sc by the previous component -> one batched matmul.
            ph = h_sc[(comp - 1) * T_in * B: comp * T_in * B, :]
            term = x_proj + jnp.dot(ph, enc_w_h, preferred_element_type=f32)
        c = jnp.zeros((B, H), f32)
        h = None
        for t in range(T_in):
            pre = term[t * B:(t + 1) * B, :]
            if t > 0:                                 # h == 0 at t == 0 -> skip dot
                pre = pre + jnp.dot(h, enc_u, preferred_element_type=f32)
            h, c = lstm_cell(pre, c)
            row0 = (comp * T_in + t) * B
            h_sc[row0:row0 + B, :] = h
            if t == 0:
                fh_sc[comp * B:(comp + 1) * B, :] = h
        final_h.append(h)
        final_c.append(c)

    # ---------------------- initial-pose RNN ----------------------
    ip_in = (jnp.dot(fh_sc[...], ip_wih_ref[...], preferred_element_type=f32)
             + ip_b_ref[...])                         # (n_comp*B, 4H)
    c = jnp.zeros((B, H), f32)
    h = None
    for comp in range(n_comp):
        pre = ip_in[comp * B:(comp + 1) * B, :]
        if comp > 0:                                  # h == 0 at comp == 0
            pre = pre + jnp.dot(h, ip_u, preferred_element_type=f32)
        h, c = lstm_cell(pre, c)
        ip_h_sc[comp * B:(comp + 1) * B, :] = h

    # ------------------------- predict RNN -------------------------
    # prev_out of the predict LSTM always equals its own hidden h (nn.LSTM with
    # seq-len 1: output == h_n, and the first prev_out is the encode final h,
    # which is also the carried hidden), so W_ih(part A)+W_hh were pre-summed
    # -> exactly one dependent matmul per step.
    pred_base = n_comp * T_in * B
    if not independent:
        pred_w_b = pred_wb_ref[...]                   # only loaded when used
    for comp in range(n_comp):
        h = final_h[comp]
        c = final_c[comp]
        if comp > 0 and not independent:
            ph = h_sc[pred_base + (comp - 1) * T_out * B:
                      pred_base + comp * T_out * B, :]
            cross = jnp.dot(ph, pred_w_b, preferred_element_type=f32)
        for t in range(T_out):
            pre = jnp.dot(h, pred_wah, preferred_element_type=f32) + pred_b
            if comp > 0 and not independent:
                pre = pre + cross[t * B:(t + 1) * B, :]
            h, c = lstm_cell(pre, c)
            row0 = pred_base + (comp * T_out + t) * B
            h_sc[row0:row0 + B, :] = h

    # ----------------- fused (mu || softplus(sigma)) heads -----------------
    def project(acts, w, bias, o_ref):
        y = jnp.dot(acts, w, preferred_element_type=f32) + bias
        col = jax.lax.broadcasted_iota(jnp.int32, y.shape, 1)
        # first out_size lanes = mu (identity), last out_size = softplus(sigma)
        o_ref[...] = jnp.where(col < out_size, y, jnp.logaddexp(y, 0.0))

    # Single merged projection for encode + predict rows (shared beta head).
    project(h_sc[...], beta_w_ref[...], beta_b_ref[...], beta_ref)
    project(ip_h_sc[...], ipp_w_ref[...], ipp_b_ref[...], init_pose_ref)


# ----------------------------------------------------------------------------
# PoseRNN forward
# ----------------------------------------------------------------------------
def pose_rnn_forward(params, cfg, video):
    B, T_in, C, Himg, Wimg = video.shape
    n_comp = cfg["n_components"]
    T_out = cfg["n_frames_output"]
    hs = cfg["hidden_size"]
    latent = cfg["image_latent_size"]
    out = cfg["output_size"]
    indep = cfg["independent_components"]

    # ---------------- CNN encoder (Pallas matmul per conv layer) ----------------
    reprs = image_encoder(params["enc_layers"], video.reshape(B * T_in, C, Himg, Wimg))
    # rows (b, t) -> (t, b) so the kernel's per-t slices are contiguous
    reprs = reprs.reshape(B, T_in, latent).transpose(1, 0, 2).reshape(T_in * B, latent)

    # ---------------- weight packing for the fused RNN kernel ----------------
    enc_w_x = params["enc_w_ih"][:latent]          # (latent, 4H)
    enc_w_h = params["enc_w_ih"][latent:]          # (H, 4H)
    if indep:
        pred_w_a = params["pred_w_ih"]             # (H, 4H)
        pred_w_b = jnp.zeros((hs, 4 * hs), jnp.float32)   # never read in-kernel
    else:
        pred_w_a = params["pred_w_ih"][:hs]        # (H, 4H) prev-output part
        pred_w_b = params["pred_w_ih"][hs:]        # (H, 4H) prev-component-hidden part
    # prev_out == own hidden h for every predict step -> fold W_ih(A) into W_hh.
    pred_wah = pred_w_a + params["pred_w_hh"]

    beta_w = jnp.concatenate([params["beta_mu_w"], params["beta_sigma_w"]], axis=1)
    beta_b = jnp.concatenate([params["beta_mu_b"], params["beta_sigma_b"]]).reshape(1, 2 * out)
    ipp_w = jnp.concatenate([params["ip_mu_w"], params["ip_sigma_w"]], axis=1)
    ipp_b = jnp.concatenate([params["ip_mu_b"], params["ip_sigma_b"]]).reshape(1, 2 * out)

    n_rows_in = n_comp * T_in * B
    n_rows_pred = n_comp * T_out * B

    kernel = functools.partial(
        _pose_rnn_kernel,
        B=B, T_in=T_in, T_out=T_out, n_comp=n_comp, H=hs,
        out_size=out, independent=indep)

    beta, init_pose = pl.pallas_call(
        kernel,
        out_shape=(
            jax.ShapeDtypeStruct((n_rows_in + n_rows_pred, 2 * out), jnp.float32),
            jax.ShapeDtypeStruct((n_comp * B, 2 * out), jnp.float32),
        ),
        scratch_shapes=[
            pltpu.VMEM((n_rows_in + n_rows_pred, hs), jnp.float32),   # h_sc
            pltpu.VMEM((n_comp * B, hs), jnp.float32),                # fh_sc
            pltpu.VMEM((n_comp * B, hs), jnp.float32),                # ip_h_sc
        ],
    )(reprs.astype(jnp.float32),
      enc_w_x, enc_w_h, params["enc_w_hh"], params["enc_b"].reshape(1, 4 * hs),
      pred_wah, pred_w_b, params["pred_b"].reshape(1, 4 * hs),
      params["ip_w_ih"], params["ip_w_hh"], params["ip_b"].reshape(1, 4 * hs),
      beta_w, beta_b, ipp_w, ipp_b)

    in_beta = beta[:n_rows_in]
    pred_beta = beta[n_rows_in:]

    # Kernel rows are ordered (component, time, batch); PyTorch views are
    # ordered (batch, time, component).  Fix up with tiny XLA transposes.
    def reorder(x, n_time):
        x = x.reshape(n_comp, n_time, B, 2 * out)
        x = x.transpose(2, 1, 0, 3).reshape(-1, 2 * out)
        return x[:, :out], x[:, out:]

    in_mu, in_sigma = reorder(in_beta, T_in)
    pr_mu, pr_sigma = reorder(pred_beta, T_out)
    init = init_pose.reshape(n_comp, B, 2 * out).transpose(1, 0, 2).reshape(-1, 2 * out)
    init_mu, init_sigma = init[:, :out], init[:, out:]

    return (in_mu, in_sigma, pr_mu, pr_sigma, init_mu, init_sigma)


# ----------------------------------------------------------------------------
# Deterministic parameter construction
# ----------------------------------------------------------------------------
def make_params(cfg, key):
    def nxt():
        nonlocal key
        key, sub = jax.random.split(key)
        return sub

    def init(shape, scale=0.1):
        return scale * jax.random.normal(nxt(), shape, dtype=jnp.float32)

    n_channels = cfg["n_channels"]
    ngf = cfg["ngf"]
    latent = cfg["image_latent_size"]
    hs = cfg["hidden_size"]
    out = cfg["output_size"]
    n_layers = int(np.log2(cfg["image_size"])) - 1

    # ImageEncoder conv stack (weights stored as (k*k*Cin, Cout); conv bias=False)
    enc_layers = []
    c_in, c_out = n_channels, ngf
    enc_layers.append(dict(w=init((c_in * 16, c_out)), b=jnp.zeros((c_out,), jnp.float32),
                           k=4, s=2, p=1, act="leaky_relu"))
    for _ in range(1, n_layers - 1):
        c_in, c_out = c_out, c_out * 2
        enc_layers.append(dict(w=init((c_in * 16, c_out)), b=jnp.zeros((c_out,), jnp.float32),
                               k=4, s=2, p=1, act="leaky_relu"))
    enc_layers.append(dict(w=init((c_out * 16, latent)), b=jnp.zeros((latent,), jnp.float32),
                           k=4, s=1, p=0, act="none"))

    pred_in = hs if cfg["independent_components"] else 2 * hs
    params = dict(
        enc_layers=enc_layers,
        # encode_rnn: LSTM(image_latent_size + hidden, hidden)
        enc_w_ih=init((latent + hs, 4 * hs)), enc_w_hh=init((hs, 4 * hs)),
        enc_b=init((4 * hs,)),
        # predict_rnn
        pred_w_ih=init((pred_in, 4 * hs)), pred_w_hh=init((hs, 4 * hs)),
        pred_b=init((4 * hs,)),
        # initial_pose_rnn
        ip_w_ih=init((hs, 4 * hs)), ip_w_hh=init((hs, 4 * hs)),
        ip_b=init((4 * hs,)),
        # linears
        beta_mu_w=init((hs, out)), beta_mu_b=init((out,)),
        beta_sigma_w=init((hs, out)), beta_sigma_b=init((out,)),
        ip_mu_w=init((hs, out)), ip_mu_b=init((out,)),
        ip_sigma_w=init((hs, out)), ip_sigma_b=init((out,)),
    )
    return params


# ----------------------------------------------------------------------------
# Main
# ----------------------------------------------------------------------------
if __name__ == "__main__":
    cfg = dict(
        n_components=2,
        n_frames_output=3,
        n_channels=1,
        image_size=16,
        image_latent_size=16,
        hidden_size=32,
        ngf=8,
        output_size=6,
        independent_components=False,
    )
    batch_size = 2
    n_frames_input = 4

    key = jax.random.PRNGKey(0)
    key, pkey, xkey = jax.random.split(key, 3)
    params = make_params(cfg, pkey)
    video = jax.random.normal(
        xkey, (batch_size, n_frames_input, cfg["n_channels"],
               cfg["image_size"], cfg["image_size"]), dtype=jnp.float32)

    fwd = jax.jit(functools.partial(pose_rnn_forward, params, cfg))
    outs = fwd(video)
    outs = jax.block_until_ready(outs)

    (in_mu, in_sigma, pr_mu, pr_sigma, init_mu, init_sigma) = outs
    assert in_mu.shape == (batch_size * n_frames_input * cfg["n_components"], cfg["output_size"])
    assert in_sigma.shape == in_mu.shape
    assert pr_mu.shape == (batch_size * cfg["n_frames_output"] * cfg["n_components"], cfg["output_size"])
    assert pr_sigma.shape == pr_mu.shape
    assert init_mu.shape == (batch_size * cfg["n_components"], cfg["output_size"])
    assert init_sigma.shape == init_mu.shape
    assert bool(jnp.all(in_sigma > 0)) and bool(jnp.all(pr_sigma > 0)) and bool(jnp.all(init_sigma > 0))
    assert all(bool(jnp.all(jnp.isfinite(o))) for o in outs)

    print("KERNEL_OK")
</pallas_src>

<mosaic_0001>
module attributes {stable_mosaic.version = 11 : i64} {
  func.func @_dense_kernel(%arg0: memref<512x16xbf16, #tpu.memory_space<vmem>>, %arg1: memref<16x8xbf16, #tpu.memory_space<vmem>>, %arg2: memref<1x8xf32, #tpu.memory_space<vmem>>, %arg3: memref<512x8xf32, #tpu.memory_space<vmem>>) attributes {dimension_semantics = [], scalar_prefetch = 0 : i64, scratch_operands = 0 : i64, tpu.core_type = #tpu.core_type<tc>} {
    %c0 = arith.constant 0 : index
    %c0_0 = arith.constant 0 : index
    %0 = vector.load %arg0[%c0, %c0_0] : memref<512x16xbf16, #tpu.memory_space<vmem>>, vector<512x16xbf16>
    %c0_1 = arith.constant 0 : index
    %c0_2 = arith.constant 0 : index
    %1 = vector.load %arg1[%c0_1, %c0_2] : memref<16x8xbf16, #tpu.memory_space<vmem>>, vector<16x8xbf16>
    %cst = arith.constant dense<0.000000e+00> : vector<512x8xf32>
    %2 = tpu.matmul %0, %1, %cst {dimension_numbers = #tpu.dot_dimension_numbers<[1], [0], [0], [1], [0, 0, 1, 1], [], []>} : vector<512x16xbf16>, vector<16x8xbf16>, vector<512x8xf32> -> vector<512x8xf32>
    %c0_3 = arith.constant 0 : index
    %c0_4 = arith.constant 0 : index
    %3 = vector.load %arg2[%c0_3, %c0_4] : memref<1x8xf32, #tpu.memory_space<vmem>>, vector<1x8xf32>
    %4 = vector.broadcast %3 : vector<1x8xf32> to vector<512x8xf32>
    %5 = arith.addf %2, %4 : vector<512x8xf32>
    %cst_5 = arith.constant 0.000000e+00 : f32
    %6 = vector.broadcast %cst_5 : f32 to vector<512x8xf32>
    %7 = arith.cmpf ogt, %5, %6 : vector<512x8xf32>
    %cst_6 = arith.constant 2.000000e-01 : f32
    %8 = vector.broadcast %cst_6 : f32 to vector<512x8xf32>
    %9 = arith.mulf %8, %5 : vector<512x8xf32>
    %10 = arith.select %7, %5, %9 : vector<512x8xi1>, vector<512x8xf32>
    %c0_7 = arith.constant 0 : index
    %c0_8 = arith.constant 0 : index
    %11 = vector.load %arg3[%c0_7, %c0_8] : memref<512x8xf32, #tpu.memory_space<vmem>>, vector<512x8xf32>
    tpu.vector_store %arg3[%c0_7, %c0_8], %10 {strides = array<i32>} : memref<512x8xf32, #tpu.memory_space<vmem>>, vector<512x8xf32>,
    return
  }
}

module attributes {stable_mosaic.version = 11 : i64} {
  func.func @_dense_kernel(%arg0: memref<128x128xbf16, #tpu.memory_space<vmem>>, %arg1: memref<128x16xbf16, #tpu.memory_space<vmem>>, %arg2: memref<1x16xf32, #tpu.memory_space<vmem>>, %arg3: memref<128x16xf32, #tpu.memory_space<vmem>>) attributes {dimension_semantics = [], scalar_prefetch = 0 : i64, scratch_operands = 0 : i64, tpu.core_type = #tpu.core_type<tc>} {
    %c0 = arith.constant 0 : index
    %c0_0 = arith.constant 0 : index
    %0 = vector.load %arg0[%c0, %c0_0] : memref<128x128xbf16, #tpu.memory_space<vmem>>, vector<128x128xbf16>
    %c0_1 = arith.constant 0 : index
    %c0_2 = arith.constant 0 : index
    %1 = vector.load %arg1[%c0_1, %c0_2] : memref<128x16xbf16, #tpu.memory_space<vmem>>, vector<128x16xbf16>
    %cst = arith.constant dense<0.000000e+00> : vector<128x16xf32>
    %2 = tpu.matmul %0, %1, %cst {dimension_numbers = #tpu.dot_dimension_numbers<[1], [0], [0], [1], [0, 0, 1, 1], [], []>} : vector<128x128xbf16>, vector<128x16xbf16>, vector<128x16xf32> -> vector<128x16xf32>
    %c0_3 = arith.constant 0 : index
    %c0_4 = arith.constant 0 : index
    %3 = vector.load %arg2[%c0_3, %c0_4] : memref<1x16xf32, #tpu.memory_space<vmem>>, vector<1x16xf32>
    %4 = vector.broadcast %3 : vector<1x16xf32> to vector<128x16xf32>
    %5 = arith.addf %2, %4 : vector<128x16xf32>
    %cst_5 = arith.constant 0.000000e+00 : f32
    %6 = vector.broadcast %cst_5 : f32 to vector<128x16xf32>
    %7 = arith.cmpf ogt, %5, %6 : vector<128x16xf32>
    %cst_6 = arith.constant 2.000000e-01 : f32
    %8 = vector.broadcast %cst_6 : f32 to vector<128x16xf32>
    %9 = arith.mulf %8, %5 : vector<128x16xf32>
    %10 = arith.select %7, %5, %9 : vector<128x16xi1>, vector<128x16xf32>
    %c0_7 = arith.constant 0 : index
    %c0_8 = arith.constant 0 : index
    %11 = vector.load %arg3[%c0_7, %c0_8] : memref<128x16xf32, #tpu.memory_space<vmem>>, vector<128x16xf32>
    tpu.vector_store %arg3[%c0_7, %c0_8], %10 {strides = array<i32>} : memref<128x16xf32, #tpu.memory_space<vmem>>, vector<128x16xf32>,
    return
  }
}

module attributes {stable_mosaic.version = 11 : i64} {
  func.func @_dense_kernel(%arg0: memref<8x256xbf16, #tpu.memory_space<vmem>>, %arg1: memref<256x16xbf16, #tpu.memory_space<vmem>>, %arg2: memref<1x16xf32, #tpu.memory_space<vmem>>, %arg3: memref<8x16xf32, #tpu.memory_space<vmem>>) attributes {dimension_semantics = [], scalar_prefetch = 0 : i64, scratch_operands = 0 : i64, tpu.core_type = #tpu.core_type<tc>} {
    %c0 = arith.constant 0 : index
    %c0_0 = arith.constant 0 : index
    %0 = vector.load %arg0[%c0, %c0_0] : memref<8x256xbf16, #tpu.memory_space<vmem>>, vector<8x256xbf16>
    %c0_1 = arith.constant 0 : index
    %c0_2 = arith.constant 0 : index
    %1 = vector.load %arg1[%c0_1, %c0_2] : memref<256x16xbf16, #tpu.memory_space<vmem>>, vector<256x16xbf16>
    %cst = arith.constant dense<0.000000e+00> : vector<8x16xf32>
    %2 = tpu.matmul %0, %1, %cst {dimension_numbers = #tpu.dot_dimension_numbers<[1], [0], [0], [1], [0, 0, 1, 1], [], []>} : vector<8x256xbf16>, vector<256x16xbf16>, vector<8x16xf32> -> vector<8x16xf32>
    %c0_3 = arith.constant 0 : index
    %c0_4 = arith.constant 0 : index
    %3 = vector.load %arg2[%c0_3, %c0_4] : memref<1x16xf32, #tpu.memory_space<vmem>>, vector<1x16xf32>
    %4 = vector.broadcast %3 : vector<1x16xf32> to vector<8x16xf32>
    %5 = arith.addf %2, %4 : vector<8x16xf32>
    %c0_5 = arith.constant 0 : index
    %c0_6 = arith.constant 0 : index
    %6 = vector.load %arg3[%c0_5, %c0_6] : memref<8x16xf32, #tpu.memory_space<vmem>>, vector<8x16xf32>
    tpu.vector_store %arg3[%c0_5, %c0_6], %5 {strides = array<i32>} : memref<8x16xf32, #tpu.memory_space<vmem>>, vector<8x16xf32>,
    return
  }
}

module attributes {stable_mosaic.version = 11 : i64} {
  func.func @_pose_rnn_kernel(%arg0: memref<8x16xf32, #tpu.memory_space<vmem>>, %arg1: memref<16x128xf32, #tpu.memory_space<vmem>>, %arg2: memref<32x128xf32, #tpu.memory_space<vmem>>, %arg3: memref<32x128xf32, #tpu.memory_space<vmem>>, %arg4: memref<1x128xf32, #tpu.memory_space<vmem>>, %arg5: memref<32x128xf32, #tpu.memory_space<vmem>>, %arg6: memref<32x128xf32, #tpu.memory_space<vmem>>, %arg7: memref<1x128xf32, #tpu.memory_space<vmem>>, %arg8: memref<32x128xf32, #tpu.memory_space<vmem>>, %arg9: memref<32x128xf32, #tpu.memory_space<vmem>>, %arg10: memref<1x128xf32, #tpu.memory_space<vmem>>, %arg11: memref<32x12xf32, #tpu.memory_space<vmem>>, %arg12: memref<1x12xf32, #tpu.memory_space<vmem>>, %arg13: memref<32x12xf32, #tpu.memory_space<vmem>>, %arg14: memref<1x12xf32, #tpu.memory_space<vmem>>, %arg15: memref<28x12xf32, #tpu.memory_space<vmem>>, %arg16: memref<4x12xf32, #tpu.memory_space<vmem>>, %arg17: memref<28x32xf32, #tpu.memory_space<vmem>>, %arg18: memref<4x32xf32, #tpu.memory_space<vmem>>, %arg19: memref<4x32xf32, #tpu.memory_space<vmem>>) attributes {dimension_semantics = [], scalar_prefetch = 0 : i64, scratch_operands = 3 : i64, tpu.core_type = #tpu.core_type<tc>} {
    %0 = tpu.iota {dimensions = array<i32: 1>} : vector<2x128xi32>
    %c64_i32 = arith.constant 64 : i32
    %1 = vector.broadcast %c64_i32 : i32 to vector<2x128xi32>
    %2 = arith.cmpi sge, %0, %1 : vector<2x128xi32>
    %c96_i32 = arith.constant 96 : i32
    %3 = vector.broadcast %c96_i32 : i32 to vector<2x128xi32>
    %4 = arith.cmpi slt, %0, %3 : vector<2x128xi32>
    %5 = arith.andi %2, %4 : vector<2x128xi1>
    %cst = arith.constant 1.000000e+00 : f32
    %cst_0 = arith.constant 5.000000e-01 : f32
    %6 = vector.broadcast %cst : f32 to vector<2x128xf32>
    %7 = vector.broadcast %cst_0 : f32 to vector<2x128xf32>
    %8 = arith.select %5, %6, %7 : vector<2x128xi1>, vector<2x128xf32>
    %cst_1 = arith.constant 0.000000e+00 : f32
    %cst_2 = arith.constant 5.000000e-01 : f32
    %9 = vector.broadcast %cst_1 : f32 to vector<2x128xf32>
    %10 = vector.broadcast %cst_2 : f32 to vector<2x128xf32>
    %11 = arith.select %5, %9, %10 : vector<2x128xi1>, vector<2x128xf32>
    %c0 = arith.constant 0 : index
    %c0_3 = arith.constant 0 : index
    %12 = vector.load %arg2[%c0, %c0_3] : memref<32x128xf32, #tpu.memory_space<vmem>>, vector<32x128xf32>
    %c0_4 = arith.constant 0 : index
    %c0_5 = arith.constant 0 : index
    %13 = vector.load %arg3[%c0_4, %c0_5] : memref<32x128xf32, #tpu.memory_space<vmem>>, vector<32x128xf32>
    %c0_6 = arith.constant 0 : index
    %c0_7 = arith.constant 0 : index
    %14 = vector.load %arg5[%c0_6, %c0_7] : memref<32x128xf32, #tpu.memory_space<vmem>>, vector<32x128xf32>
    %c0_8 = arith.constant 0 : index
    %c0_9 = arith.constant 0 : index
    %15 = vector.load %arg7[%c0_8, %c0_9] : memref<1x128xf32, #tpu.memory_space<vmem>>, vector<1x128xf32>
    %c0_10 = arith.constant 0 : index
    %c0_11 = arith.constant 0 : index
    %16 = vector.load %arg9[%c0_10, %c0_11] : memref<32x128xf32, #tpu.memory_space<vmem>>, vector<32x128xf32>
    %c0_12 = arith.constant 0 : index
    %c0_13 = arith.constant 0 : index
    %17 = vector.load %arg0[%c0_12, %c0_13] : memref<8x16xf32, #tpu.memory_space<vmem>>, vector<8x16xf32>
    %c0_14 = arith.constant 0 : index
    %c0_15 = arith.constant 0 : index
    %18 = vector.load %arg1[%c0_14, %c0_15] : memref<16x128xf32, #tpu.memory_space<vmem>>, vector<16x128xf32>
    %cst_16 = arith.constant dense<0.000000e+00> : vector<8x128xf32>
    %19 = tpu.matmul %17, %18, %cst_16 {dimension_numbers = #tpu.dot_dimension_numbers<[1], [0], [0], [1], [0, 0, 1, 1], [], []>} : vector<8x16xf32>, vector<16x128xf32>, vector<8x128xf32> -> vector<8x128xf32>
    %c0_17 = arith.constant 0 : index
    %c0_18 = arith.constant 0 : index
    %20 = vector.load %arg4[%c0_17, %c0_18] : memref<1x128xf32, #tpu.memory_space<vmem>>, vector<1x128xf32>
    %21 = vector.broadcast %20 : vector<1x128xf32> to vector<8x128xf32>
    %22 = arith.addf %19, %21 : vector<8x128xf32>
    %cst_19 = arith.constant 0.000000e+00 : f32
    %23 = vector.broadcast %cst_19 : f32 to vector<2x32xf32>
    %24 = vector.extract_strided_slice %22 {offsets = [0, 0], sizes = [2, 128], strides = [1, 1]} : vector<8x128xf32> to vector<2x128xf32>
    %25 = arith.mulf %24, %8 : vector<2x128xf32>
    %26 = math.tanh %25 : vector<2x128xf32>
    %27 = arith.mulf %26, %8 : vector<2x128xf32>
    %28 = arith.addf %27, %11 : vector<2x128xf32>
    %29 = vector.extract_strided_slice %28 {offsets = [0, 0], sizes = [2, 32], strides = [1, 1]} : vector<2x128xf32> to vector<2x32xf32>
    %30 = vector.extract_strided_slice %28 {offsets = [0, 32], sizes = [2, 32], strides = [1, 1]} : vector<2x128xf32> to vector<2x32xf32>
    %31 = vector.extract_strided_slice %28 {offsets = [0, 64], sizes = [2, 32], strides = [1, 1]} : vector<2x128xf32> to vector<2x32xf32>
    %32 = vector.extract_strided_slice %28 {offsets = [0, 96], sizes = [2, 32], strides = [1, 1]} : vector<2x128xf32> to vector<2x32xf32>
    %33 = arith.mulf %30, %23 : vector<2x32xf32>
    %34 = arith.mulf %29, %31 : vector<2x32xf32>
    %35 = arith.addf %33, %34 : vector<2x32xf32>
    %36 = math.tanh %35 : vector<2x32xf32>
    %37 = arith.mulf %32, %36 : vector<2x32xf32>
    %c0_20 = arith.constant 0 : index
    %c0_21 = arith.constant 0 : index
    %38 = vector.load %arg17[%c0_20, %c0_21] : memref<28x32xf32, #tpu.memory_space<vmem>>, vector<2x32xf32>
    tpu.vector_store %arg17[%c0_20, %c0_21], %37 {strides = array<i32>} : memref<28x32xf32, #tpu.memory_space<vmem>>, vector<2x32xf32>,
    %c0_22 = arith.constant 0 : index
    %c0_23 = arith.constant 0 : index
    %39 = vector.load %arg18[%c0_22, %c0_23] : memref<4x32xf32, #tpu.memory_space<vmem>>, vector<2x32xf32>
    tpu.vector_store %arg18[%c0_22, %c0_23], %37 {strides = array<i32>} : memref<4x32xf32, #tpu.memory_space<vmem>>, vector<2x32xf32>,
    %40 = vector.extract_strided_slice %22 {offsets = [2, 0], sizes = [2, 128], strides = [1, 1]} : vector<8x128xf32> to vector<2x128xf32>
    %cst_24 = arith.constant dense<0.000000e+00> : vector<2x128xf32>
    %41 = tpu.matmul %37, %13, %cst_24 {dimension_numbers = #tpu.dot_dimension_numbers<[1], [0], [0], [1], [0, 0, 1, 1], [], []>} : vector<2x32xf32>, vector<32x128xf32>, vector<2x128xf32> -> vector<2x128xf32>
    %42 = arith.addf %40, %41 : vector<2x128xf32>
    %43 = arith.mulf %42, %8 : vector<2x128xf32>
    %44 = math.tanh %43 : vector<2x128xf32>
    %45 = arith.mulf %44, %8 : vector<2x128xf32>
    %46 = arith.addf %45, %11 : vector<2x128xf32>
    %47 = vector.extract_strided_slice %46 {offsets = [0, 0], sizes = [2, 32], strides = [1, 1]} : vector<2x128xf32> to vector<2x32xf32>
    %48 = vector.extract_strided_slice %46 {offsets = [0, 32], sizes = [2, 32], strides = [1, 1]} : vector<2x128xf32> to vector<2x32xf32>
    %49 = vector.extract_strided_slice %46 {offsets = [0, 64], sizes = [2, 32], strides = [1, 1]} : vector<2x128xf32> to vector<2x32xf32>
    %50 = vector.extract_strided_slice %46 {offsets = [0, 96], sizes = [2, 32], strides = [1, 1]} : vector<2x128xf32> to vector<2x32xf32>
    %51 = arith.mulf %48, %35 : vector<2x32xf32>
    %52 = arith.mulf %47, %49 : vector<2x32xf32>
    %53 = arith.addf %51, %52 : vector<2x32xf32>
    %54 = math.tanh %53 : vector<2x32xf32>
    %55 = arith.mulf %50, %54 : vector<2x32xf32>
    %c2 = arith.constant 2 : index
    %c0_25 = arith.constant 0 : index
    %56 = vector.load %arg17[%c2, %c0_25] : memref<28x32xf32, #tpu.memory_space<vmem>>, vector<2x32xf32>
    tpu.vector_store %arg17[%c2, %c0_25], %55 {strides = array<i32>} : memref<28x32xf32, #tpu.memory_space<vmem>>, vector<2x32xf32>,
    %57 = vector.extract_strided_slice %22 {offsets = [4, 0], sizes = [2, 128], strides = [1, 1]} : vector<8x128xf32> to vector<2x128xf32>
    %cst_26 = arith.constant dense<0.000000e+00> : vector<2x128xf32>
    %58 = tpu.matmul %55, %13, %cst_26 {dimension_numbers = #tpu.dot_dimension_numbers<[1], [0], [0], [1], [0, 0, 1, 1], [], []>} : vector<2x32xf32>, vector<32x128xf32>, vector<2x128xf32> -> vector<2x128xf32>
    %59 = arith.addf %57, %58 : vector<2x128xf32>
    %60 = arith.mulf %59, %8 : vector<2x128xf32>
    %61 = math.tanh %60 : vector<2x128xf32>
    %62 = arith.mulf %61, %8 : vector<2x128xf32>
    %63 = arith.addf %62, %11 : vector<2x128xf32>
    %64 = vector.extract_strided_slice %63 {offsets = [0, 0], sizes = [2, 32], strides = [1, 1]} : vector<2x128xf32> to vector<2x32xf32>
    %65 = vector.extract_strided_slice %63 {offsets = [0, 32], sizes = [2, 32], strides = [1, 1]} : vector<2x128xf32> to vector<2x32xf32>
    %66 = vector.extract_strided_slice %63 {offsets = [0, 64], sizes = [2, 32], strides = [1, 1]} : vector<2x128xf32> to vector<2x32xf32>
    %67 = vector.extract_strided_slice %63 {offsets = [0, 96], sizes = [2, 32], strides = [1, 1]} : vector<2x128xf32> to vector<2x32xf32>
    %68 = arith.mulf %65, %53 : vector<2x32xf32>
    %69 = arith.mulf %64, %66 : vector<2x32xf32>
    %70 = arith.addf %68, %69 : vector<2x32xf32>
    %71 = math.tanh %70 : vector<2x32xf32>
    %72 = arith.mulf %67, %71 : vector<2x32xf32>
    %c4 = arith.constant 4 : index
    %c0_27 = arith.constant 0 : index
    %73 = vector.load %arg17[%c4, %c0_27] : memref<28x32xf32, #tpu.memory_space<vmem>>, vector<2x32xf32>
    tpu.vector_store %arg17[%c4, %c0_27], %72 {strides = array<i32>} : memref<28x32xf32, #tpu.memory_space<vmem>>, vector<2x32xf32>,
    %74 = vector.extract_strided_slice %22 {offsets = [6, 0], sizes = [2, 128], strides = [1, 1]} : vector<8x128xf32> to vector<2x128xf32>
    %cst_28 = arith.constant dense<0.000000e+00> : vector<2x128xf32>
    %75 = tpu.matmul %72, %13, %cst_28 {dimension_numbers = #tpu.dot_dimension_numbers<[1], [0], [0], [1], [0, 0, 1, 1], [], []>} : vector<2x32xf32>, vector<32x128xf32>, vector<2x128xf32> -> vector<2x128xf32>
    %76 = arith.addf %74, %75 : vector<2x128xf32>
    %77 = arith.mulf %76, %8 : vector<2x128xf32>
    %78 = math.tanh %77 : vector<2x128xf32>
    %79 = arith.mulf %78, %8 : vector<2x128xf32>
    %80 = arith.addf %79, %11 : vector<2x128xf32>
    %81 = vector.extract_strided_slice %80 {offsets = [0, 0], sizes = [2, 32], strides = [1, 1]} : vector<2x128xf32> to vector<2x32xf32>
    %82 = vector.extract_strided_slice %80 {offsets = [0, 32], sizes = [2, 32], strides = [1, 1]} : vector<2x128xf32> to vector<2x32xf32>
    %83 = vector.extract_strided_slice %80 {offsets = [0, 64], sizes = [2, 32], strides = [1, 1]} : vector<2x128xf32> to vector<2x32xf32>
    %84 = vector.extract_strided_slice %80 {offsets = [0, 96], sizes = [2, 32], strides = [1, 1]} : vector<2x128xf32> to vector<2x32xf32>
    %85 = arith.mulf %82, %70 : vector<2x32xf32>
    %86 = arith.mulf %81, %83 : vector<2x32xf32>
    %87 = arith.addf %85, %86 : vector<2x32xf32>
    %88 = math.tanh %87 : vector<2x32xf32>
    %89 = arith.mulf %84, %88 : vector<2x32xf32>
    %c6 = arith.constant 6 : index
    %c0_29 = arith.constant 0 : index
    %90 = vector.load %arg17[%c6, %c0_29] : memref<28x32xf32, #tpu.memory_space<vmem>>, vector<2x32xf32>
    tpu.vector_store %arg17[%c6, %c0_29], %89 {strides = array<i32>} : memref<28x32xf32, #tpu.memory_space<vmem>>, vector<2x32xf32>,
    %c0_30 = arith.constant 0 : index
    %c0_31 = arith.constant 0 : index
    %91 = vector.load %arg17[%c0_30, %c0_31] : memref<28x32xf32, #tpu.memory_space<vmem>>, vector<8x32xf32>
    %cst_32 = arith.constant dense<0.000000e+00> : vector<8x128xf32>
    %92 = tpu.matmul %91, %12, %cst_32 {dimension_numbers = #tpu.dot_dimension_numbers<[1], [0], [0], [1], [0, 0, 1, 1], [], []>} : vector<8x32xf32>, vector<32x128xf32>, vector<8x128xf32> -> vector<8x128xf32>
    %93 = arith.addf %22, %92 : vector<8x128xf32>
    %cst_33 = arith.constant 0.000000e+00 : f32
    %94 = vector.broadcast %cst_33 : f32 to vector<2x32xf32>
    %95 = vector.extract_strided_slice %93 {offsets = [0, 0], sizes = [2, 128], strides = [1, 1]} : vector<8x128xf32> to vector<2x128xf32>
    %96 = arith.mulf %95, %8 : vector<2x128xf32>
    %97 = math.tanh %96 : vector<2x128xf32>
    %98 = arith.mulf %97, %8 : vector<2x128xf32>
    %99 = arith.addf %98, %11 : vector<2x128xf32>
    %100 = vector.extract_strided_slice %99 {offsets = [0, 0], sizes = [2, 32], strides = [1, 1]} : vector<2x128xf32> to vector<2x32xf32>
    %101 = vector.extract_strided_slice %99 {offsets = [0, 32], sizes = [2, 32], strides = [1, 1]} : vector<2x128xf32> to vector<2x32xf32>
    %102 = vector.extract_strided_slice %99 {offsets = [0, 64], sizes = [2, 32], strides = [1, 1]} : vector<2x128xf32> to vector<2x32xf32>
    %103 = vector.extract_strided_slice %99 {offsets = [0, 96], sizes = [2, 32], strides = [1, 1]} : vector<2x128xf32> to vector<2x32xf32>
    %104 = arith.mulf %101, %94 : vector<2x32xf32>
    %105 = arith.mulf %100, %102 : vector<2x32xf32>
    %106 = arith.addf %104, %105 : vector<2x32xf32>
    %107 = math.tanh %106 : vector<2x32xf32>
    %108 = arith.mulf %103, %107 : vector<2x32xf32>
    %c8 = arith.constant 8 : index
    %c0_34 = arith.constant 0 : index
    %109 = vector.load %arg17[%c8, %c0_34] : memref<28x32xf32, #tpu.memory_space<vmem>>, vector<2x32xf32>
    tpu.vector_store %arg17[%c8, %c0_34], %108 {strides = array<i32>} : memref<28x32xf32, #tpu.memory_space<vmem>>, vector<2x32xf32>,
    %c2_35 = arith.constant 2 : index
    %c0_36 = arith.constant 0 : index
    %110 = vector.load %arg18[%c2_35, %c0_36] : memref<4x32xf32, #tpu.memory_space<vmem>>, vector<2x32xf32>
    tpu.vector_store %arg18[%c2_35, %c0_36], %108 {strides = array<i32>} : memref<4x32xf32, #tpu.memory_space<vmem>>, vector<2x32xf32>,
    %111 = vector.extract_strided_slice %93 {offsets = [2, 0], sizes = [2, 128], strides = [1, 1]} : vector<8x128xf32> to vector<2x128xf32>
    %cst_37 = arith.constant dense<0.000000e+00> : vector<2x128xf32>
    %112 = tpu.matmul %108, %13, %cst_37 {dimension_numbers = #tpu.dot_dimension_numbers<[1], [0], [0], [1], [0, 0, 1, 1], [], []>} : vector<2x32xf32>, vector<32x128xf32>, vector<2x128xf32> -> vector<2x128xf32>
    %113 = arith.addf %111, %112 : vector<2x128xf32>
    %114 = arith.mulf %113, %8 : vector<2x128xf32>
    %115 = math.tanh %114 : vector<2x128xf32>
    %116 = arith.mulf %115, %8 : vector<2x128xf32>
    %117 = arith.addf %116, %11 : vector<2x128xf32>
    %118 = vector.extract_strided_slice %117 {offsets = [0, 0], sizes = [2, 32], strides = [1, 1]} : vector<2x128xf32> to vector<2x32xf32>
    %119 = vector.extract_strided_slice %117 {offsets = [0, 32], sizes = [2, 32], strides = [1, 1]} : vector<2x128xf32> to vector<2x32xf32>
    %120 = vector.extract_strided_slice %117 {offsets = [0, 64], sizes = [2, 32], strides = [1, 1]} : vector<2x128xf32> to vector<2x32xf32>
    %121 = vector.extract_strided_slice %117 {offsets = [0, 96], sizes = [2, 32], strides = [1, 1]} : vector<2x128xf32> to vector<2x32xf32>
    %122 = arith.mulf %119, %106 : vector<2x32xf32>
    %123 = arith.mulf %118, %120 : vector<2x32xf32>
    %124 = arith.addf %122, %123 : vector<2x32xf32>
    %125 = math.tanh %124 : vector<2x32xf32>
    %126 = arith.mulf %121, %125 : vector<2x32xf32>
    %c10 = arith.constant 10 : index
    %c0_38 = arith.constant 0 : index
    %127 = vector.load %arg17[%c10, %c0_38] : memref<28x32xf32, #tpu.memory_space<vmem>>, vector<2x32xf32>
    tpu.vector_store %arg17[%c10, %c0_38], %126 {strides = array<i32>} : memref<28x32xf32, #tpu.memory_space<vmem>>, vector<2x32xf32>,
    %128 = vector.extract_strided_slice %93 {offsets = [4, 0], sizes = [2, 128], strides = [1, 1]} : vector<8x128xf32> to vector<2x128xf32>
    %cst_39 = arith.constant dense<0.000000e+00> : vector<2x128xf32>
    %129 = tpu.matmul %126, %13, %cst_39 {dimension_numbers = #tpu.dot_dimension_numbers<[1], [0], [0], [1], [0, 0, 1, 1], [], []>} : vector<2x32xf32>, vector<32x128xf32>, vector<2x128xf32> -> vector<2x128xf32>
    %130 = arith.addf %128, %129 : vector<2x128xf32>
    %131 = arith.mulf %130, %8 : vector<2x128xf32>
    %132 = math.tanh %131 : vector<2x128xf32>
    %133 = arith.mulf %132, %8 : vector<2x128xf32>
    %134 = arith.addf %133, %11 : vector<2x128xf32>
    %135 = vector.extract_strided_slice %134 {offsets = [0, 0], sizes = [2, 32], strides = [1, 1]} : vector<2x128xf32> to vector<2x32xf32>
    %136 = vector.extract_strided_slice %134 {offsets = [0, 32], sizes = [2, 32], strides = [1, 1]} : vector<2x128xf32> to vector<2x32xf32>
    %137 = vector.extract_strided_slice %134 {offsets = [0, 64], sizes = [2, 32], strides = [1, 1]} : vector<2x128xf32> to vector<2x32xf32>
    %138 = vector.extract_strided_slice %134 {offsets = [0, 96], sizes = [2, 32], strides = [1, 1]} : vector<2x128xf32> to vector<2x32xf32>
    %139 = arith.mulf %136, %124 : vector<2x32xf32>
    %140 = arith.mulf %135, %137 : vector<2x32xf32>
    %141 = arith.addf %139, %140 : vector<2x32xf32>
    %142 = math.tanh %141 : vector<2x32xf32>
    %143 = arith.mulf %138, %142 : vector<2x32xf32>
    %c12 = arith.constant 12 : index
    %c0_40 = arith.constant 0 : index
    %144 = vector.load %arg17[%c12, %c0_40] : memref<28x32xf32, #tpu.memory_space<vmem>>, vector<2x32xf32>
    tpu.vector_store %arg17[%c12, %c0_40], %143 {strides = array<i32>} : memref<28x32xf32, #tpu.memory_space<vmem>>, vector<2x32xf32>,
    %145 = vector.extract_strided_slice %93 {offsets = [6, 0], sizes = [2, 128], strides = [1, 1]} : vector<8x128xf32> to vector<2x128xf32>
    %cst_41 = arith.constant dense<0.000000e+00> : vector<2x128xf32>
    %146 = tpu.matmul %143, %13, %cst_41 {dimension_numbers = #tpu.dot_dimension_numbers<[1], [0], [0], [1], [0, 0, 1, 1], [], []>} : vector<2x32xf32>, vector<32x128xf32>, vector<2x128xf32> -> vector<2x128xf32>
    %147 = arith.addf %145, %146 : vector<2x128xf32>
    %148 = arith.mulf %147, %8 : vector<2x128xf32>
    %149 = math.tanh %148 : vector<2x128xf32>
    %150 = arith.mulf %149, %8 : vector<2x128xf32>
    %151 = arith.addf %150, %11 : vector<2x128xf32>
    %152 = vector.extract_strided_slice %151 {offsets = [0, 0], sizes = [2, 32], strides = [1, 1]} : vector<2x128xf32> to vector<2x32xf32>
    %153 = vector.extract_strided_slice %151 {offsets = [0, 32], sizes = [2, 32], strides = [1, 1]} : vector<2x128xf32> to vector<2x32xf32>
    %154 = vector.extract_strided_slice %151 {offsets = [0, 64], sizes = [2, 32], strides = [1, 1]} : vector<2x128xf32> to vector<2x32xf32>
    %155 = vector.extract_strided_slice %151 {offsets = [0, 96], sizes = [2, 32], strides = [1, 1]} : vector<2x128xf32> to vector<2x32xf32>
    %156 = arith.mulf %153, %141 : vector<2x32xf32>
    %157 = arith.mulf %152, %154 : vector<2x32xf32>
    %158 = arith.addf %156, %157 : vector<2x32xf32>
    %159 = math.tanh %158 : vector<2x32xf32>
    %160 = arith.mulf %155, %159 : vector<2x32xf32>
    %c14 = arith.constant 14 : index
    %c0_42 = arith.constant 0 : index
    %161 = vector.load %arg17[%c14, %c0_42] : memref<28x32xf32, #tpu.memory_space<vmem>>, vector<2x32xf32>
    tpu.vector_store %arg17[%c14, %c0_42], %160 {strides = array<i32>} : memref<28x32xf32, #tpu.memory_space<vmem>>, vector<2x32xf32>,
    %c0_43 = arith.constant 0 : index
    %c0_44 = arith.constant 0 : index
    %162 = vector.load %arg18[%c0_43, %c0_44] : memref<4x32xf32, #tpu.memory_space<vmem>>, vector<4x32xf32>
    %c0_45 = arith.constant 0 : index
    %c0_46 = arith.constant 0 : index
    %163 = vector.load %arg8[%c0_45, %c0_46] : memref<32x128xf32, #tpu.memory_space<vmem>>, vector<32x128xf32>
    %cst_47 = arith.constant dense<0.000000e+00> : vector<4x128xf32>
    %164 = tpu.matmul %162, %163, %cst_47 {dimension_numbers = #tpu.dot_dimension_numbers<[1], [0], [0], [1], [0, 0, 1, 1], [], []>} : vector<4x32xf32>, vector<32x128xf32>, vector<4x128xf32> -> vector<4x128xf32>
    %c0_48 = arith.constant 0 : index
    %c0_49 = arith.constant 0 : index
    %165 = vector.load %arg10[%c0_48, %c0_49] : memref<1x128xf32, #tpu.memory_space<vmem>>, vector<1x128xf32>
    %166 = vector.broadcast %165 : vector<1x128xf32> to vector<4x128xf32>
    %167 = arith.addf %164, %166 : vector<4x128xf32>
    %cst_50 = arith.constant 0.000000e+00 : f32
    %168 = vector.broadcast %cst_50 : f32 to vector<2x32xf32>
    %169 = vector.extract_strided_slice %167 {offsets = [0, 0], sizes = [2, 128], strides = [1, 1]} : vector<4x128xf32> to vector<2x128xf32>
    %170 = arith.mulf %169, %8 : vector<2x128xf32>
    %171 = math.tanh %170 : vector<2x128xf32>
    %172 = arith.mulf %171, %8 : vector<2x128xf32>
    %173 = arith.addf %172, %11 : vector<2x128xf32>
    %174 = vector.extract_strided_slice %173 {offsets = [0, 0], sizes = [2, 32], strides = [1, 1]} : vector<2x128xf32> to vector<2x32xf32>
    %175 = vector.extract_strided_slice %173 {offsets = [0, 32], sizes = [2, 32], strides = [1, 1]} : vector<2x128xf32> to vector<2x32xf32>
    %176 = vector.extract_strided_slice %173 {offsets = [0, 64], sizes = [2, 32], strides = [1, 1]} : vector<2x128xf32> to vector<2x32xf32>
    %177 = vector.extract_strided_slice %173 {offsets = [0, 96], sizes = [2, 32], strides = [1, 1]} : vector<2x128xf32> to vector<2x32xf32>
    %178 = arith.mulf %175, %168 : vector<2x32xf32>
    %179 = arith.mulf %174, %176 : vector<2x32xf32>
    %180 = arith.addf %178, %179 : vector<2x32xf32>
    %181 = math.tanh %180 : vector<2x32xf32>
    %182 = arith.mulf %177, %181 : vector<2x32xf32>
    %c0_51 = arith.constant 0 : index
    %c0_52 = arith.constant 0 : index
    %183 = vector.load %arg19[%c0_51, %c0_52] : memref<4x32xf32, #tpu.memory_space<vmem>>, vector<2x32xf32>
    tpu.vector_store %arg19[%c0_51, %c0_52], %182 {strides = array<i32>} : memref<4x32xf32, #tpu.memory_space<vmem>>, vector<2x32xf32>,
    %184 = vector.extract_strided_slice %167 {offsets = [2, 0], sizes = [2, 128], strides = [1, 1]} : vector<4x128xf32> to vector<2x128xf32>
    %cst_53 = arith.constant dense<0.000000e+00> : vector<2x128xf32>
    %185 = tpu.matmul %182, %16, %cst_53 {dimension_numbers = #tpu.dot_dimension_numbers<[1], [0], [0], [1], [0, 0, 1, 1], [], []>} : vector<2x32xf32>, vector<32x128xf32>, vector<2x128xf32> -> vector<2x128xf32>
    %186 = arith.addf %184, %185 : vector<2x128xf32>
    %187 = arith.mulf %186, %8 : vector<2x128xf32>
    %188 = math.tanh %187 : vector<2x128xf32>
    %189 = arith.mulf %188, %8 : vector<2x128xf32>
    %190 = arith.addf %189, %11 : vector<2x128xf32>
    %191 = vector.extract_strided_slice %190 {offsets = [0, 0], sizes = [2, 32], strides = [1, 1]} : vector<2x128xf32> to vector<2x32xf32>
    %192 = vector.extract_strided_slice %190 {offsets = [0, 32], sizes = [2, 32], strides = [1, 1]} : vector<2x128xf32> to vector<2x32xf32>
    %193 = vector.extract_strided_slice %190 {offsets = [0, 64], sizes = [2, 32], strides = [1, 1]} : vector<2x128xf32> to vector<2x32xf32>
    %194 = vector.extract_strided_slice %190 {offsets = [0, 96], sizes = [2, 32], strides = [1, 1]} : vector<2x128xf32> to vector<2x32xf32>
    %195 = arith.mulf %192, %180 : vector<2x32xf32>
    %196 = arith.mulf %191, %193 : vector<2x32xf32>
    %197 = arith.addf %195, %196 : vector<2x32xf32>
    %198 = math.tanh %197 : vector<2x32xf32>
    %199 = arith.mulf %194, %198 : vector<2x32xf32>
    %c2_54 = arith.constant 2 : index
    %c0_55 = arith.constant 0 : index
    %200 = vector.load %arg19[%c2_54, %c0_55] : memref<4x32xf32, #tpu.memory_space<vmem>>, vector<2x32xf32>
    tpu.vector_store %arg19[%c2_54, %c0_55], %199 {strides = array<i32>} : memref<4x32xf32, #tpu.memory_space<vmem>>, vector<2x32xf32>,
    %c0_56 = arith.constant 0 : index
    %c0_57 = arith.constant 0 : index
    %201 = vector.load %arg6[%c0_56, %c0_57] : memref<32x128xf32, #tpu.memory_space<vmem>>, vector<32x128xf32>
    %cst_58 = arith.constant dense<0.000000e+00> : vector<2x128xf32>
    %202 = tpu.matmul %89, %14, %cst_58 {dimension_numbers = #tpu.dot_dimension_numbers<[1], [0], [0], [1], [0, 0, 1, 1], [], []>} : vector<2x32xf32>, vector<32x128xf32>, vector<2x128xf32> -> vector<2x128xf32>
    %203 = vector.broadcast %15 : vector<1x128xf32> to vector<2x128xf32>
    %204 = arith.addf %202, %203 : vector<2x128xf32>
    %205 = arith.mulf %204, %8 : vector<2x128xf32>
    %206 = math.tanh %205 : vector<2x128xf32>
    %207 = arith.mulf %206, %8 : vector<2x128xf32>
    %208 = arith.addf %207, %11 : vector<2x128xf32>
    %209 = vector.extract_strided_slice %208 {offsets = [0, 0], sizes = [2, 32], strides = [1, 1]} : vector<2x128xf32> to vector<2x32xf32>
    %210 = vector.extract_strided_slice %208 {offsets = [0, 32], sizes = [2, 32], strides = [1, 1]} : vector<2x128xf32> to vector<2x32xf32>
    %211 = vector.extract_strided_slice %208 {offsets = [0, 64], sizes = [2, 32], strides = [1, 1]} : vector<2x128xf32> to vector<2x32xf32>
    %212 = vector.extract_strided_slice %208 {offsets = [0, 96], sizes = [2, 32], strides = [1, 1]} : vector<2x128xf32> to vector<2x32xf32>
    %213 = arith.mulf %210, %87 : vector<2x32xf32>
    %214 = arith.mulf %209, %211 : vector<2x32xf32>
    %215 = arith.addf %213, %214 : vector<2x32xf32>
    %216 = math.tanh %215 : vector<2x32xf32>
    %217 = arith.mulf %212, %216 : vector<2x32xf32>
    %c16 = arith.constant 16 : index
    %c0_59 = arith.constant 0 : index
    %218 = vector.load %arg17[%c16, %c0_59] : memref<28x32xf32, #tpu.memory_space<vmem>>, vector<2x32xf32>
    tpu.vector_store %arg17[%c16, %c0_59], %217 {strides = array<i32>} : memref<28x32xf32, #tpu.memory_space<vmem>>, vector<2x32xf32>,
    %cst_60 = arith.constant dense<0.000000e+00> : vector<2x128xf32>
    %219 = tpu.matmul %217, %14, %cst_60 {dimension_numbers = #tpu.dot_dimension_numbers<[1], [0], [0], [1], [0, 0, 1, 1], [], []>} : vector<2x32xf32>, vector<32x128xf32>, vector<2x128xf32> -> vector<2x128xf32>
    %220 = vector.broadcast %15 : vector<1x128xf32> to vector<2x128xf32>
    %221 = arith.addf %219, %220 : vector<2x128xf32>
    %222 = arith.mulf %221, %8 : vector<2x128xf32>
    %223 = math.tanh %222 : vector<2x128xf32>
    %224 = arith.mulf %223, %8 : vector<2x128xf32>
    %225 = arith.addf %224, %11 : vector<2x128xf32>
    %226 = vector.extract_strided_slice %225 {offsets = [0, 0], sizes = [2, 32], strides = [1, 1]} : vector<2x128xf32> to vector<2x32xf32>
    %227 = vector.extract_strided_slice %225 {offsets = [0, 32], sizes = [2, 32], strides = [1, 1]} : vector<2x128xf32> to vector<2x32xf32>
    %228 = vector.extract_strided_slice %225 {offsets = [0, 64], sizes = [2, 32], strides = [1, 1]} : vector<2x128xf32> to vector<2x32xf32>
    %229 = vector.extract_strided_slice %225 {offsets = [0, 96], sizes = [2, 32], strides = [1, 1]} : vector<2x128xf32> to vector<2x32xf32>
    %230 = arith.mulf %227, %215 : vector<2x32xf32>
    %231 = arith.mulf %226, %228 : vector<2x32xf32>
    %232 = arith.addf %230, %231 : vector<2x32xf32>
    %233 = math.tanh %232 : vector<2x32xf32>
    %234 = arith.mulf %229, %233 : vector<2x32xf32>
    %c18 = arith.constant 18 : index
    %c0_61 = arith.constant 0 : index
    %235 = vector.load %arg17[%c18, %c0_61] : memref<28x32xf32, #tpu.memory_space<vmem>>, vector<2x32xf32>
    tpu.vector_store %arg17[%c18, %c0_61], %234 {strides = array<i32>} : memref<28x32xf32, #tpu.memory_space<vmem>>, vector<2x32xf32>,
    %cst_62 = arith.constant dense<0.000000e+00> : vector<2x128xf32>
    %236 = tpu.matmul %234, %14, %cst_62 {dimension_numbers = #tpu.dot_dimension_numbers<[1], [0], [0], [1], [0, 0, 1, 1], [], []>} : vector<2x32xf32>, vector<32x128xf32>, vector<2x128xf32> -> vector<2x128xf32>
    %237 = vector.broadcast %15 : vector<1x128xf32> to vector<2x128xf32>
    %238 = arith.addf %236, %237 : vector<2x128xf32>
    %239 = arith.mulf %238, %8 : vector<2x128xf32>
    %240 = math.tanh %239 : vector<2x128xf32>
    %241 = arith.mulf %240, %8 : vector<2x128xf32>
    %242 = arith.addf %241, %11 : vector<2x128xf32>
    %243 = vector.extract_strided_slice %242 {offsets = [0, 0], sizes = [2, 32], strides = [1, 1]} : vector<2x128xf32> to vector<2x32xf32>
    %244 = vector.extract_strided_slice %242 {offsets = [0, 32], sizes = [2, 32], strides = [1, 1]} : vector<2x128xf32> to vector<2x32xf32>
    %245 = vector.extract_strided_slice %242 {offsets = [0, 64], sizes = [2, 32], strides = [1, 1]} : vector<2x128xf32> to vector<2x32xf32>
    %246 = vector.extract_strided_slice %242 {offsets = [0, 96], sizes = [2, 32], strides = [1, 1]} : vector<2x128xf32> to vector<2x32xf32>
    %247 = arith.mulf %244, %232 : vector<2x32xf32>
    %248 = arith.mulf %243, %245 : vector<2x32xf32>
    %249 = arith.addf %247, %248 : vector<2x32xf32>
    %250 = math.tanh %249 : vector<2x32xf32>
    %251 = arith.mulf %246, %250 : vector<2x32xf32>
    %c20 = arith.constant 20 : index
    %c0_63 = arith.constant 0 : index
    %252 = vector.load %arg17[%c20, %c0_63] : memref<28x32xf32, #tpu.memory_space<vmem>>, vector<2x32xf32>
    tpu.vector_store %arg17[%c20, %c0_63], %251 {strides = array<i32>} : memref<28x32xf32, #tpu.memory_space<vmem>>, vector<2x32xf32>,
    %c16_64 = arith.constant 16 : index
    %c0_65 = arith.constant 0 : index
    %253 = vector.load %arg17[%c16_64, %c0_65] : memref<28x32xf32, #tpu.memory_space<vmem>>, vector<6x32xf32>
    %cst_66 = arith.constant dense<0.000000e+00> : vector<6x128xf32>
    %254 = tpu.matmul %253, %201, %cst_66 {dimension_numbers = #tpu.dot_dimension_numbers<[1], [0], [0], [1], [0, 0, 1, 1], [], []>} : vector<6x32xf32>, vector<32x128xf32>, vector<6x128xf32> -> vector<6x128xf32>
    %cst_67 = arith.constant dense<0.000000e+00> : vector<2x128xf32>
    %255 = tpu.matmul %160, %14, %cst_67 {dimension_numbers = #tpu.dot_dimension_numbers<[1], [0], [0], [1], [0, 0, 1, 1], [], []>} : vector<2x32xf32>, vector<32x128xf32>, vector<2x128xf32> -> vector<2x128xf32>
    %256 = vector.broadcast %15 : vector<1x128xf32> to vector<2x128xf32>
    %257 = arith.addf %255, %256 : vector<2x128xf32>
    %258 = vector.extract_strided_slice %254 {offsets = [0, 0], sizes = [2, 128], strides = [1, 1]} : vector<6x128xf32> to vector<2x128xf32>
    %259 = arith.addf %257, %258 : vector<2x128xf32>
    %260 = arith.mulf %259, %8 : vector<2x128xf32>
    %261 = math.tanh %260 : vector<2x128xf32>
    %262 = arith.mulf %261, %8 : vector<2x128xf32>
    %263 = arith.addf %262, %11 : vector<2x128xf32>
    %264 = vector.extract_strided_slice %263 {offsets = [0, 0], sizes = [2, 32], strides = [1, 1]} : vector<2x128xf32> to vector<2x32xf32>
    %265 = vector.extract_strided_slice %263 {offsets = [0, 32], sizes = [2, 32], strides = [1, 1]} : vector<2x128xf32> to vector<2x32xf32>
    %266 = vector.extract_strided_slice %263 {offsets = [0, 64], sizes = [2, 32], strides = [1, 1]} : vector<2x128xf32> to vector<2x32xf32>
    %267 = vector.extract_strided_slice %263 {offsets = [0, 96], sizes = [2, 32], strides = [1, 1]} : vector<2x128xf32> to vector<2x32xf32>
    %268 = arith.mulf %265, %158 : vector<2x32xf32>
    %269 = arith.mulf %264, %266 : vector<2x32xf32>
    %270 = arith.addf %268, %269 : vector<2x32xf32>
    %271 = math.tanh %270 : vector<2x32xf32>
    %272 = arith.mulf %267, %271 : vector<2x32xf32>
    %c22 = arith.constant 22 : index
    %c0_68 = arith.constant 0 : index
    %273 = vector.load %arg17[%c22, %c0_68] : memref<28x32xf32, #tpu.memory_space<vmem>>, vector<2x32xf32>
    tpu.vector_store %arg17[%c22, %c0_68], %272 {strides = array<i32>} : memref<28x32xf32, #tpu.memory_space<vmem>>, vector<2x32xf32>,
    %cst_69 = arith.constant dense<0.000000e+00> : vector<2x128xf32>
    %274 = tpu.matmul %272, %14, %cst_69 {dimension_numbers = #tpu.dot_dimension_numbers<[1], [0], [0], [1], [0, 0, 1, 1], [], []>} : vector<2x32xf32>, vector<32x128xf32>, vector<2x128xf32> -> vector<2x128xf32>
    %275 = vector.broadcast %15 : vector<1x128xf32> to vector<2x128xf32>
    %276 = arith.addf %274, %275 : vector<2x128xf32>
    %277 = vector.extract_strided_slice %254 {offsets = [2, 0], sizes = [2, 128], strides = [1, 1]} : vector<6x128xf32> to vector<2x128xf32>
    %278 = arith.addf %276, %277 : vector<2x128xf32>
    %279 = arith.mulf %278, %8 : vector<2x128xf32>
    %280 = math.tanh %279 : vector<2x128xf32>
    %281 = arith.mulf %280, %8 : vector<2x128xf32>
    %282 = arith.addf %281, %11 : vector<2x128xf32>
    %283 = vector.extract_strided_slice %282 {offsets = [0, 0], sizes = [2, 32], strides = [1, 1]} : vector<2x128xf32> to vector<2x32xf32>
    %284 = vector.extract_strided_slice %282 {offsets = [0, 32], sizes = [2, 32], strides = [1, 1]} : vector<2x128xf32> to vector<2x32xf32>
    %285 = vector.extract_strided_slice %282 {offsets = [0, 64], sizes = [2, 32], strides = [1, 1]} : vector<2x128xf32> to vector<2x32xf32>
    %286 = vector.extract_strided_slice %282 {offsets = [0, 96], sizes = [2, 32], strides = [1, 1]} : vector<2x128xf32> to vector<2x32xf32>
    %287 = arith.mulf %284, %270 : vector<2x32xf32>
    %288 = arith.mulf %283, %285 : vector<2x32xf32>
    %289 = arith.addf %287, %288 : vector<2x32xf32>
    %290 = math.tanh %289 : vector<2x32xf32>
    %291 = arith.mulf %286, %290 : vector<2x32xf32>
    %c24 = arith.constant 24 : index
    %c0_70 = arith.constant 0 : index
    %292 = vector.load %arg17[%c24, %c0_70] : memref<28x32xf32, #tpu.memory_space<vmem>>, vector<2x32xf32>
    tpu.vector_store %arg17[%c24, %c0_70], %291 {strides = array<i32>} : memref<28x32xf32, #tpu.memory_space<vmem>>, vector<2x32xf32>,
    %cst_71 = arith.constant dense<0.000000e+00> : vector<2x128xf32>
    %293 = tpu.matmul %291, %14, %cst_71 {dimension_numbers = #tpu.dot_dimension_numbers<[1], [0], [0], [1], [0, 0, 1, 1], [], []>} : vector<2x32xf32>, vector<32x128xf32>, vector<2x128xf32> -> vector<2x128xf32>
    %294 = vector.broadcast %15 : vector<1x128xf32> to vector<2x128xf32>
    %295 = arith.addf %293, %294 : vector<2x128xf32>
    %296 = vector.extract_strided_slice %254 {offsets = [4, 0], sizes = [2, 128], strides = [1, 1]} : vector<6x128xf32> to vector<2x128xf32>
    %297 = arith.addf %295, %296 : vector<2x128xf32>
    %298 = arith.mulf %297, %8 : vector<2x128xf32>
    %299 = math.tanh %298 : vector<2x128xf32>
    %300 = arith.mulf %299, %8 : vector<2x128xf32>
    %301 = arith.addf %300, %11 : vector<2x128xf32>
    %302 = vector.extract_strided_slice %301 {offsets = [0, 0], sizes = [2, 32], strides = [1, 1]} : vector<2x128xf32> to vector<2x32xf32>
    %303 = vector.extract_strided_slice %301 {offsets = [0, 32], sizes = [2, 32], strides = [1, 1]} : vector<2x128xf32> to vector<2x32xf32>
    %304 = vector.extract_strided_slice %301 {offsets = [0, 64], sizes = [2, 32], strides = [1, 1]} : vector<2x128xf32> to vector<2x32xf32>
    %305 = vector.extract_strided_slice %301 {offsets = [0, 96], sizes = [2, 32], strides = [1, 1]} : vector<2x128xf32> to vector<2x32xf32>
    %306 = arith.mulf %303, %289 : vector<2x32xf32>
    %307 = arith.mulf %302, %304 : vector<2x32xf32>
    %308 = arith.addf %306, %307 : vector<2x32xf32>
    %309 = math.tanh %308 : vector<2x32xf32>
    %310 = arith.mulf %305, %309 : vector<2x32xf32>
    %c26 = arith.constant 26 : index
    %c0_72 = arith.constant 0 : index
    %311 = vector.load %arg17[%c26, %c0_72] : memref<28x32xf32, #tpu.memory_space<vmem>>, vector<2x32xf32>
    tpu.vector_store %arg17[%c26, %c0_72], %310 {strides = array<i32>} : memref<28x32xf32, #tpu.memory_space<vmem>>, vector<2x32xf32>,
    %c0_73 = arith.constant 0 : index
    %c0_74 = arith.constant 0 : index
    %312 = vector.load %arg17[%c0_73, %c0_74] : memref<28x32xf32, #tpu.memory_space<vmem>>, vector<28x32xf32>
    %c0_75 = arith.constant 0 : index
    %c0_76 = arith.constant 0 : index
    %313 = vector.load %arg11[%c0_75, %c0_76] : memref<32x12xf32, #tpu.memory_space<vmem>>, vector<32x12xf32>
    %c0_77 = arith.constant 0 : index
    %c0_78 = arith.constant 0 : index
    %314 = vector.load %arg12[%c0_77, %c0_78] : memref<1x12xf32, #tpu.memory_space<vmem>>, vector<1x12xf32>
    %cst_79 = arith.constant dense<0.000000e+00> : vector<28x12xf32>
    %315 = tpu.matmul %312, %313, %cst_79 {dimension_numbers = #tpu.dot_dimension_numbers<[1], [0], [0], [1], [0, 0, 1, 1], [], []>} : vector<28x32xf32>, vector<32x12xf32>, vector<28x12xf32> -> vector<28x12xf32>
    %316 = vector.broadcast %314 : vector<1x12xf32> to vector<28x12xf32>
    %317 = arith.addf %315, %316 : vector<28x12xf32>
    %318 = tpu.iota {dimensions = array<i32: 1>} : vector<28x12xi32>
    %c6_i32 = arith.constant 6 : i32
    %319 = vector.broadcast %c6_i32 : i32 to vector<28x12xi32>
    %320 = arith.cmpi slt, %318, %319 : vector<28x12xi32>
    %cst_80 = arith.constant 0.000000e+00 : f32
    %321 = vector.broadcast %cst_80 : f32 to vector<28x12xf32>
    %322 = arith.maximumf %317, %321 : vector<28x12xf32>
    %323 = vector.broadcast %cst_80 : f32 to vector<28x12xf32>
    %324 = arith.subf %317, %323 : vector<28x12xf32>
    %325 = arith.cmpf one, %324, %324 : vector<28x12xf32>
    %326 = vector.broadcast %cst_80 : f32 to vector<28x12xf32>
    %327 = arith.addf %317, %326 : vector<28x12xf32>
    %328 = math.absf %324 : vector<28x12xf32>
    %cst_81 = arith.constant 0.000000e+00 : f32
    %329 = vector.broadcast %cst_81 : f32 to vector<28x12xf32>
    %330 = arith.subf %329, %328 : vector<28x12xf32>
    %331 = math.exp %330 : vector<28x12xf32>
    %332 = math.log1p %331 : vector<28x12xf32>
    %333 = arith.addf %322, %332 : vector<28x12xf32>
    %334 = arith.select %325, %327, %333 : vector<28x12xi1>, vector<28x12xf32>
    %335 = arith.select %320, %317, %334 : vector<28x12xi1>, vector<28x12xf32>
    %c0_82 = arith.constant 0 : index
    %c0_83 = arith.constant 0 : index
    %336 = vector.load %arg15[%c0_82, %c0_83] : memref<28x12xf32, #tpu.memory_space<vmem>>, vector<28x12xf32>
    tpu.vector_store %arg15[%c0_82, %c0_83], %335 {strides = array<i32>} : memref<28x12xf32, #tpu.memory_space<vmem>>, vector<28x12xf32>,
    %c0_84 = arith.constant 0 : index
    %c0_85 = arith.constant 0 : index
    %337 = vector.load %arg19[%c0_84, %c0_85] : memref<4x32xf32, #tpu.memory_space<vmem>>, vector<4x32xf32>
    %c0_86 = arith.constant 0 : index
    %c0_87 = arith.constant 0 : index
    %338 = vector.load %arg13[%c0_86, %c0_87] : memref<32x12xf32, #tpu.memory_space<vmem>>, vector<32x12xf32>
    %c0_88 = arith.constant 0 : index
    %c0_89 = arith.constant 0 : index
    %339 = vector.load %arg14[%c0_88, %c0_89] : memref<1x12xf32, #tpu.memory_space<vmem>>, vector<1x12xf32>
    %cst_90 = arith.constant dense<0.000000e+00> : vector<4x12xf32>
    %340 = tpu.matmul %337, %338, %cst_90 {dimension_numbers = #tpu.dot_dimension_numbers<[1], [0], [0], [1], [0, 0, 1, 1], [], []>} : vector<4x32xf32>, vector<32x12xf32>, vector<4x12xf32> -> vector<4x12xf32>
    %341 = vector.broadcast %339 : vector<1x12xf32> to vector<4x12xf32>
    %342 = arith.addf %340, %341 : vector<4x12xf32>
    %343 = tpu.iota {dimensions = array<i32: 1>} : vector<4x12xi32>
    %c6_i32_91 = arith.constant 6 : i32
    %344 = vector.broadcast %c6_i32_91 : i32 to vector<4x12xi32>
    %345 = arith.cmpi slt, %343, %344 : vector<4x12xi32>
    %cst_92 = arith.constant 0.000000e+00 : f32
    %346 = vector.broadcast %cst_92 : f32 to vector<4x12xf32>
    %347 = arith.maximumf %342, %346 : vector<4x12xf32>
    %348 = vector.broadcast %cst_92 : f32 to vector<4x12xf32>
    %349 = arith.subf %342, %348 : vector<4x12xf32>
    %350 = arith.cmpf one, %349, %349 : vector<4x12xf32>
    %351 = vector.broadcast %cst_92 : f32 to vector<4x12xf32>
    %352 = arith.addf %342, %351 : vector<4x12xf32>
    %353 = math.absf %349 : vector<4x12xf32>
    %cst_93 = arith.constant 0.000000e+00 : f32
    %354 = vector.broadcast %cst_93 : f32 to vector<4x12xf32>
    %355 = arith.subf %354, %353 : vector<4x12xf32>
    %356 = math.exp %355 : vector<4x12xf32>
    %357 = math.log1p %356 : vector<4x12xf32>
    %358 = arith.addf %347, %357 : vector<4x12xf32>
    %359 = arith.select %350, %352, %358 : vector<4x12xi1>, vector<4x12xf32>
    %360 = arith.select %345, %342, %359 : vector<4x12xi1>, vector<4x12xf32>
    %c0_94 = arith.constant 0 : index
    %c0_95 = arith.constant 0 : index
    %361 = vector.load %arg16[%c0_94, %c0_95] : memref<4x12xf32, #tpu.memory_space<vmem>>, vector<4x12xf32>
    tpu.vector_store %arg16[%c0_94, %c0_95], %360 {strides = array<i32>} : memref<4x12xf32, #tpu.memory_space<vmem>>, vector<4x12xf32>,
    return
  }
}

</mosaic_0001>

<bundles_post_ra>
// kernel: pose_rnn_forward.4
= control target key start
LH: loop header
LB: loop body
LE: loop exit
PB: predicated region body
PF: predicated region fallthrough
CT: control target
= control target key end

     0   :  { %vm254_vm0 = vcmask 130048   ;;  %vm832_vm1 = vcmask 64512   ;;  %s1577_s1 = inlined_call_operand.vmem [shape: bf16[16,8], index: 1, kind: input, shape index: {}]   ;;  %s1578_s0 = inlined_call_operand.vmem [shape: bf16[512,16], index: 0, kind: input, shape index: {}]   ;;  %s1579_s2 = inlined_call_operand.vmem [shape: f32[1,8], index: 2, kind: input, shape index: {}]   ;;  %s1580_s3 = inlined_call_operand.vmem [shape: f32[512,8], index: 3, kind: output, shape index: {}]  }
   0x1   :  { %v1068_v0 = vld [vmem:[%s1577_s1] sm:$0xff]   ;;  %v1071_v3 = vld [vmem:[%s1578_s0 + $0x8] sm:$0xff]   ;;  %v1073_v5 = vld [vmem:[%s1578_s0 + $0x10] sm:$0xff]  }
   0x2   :  { %v1069_v1 = vld [vmem:[%s1578_s0] sm:$0xff]   ;;  %1000 = vmatprep.subr.bf16.mxu0 %v1068_v0  ;;  %1066 = vmatprep.subr.bf16.mxu1 %v1068_v0  ;;  %v1072_v4 = vld [vmem:[%s1578_s0 + $0x88] sm:$0xff]   ;;  %v1074_v6 = vld [vmem:[%s1578_s0 + $0x90] sm:$0xff]  }
   0x3   :  { %v1070_v2 = vld [vmem:[%s1578_s0 + $0x80] sm:$0xff]   ;;  %1001 = vmatpush3.bf16.msra.mxu0 %v1068_v0  ;;  %1067 = vmatpush3.bf16.msra.mxu1 %v1068_v0  ;;  %v1075_v7 = vld [vmem:[%s1578_s0 + $0x18] sm:$0xff]   ;;  %v1079_v11 = vld [vmem:[%s1578_s0 + $0x28] sm:$0xff]  }
   0x4   :  { %1002 = vmatprep.mubr.msk.bf16.mxu0 %vm254_vm0, %v1069_v1  ;;  %1034 = vmatprep.mubr.msk.bf16.mxu1 %vm254_vm0, %v1070_v2  ;;  %v1076_v8 = vld [vmem:[%s1578_s0 + $0x98] sm:$0xff]   ;;  %v1077_v9 = vld [vmem:[%s1578_s0 + $0x20] sm:$0xff]   ;;  %v1080_v12 = vld [vmem:[%s1578_s0 + $0xa8] sm:$0xff]  }
   0x5   :  { %v1078_v10 = vld [vmem:[%s1578_s0 + $0xa0] sm:$0xff]   ;;  %v1081_v13 = vld [vmem:[%s1578_s0 + $0x30] sm:$0xff]   ;;  %v1083_v15 = vld [vmem:[%s1578_s0 + $0x38] sm:$0xff]  }
   0x6   :  { %1003 = vmatmul.mubr.msk.bf16.vlgmr.msra.gmra.mxu0 %vm254_vm0, %v1071_v3  ;;  %1035 = vmatmul.mubr.msk.bf16.vlgmr.msra.gmra.mxu1 %vm254_vm0, %v1072_v4  ;;  %v1082_v14 = vld [vmem:[%s1578_s0 + $0xb0] sm:$0xff]   ;;  %v1084_v16 = vld [vmem:[%s1578_s0 + $0xb8] sm:$0xff]   ;;  %v1085_v17 = vld [vmem:[%s1578_s0 + $0x40] sm:$0xff]  }
   0x7   :  { %1006 = vmatprep.mubr.msk.bf16.mxu0 %vm254_vm0, %v1073_v5  ;;  %1038 = vmatprep.mubr.msk.bf16.mxu1 %vm254_vm0, %v1074_v6  ;;  %v1086_v18 = vld [vmem:[%s1578_s0 + $0xc0] sm:$0xff]   ;;  %v1087_v19 = vld [vmem:[%s1578_s0 + $0x48] sm:$0xff]   ;;  %v1089_v21 = vld [vmem:[%s1578_s0 + $0x50] sm:$0xff]  }
   0x8   :  { %v1088_v20 = vld [vmem:[%s1578_s0 + $0xc8] sm:$0xff]   ;;  %v1090_v22 = vld [vmem:[%s1578_s0 + $0xd0] sm:$0xff]   ;;  %v1091_v23 = vld [vmem:[%s1578_s0 + $0x58] sm:$0xff]  }
   0x9   :  { %v1092_v24 = vld [vmem:[%s1578_s0 + $0xd8] sm:$0xff]   ;;  %v1093_v25 = vld [vmem:[%s1578_s0 + $0x60] sm:$0xff]   ;;  %v1095_v27 = vld [vmem:[%s1578_s0 + $0x68] sm:$0xff]  }
   0xa   :  { %v1094_v26 = vld [vmem:[%s1578_s0 + $0xe0] sm:$0xff]   ;;  %v1096_v28 = vld [vmem:[%s1578_s0 + $0xe8] sm:$0xff]   ;;  %v1097_v29 = vld [vmem:[%s1578_s0 + $0x70] sm:$0xff]  }
   0xb   :  { %v1098_v30 = vld [vmem:[%s1578_s0 + $0xf0] sm:$0xff]   ;;  %v1099_v31 = vld [vmem:[%s1578_s0 + $0x78] sm:$0xff]   ;;  %v1255_v33 = vld [vmem:[%s1579_s2] ss:$0 sm:$0xff] }
   0xc   :  { %v1100_v32 = vld [vmem:[%s1578_s0 + $0xf8] sm:$0xff]  }
   0xe   :  { %1007 = vmatmul.mubr.msk.bf16.gmra.mxu0 %vm254_vm0, %v1075_v7  ;;  %1039 = vmatmul.mubr.msk.bf16.gmra.mxu1 %vm254_vm0, %v1076_v8 }
   0xf   :  { %1010 = vmatprep.mubr.msk.bf16.mxu0 %vm254_vm0, %v1077_v9  ;;  %1042 = vmatprep.mubr.msk.bf16.mxu1 %vm254_vm0, %v1078_v10 }
  0x16   :  { %1011 = vmatmul.mubr.msk.bf16.gmra.mxu0 %vm254_vm0, %v1079_v11  ;;  %1043 = vmatmul.mubr.msk.bf16.gmra.mxu1 %vm254_vm0, %v1080_v12 }
  0x17   :  { %1014 = vmatprep.mubr.msk.bf16.mxu0 %vm254_vm0, %v1081_v13  ;;  %1046 = vmatprep.mubr.msk.bf16.mxu1 %vm254_vm0, %v1082_v14 }
  0x1e   :  { %1015 = vmatmul.mubr.msk.bf16.gmra.mxu0 %vm254_vm0, %v1083_v15  ;;  %1047 = vmatmul.mubr.msk.bf16.gmra.mxu1 %vm254_vm0, %v1084_v16 }
  0x1f   :  { %1018 = vmatprep.mubr.msk.bf16.mxu0 %vm254_vm0, %v1085_v17  ;;  %1050 = vmatprep.mubr.msk.bf16.mxu1 %vm254_vm0, %v1086_v18 }
  0x26   :  { %1019 = vmatmul.mubr.msk.bf16.gmra.mxu0 %vm254_vm0, %v1087_v19  ;;  %1051 = vmatmul.mubr.msk.bf16.gmra.mxu1 %vm254_vm0, %v1088_v20 }
  0x27   :  { %1022 = vmatprep.mubr.msk.bf16.mxu0 %vm254_vm0, %v1089_v21  ;;  %1054 = vmatprep.mubr.msk.bf16.mxu1 %vm254_vm0, %v1090_v22 }
  0x2e   :  { %1023 = vmatmul.mubr.msk.bf16.gmra.mxu0 %vm254_vm0, %v1091_v23  ;;  %1055 = vmatmul.mubr.msk.bf16.gmra.mxu1 %vm254_vm0, %v1092_v24 }
  0x2f   :  { %1026 = vmatprep.mubr.msk.bf16.mxu0 %vm254_vm0, %v1093_v25  ;;  %1058 = vmatprep.mubr.msk.bf16.mxu1 %vm254_vm0, %v1094_v26 }
  0x36   :  { %1027 = vmatmul.mubr.msk.bf16.gmra.mxu0 %vm254_vm0, %v1095_v27  ;;  %1059 = vmatmul.mubr.msk.bf16.gmra.mxu1 %vm254_vm0, %v1096_v28 }
  0x37   :  { %1030 = vmatprep.mubr.msk.bf16.mxu0 %vm254_vm0, %v1097_v29  ;;  %1062 = vmatprep.mubr.msk.bf16.mxu1 %vm254_vm0, %v1098_v30 }
  0x3e   :  { %1031 = vmatmul.mubr.msk.bf16.gmra.mxu0 %vm254_vm0, %v1099_v31  ;;  %1063 = vmatmul.mubr.msk.bf16.gmra.mxu1 %vm254_vm0, %v1100_v32 }
  0xc6   :  { %v1004_v34 = vpop.f32.mrf.mxu0  ;;  %v1036_v35 = vpop.f32.mrf.mxu1 }
  0xc7   :  { %v394_v36 = vadd.f32 %v1004_v34, %v1255_v33  ;;  %v522_v37 = vadd.f32 %v1036_v35, %v1255_v33 }
  0xc8   :  { %v385_v38 = vpop.f32.mrf.mxu0  ;;  %v513_v39 = vpop.f32.mrf.mxu1 }
  0xc9   :  { %vm642_vm2 = vcmp.gt.f32.partialorder %v394_v36, 0.0  ;;  %v706_v40 = vmul.f32 0.2, %v394_v36  ;;  %vm674_vm3 = vcmp.gt.f32.partialorder %v522_v37, 0.0  ;;  %v738_v41 = vmul.f32 0.2, %v522_v37 }
  0xca   :  { %v386_v42 = vadd.f32 %v1255_v33, %v385_v38  ;;  %v514_v43 = vadd.f32 %v1255_v33, %v513_v39  ;;  %v1005_v44 = vpop.f32.mrf.mxu0  ;;  %v1037_v45 = vpop.f32.mrf.mxu1 }
  0xcb   :  { %v770_v46 = vsel %vm642_vm2, %v394_v36, %v706_v40  ;;  %v802_v47 = vsel %vm674_vm3, %v522_v37, %v738_v41  ;;  %v397_v48 = vadd.f32 %v1005_v44, %v1255_v33  ;;  %v525_v49 = vadd.f32 %v1037_v45, %v1255_v33 }
  0xcc   :  { %835 = vst.msk [vmem:[%s1580_s3 + $0x10] sm:$0xff] %vm832_vm1, %v770_v46  ;;  %867 = vst.msk [vmem:[%s1580_s3 + $0x110] sm:$0xff] %vm832_vm1, %v802_v47  ;;  %vm640_vm4 = vcmp.gt.f32.partialorder %v386_v42, 0.0  ;;  %v704_v50 = vmul.f32 0.2, %v386_v42  ;;  %vm672_vm5 = vcmp.gt.f32.partialorder %v514_v43, 0.0  ;;  %v388_v52 = vpop.f32.mrf.mxu0  ;;  %v516_v53 = vpop.f32.mrf.mxu1 }
  0xcd   :  { %v736_v51 = vmul.f32 0.2, %v514_v43  ;;  %vm643_vm6 = vcmp.gt.f32.partialorder %v397_v48, 0.0  ;;  %v707_v54 = vmul.f32 0.2, %v397_v48  ;;  %vm675_vm7 = vcmp.gt.f32.partialorder %v525_v49, 0.0 }
  0xce   :  { %v739_v55 = vmul.f32 0.2, %v525_v49  ;;  %v768_v56 = vsel %vm640_vm4, %v386_v42, %v704_v50  ;;  %v389_v58 = vadd.f32 %v1255_v33, %v388_v52  ;;  %v517_v59 = vadd.f32 %v1255_v33, %v516_v53  ;;  %v1008_v60 = vpop.f32.mrf.mxu0  ;;  %v1040_v61 = vpop.f32.mrf.mxu1 }
  0xcf   :  { %v800_v57 = vsel %vm672_vm5, %v514_v43, %v736_v51  ;;  %833 = vst.msk [vmem:[%s1580_s3] sm:$0xff] %vm832_vm1, %v768_v56  ;;  %v771_v62 = vsel %vm643_vm6, %v397_v48, %v707_v54  ;;  %v410_v0 = vadd.f32 %v1008_v60, %v1255_v33  ;;  %v538_v1 = vadd.f32 %v1040_v61, %v1255_v33 }
  0xd0   :  { %865 = vst.msk [vmem:[%s1580_s3 + $0x100] sm:$0xff] %vm832_vm1, %v800_v57  ;;  %v803_v63 = vsel %vm675_vm7, %v525_v49, %v739_v55  ;;  %836 = vst.msk [vmem:[%s1580_s3 + $0x18] sm:$0xff] %vm832_vm1, %v771_v62  ;;  %vm641_vm8 = vcmp.gt.f32.partialorder %v389_v58, 0.0  ;;  %v705_v2 = vmul.f32 0.2, %v389_v58  ;;  %vm673_vm9 = vcmp.gt.f32.partialorder %v517_v59, 0.0  ;;  %v401_v4 = vpop.f32.mrf.mxu0  ;;  %v529_v5 = vpop.f32.mrf.mxu1 }
  0xd1   :  { %868 = vst.msk [vmem:[%s1580_s3 + $0x118] sm:$0xff] %vm832_vm1, %v803_v63  ;;  %v737_v3 = vmul.f32 0.2, %v517_v59  ;;  %vm646_vm10 = vcmp.gt.f32.partialorder %v410_v0, 0.0  ;;  %v710_v6 = vmul.f32 0.2, %v410_v0  ;;  %v402_v10 = vadd.f32 %v1255_v33, %v401_v4 }
  0xd2   :  { %vm678_vm11 = vcmp.gt.f32.partialorder %v538_v1, 0.0  ;;  %v742_v7 = vmul.f32 0.2, %v538_v1  ;;  %v769_v8 = vsel %vm641_vm8, %v389_v58, %v705_v2  ;;  %v530_v11 = vadd.f32 %v1255_v33, %v529_v5  ;;  %v1009_v12 = vpop.f32.mrf.mxu0  ;;  %v1041_v13 = vpop.f32.mrf.mxu1 }
  0xd3   :  { %v801_v9 = vsel %vm673_vm9, %v517_v59, %v737_v3  ;;  %834 = vst.msk [vmem:[%s1580_s3 + $0x8] sm:$0xff] %vm832_vm1, %v769_v8  ;;  %v774_v14 = vsel %vm646_vm10, %v410_v0, %v710_v6  ;;  %v413_v16 = vadd.f32 %v1009_v12, %v1255_v33  ;;  %v541_v17 = vadd.f32 %v1041_v13, %v1255_v33 }
  0xd4   :  { %866 = vst.msk [vmem:[%s1580_s3 + $0x108] sm:$0xff] %vm832_vm1, %v801_v9  ;;  %v806_v15 = vsel %vm678_vm11, %v538_v1, %v742_v7  ;;  %839 = vst.msk [vmem:[%s1580_s3 + $0x30] sm:$0xff] %vm832_vm1, %v774_v14  ;;  %vm644_vm12 = vcmp.gt.f32.partialorder %v402_v10, 0.0  ;;  %v708_v18 = vmul.f32 0.2, %v402_v10  ;;  %vm676_vm13 = vcmp.gt.f32.partialorder %v530_v11, 0.0  ;;  %v404_v20 = vpop.f32.mrf.mxu0  ;;  %v532_v21 = vpop.f32.mrf.mxu1 }
  0xd5   :  { %871 = vst.msk [vmem:[%s1580_s3 + $0x130] sm:$0xff] %vm832_vm1, %v806_v15  ;;  %v740_v19 = vmul.f32 0.2, %v530_v11  ;;  %vm647_vm14 = vcmp.gt.f32.partialorder %v413_v16, 0.0  ;;  %v711_v22 = vmul.f32 0.2, %v413_v16  ;;  %v405_v26 = vadd.f32 %v1255_v33, %v404_v20 }
  0xd6   :  { %vm679_vm15 = vcmp.gt.f32.partialorder %v541_v17, 0.0  ;;  %v743_v23 = vmul.f32 0.2, %v541_v17  ;;  %v772_v24 = vsel %vm644_vm12, %v402_v10, %v708_v18  ;;  %v533_v27 = vadd.f32 %v1255_v33, %v532_v21  ;;  %v1012_v28 = vpop.f32.mrf.mxu0  ;;  %v1044_v29 = vpop.f32.mrf.mxu1 }
  0xd7   :  { %v804_v25 = vsel %vm676_vm13, %v530_v11, %v740_v19  ;;  %837 = vst.msk [vmem:[%s1580_s3 + $0x20] sm:$0xff] %vm832_vm1, %v772_v24  ;;  %v775_v30 = vsel %vm647_vm14, %v413_v16, %v711_v22  ;;  %v426_v32 = vadd.f32 %v1012_v28, %v1255_v33  ;;  %v554_v34 = vadd.f32 %v1044_v29, %v1255_v33 }
  0xd8   :  { %869 = vst.msk [vmem:[%s1580_s3 + $0x120] sm:$0xff] %vm832_vm1, %v804_v25  ;;  %v807_v31 = vsel %vm679_vm15, %v541_v17, %v743_v23  ;;  %840 = vst.msk [vmem:[%s1580_s3 + $0x38] sm:$0xff] %vm832_vm1, %v775_v30  ;;  %vm645_vm0 = vcmp.gt.f32.partialorder %v405_v26, 0.0  ;;  %v709_v35 = vmul.f32 0.2, %v405_v26  ;;  %vm677_vm2 = vcmp.gt.f32.partialorder %v533_v27, 0.0  ;;  %v417_v37 = vpop.f32.mrf.mxu0  ;;  %v545_v38 = vpop.f32.mrf.mxu1 }
  0xd9   :  { %872 = vst.msk [vmem:[%s1580_s3 + $0x138] sm:$0xff] %vm832_vm1, %v807_v31  ;;  %v741_v36 = vmul.f32 0.2, %v533_v27  ;;  %vm650_vm3 = vcmp.gt.f32.partialorder %v426_v32, 0.0  ;;  %v714_v39 = vmul.f32 0.2, %v426_v32  ;;  %v418_v43 = vadd.f32 %v1255_v33, %v417_v37 }
  0xda   :  { %vm682_vm4 = vcmp.gt.f32.partialorder %v554_v34, 0.0  ;;  %v746_v40 = vmul.f32 0.2, %v554_v34  ;;  %v773_v41 = vsel %vm645_vm0, %v405_v26, %v709_v35  ;;  %v546_v44 = vadd.f32 %v1255_v33, %v545_v38  ;;  %v1013_v45 = vpop.f32.mrf.mxu0  ;;  %v1045_v46 = vpop.f32.mrf.mxu1 }
  0xdb   :  { %v805_v42 = vsel %vm677_vm2, %v533_v27, %v741_v36  ;;  %838 = vst.msk [vmem:[%s1580_s3 + $0x28] sm:$0xff] %vm832_vm1, %v773_v41  ;;  %v778_v47 = vsel %vm650_vm3, %v426_v32, %v714_v39  ;;  %v429_v49 = vadd.f32 %v1013_v45, %v1255_v33  ;;  %v557_v50 = vadd.f32 %v1045_v46, %v1255_v33 }
  0xdc   :  { %870 = vst.msk [vmem:[%s1580_s3 + $0x128] sm:$0xff] %vm832_vm1, %v805_v42  ;;  %v810_v48 = vsel %vm682_vm4, %v554_v34, %v746_v40  ;;  %843 = vst.msk [vmem:[%s1580_s3 + $0x50] sm:$0xff] %vm832_vm1, %v778_v47  ;;  %vm648_vm5 = vcmp.gt.f32.partialorder %v418_v43, 0.0  ;;  %v712_v51 = vmul.f32 0.2, %v418_v43  ;;  %vm680_vm6 = vcmp.gt.f32.partialorder %v546_v44, 0.0  ;;  %v420_v53 = vpop.f32.mrf.mxu0  ;;  %v548_v54 = vpop.f32.mrf.mxu1 }
  0xdd   :  { %875 = vst.msk [vmem:[%s1580_s3 + $0x150] sm:$0xff] %vm832_vm1, %v810_v48  ;;  %v744_v52 = vmul.f32 0.2, %v546_v44  ;;  %vm651_vm7 = vcmp.gt.f32.partialorder %v429_v49, 0.0  ;;  %v715_v55 = vmul.f32 0.2, %v429_v49  ;;  %v421_v59 = vadd.f32 %v1255_v33, %v420_v53 }
  0xde   :  { %vm683_vm8 = vcmp.gt.f32.partialorder %v557_v50, 0.0  ;;  %v747_v56 = vmul.f32 0.2, %v557_v50  ;;  %v776_v57 = vsel %vm648_vm5, %v418_v43, %v712_v51  ;;  %v549_v60 = vadd.f32 %v1255_v33, %v548_v54  ;;  %v1016_v61 = vpop.f32.mrf.mxu0  ;;  %v1048_v62 = vpop.f32.mrf.mxu1 }
  0xdf   :  { %v808_v58 = vsel %vm680_vm6, %v546_v44, %v744_v52  ;;  %841 = vst.msk [vmem:[%s1580_s3 + $0x40] sm:$0xff] %vm832_vm1, %v776_v57  ;;  %v779_v63 = vsel %vm651_vm7, %v429_v49, %v715_v55  ;;  %v442_v1 = vadd.f32 %v1016_v61, %v1255_v33  ;;  %v570_v2 = vadd.f32 %v1048_v62, %v1255_v33 }
  0xe0   :  { %873 = vst.msk [vmem:[%s1580_s3 + $0x140] sm:$0xff] %vm832_vm1, %v808_v58  ;;  %v811_v0 = vsel %vm683_vm8, %v557_v50, %v747_v56  ;;  %844 = vst.msk [vmem:[%s1580_s3 + $0x58] sm:$0xff] %vm832_vm1, %v779_v63  ;;  %vm649_vm9 = vcmp.gt.f32.partialorder %v421_v59, 0.0  ;;  %v713_v3 = vmul.f32 0.2, %v421_v59  ;;  %vm681_vm10 = vcmp.gt.f32.partialorder %v549_v60, 0.0  ;;  %v433_v5 = vpop.f32.mrf.mxu0  ;;  %v561_v6 = vpop.f32.mrf.mxu1 }
  0xe1   :  { %876 = vst.msk [vmem:[%s1580_s3 + $0x158] sm:$0xff] %vm832_vm1, %v811_v0  ;;  %v745_v4 = vmul.f32 0.2, %v549_v60  ;;  %vm654_vm11 = vcmp.gt.f32.partialorder %v442_v1, 0.0  ;;  %v718_v7 = vmul.f32 0.2, %v442_v1  ;;  %v434_v11 = vadd.f32 %v1255_v33, %v433_v5 }
  0xe2   :  { %vm686_vm12 = vcmp.gt.f32.partialorder %v570_v2, 0.0  ;;  %v750_v8 = vmul.f32 0.2, %v570_v2  ;;  %v777_v9 = vsel %vm649_vm9, %v421_v59, %v713_v3  ;;  %v562_v12 = vadd.f32 %v1255_v33, %v561_v6  ;;  %v1017_v13 = vpop.f32.mrf.mxu0  ;;  %v1049_v14 = vpop.f32.mrf.mxu1 }
  0xe3   :  { %v809_v10 = vsel %vm681_vm10, %v549_v60, %v745_v4  ;;  %842 = vst.msk [vmem:[%s1580_s3 + $0x48] sm:$0xff] %vm832_vm1, %v777_v9  ;;  %v782_v15 = vsel %vm654_vm11, %v442_v1, %v718_v7  ;;  %v445_v17 = vadd.f32 %v1017_v13, %v1255_v33  ;;  %v573_v18 = vadd.f32 %v1049_v14, %v1255_v33 }
  0xe4   :  { %874 = vst.msk [vmem:[%s1580_s3 + $0x148] sm:$0xff] %vm832_vm1, %v809_v10  ;;  %v814_v16 = vsel %vm686_vm12, %v570_v2, %v750_v8  ;;  %847 = vst.msk [vmem:[%s1580_s3 + $0x70] sm:$0xff] %vm832_vm1, %v782_v15  ;;  %vm652_vm13 = vcmp.gt.f32.partialorder %v434_v11, 0.0  ;;  %v716_v19 = vmul.f32 0.2, %v434_v11  ;;  %vm684_vm14 = vcmp.gt.f32.partialorder %v562_v12, 0.0  ;;  %v436_v21 = vpop.f32.mrf.mxu0  ;;  %v564_v22 = vpop.f32.mrf.mxu1 }
  0xe5   :  { %879 = vst.msk [vmem:[%s1580_s3 + $0x170] sm:$0xff] %vm832_vm1, %v814_v16  ;;  %v748_v20 = vmul.f32 0.2, %v562_v12  ;;  %vm655_vm15 = vcmp.gt.f32.partialorder %v445_v17, 0.0  ;;  %v719_v23 = vmul.f32 0.2, %v445_v17  ;;  %v437_v27 = vadd.f32 %v1255_v33, %v436_v21 }
  0xe6   :  { %vm687_vm0 = vcmp.gt.f32.partialorder %v573_v18, 0.0  ;;  %v751_v24 = vmul.f32 0.2, %v573_v18  ;;  %v780_v25 = vsel %vm652_vm13, %v434_v11, %v716_v19  ;;  %v565_v28 = vadd.f32 %v1255_v33, %v564_v22  ;;  %v1020_v29 = vpop.f32.mrf.mxu0  ;;  %v1052_v30 = vpop.f32.mrf.mxu1 }
  0xe7   :  { %v812_v26 = vsel %vm684_vm14, %v562_v12, %v748_v20  ;;  %845 = vst.msk [vmem:[%s1580_s3 + $0x60] sm:$0xff] %vm832_vm1, %v780_v25  ;;  %v783_v31 = vsel %vm655_vm15, %v445_v17, %v719_v23  ;;  %v458_v34 = vadd.f32 %v1020_v29, %v1255_v33  ;;  %v586_v35 = vadd.f32 %v1052_v30, %v1255_v33 }
  0xe8   :  { %877 = vst.msk [vmem:[%s1580_s3 + $0x160] sm:$0xff] %vm832_vm1, %v812_v26  ;;  %v815_v32 = vsel %vm687_vm0, %v573_v18, %v751_v24  ;;  %848 = vst.msk [vmem:[%s1580_s3 + $0x78] sm:$0xff] %vm832_vm1, %v783_v31  ;;  %vm653_vm2 = vcmp.gt.f32.partialorder %v437_v27, 0.0  ;;  %v717_v36 = vmul.f32 0.2, %v437_v27  ;;  %vm685_vm3 = vcmp.gt.f32.partialorder %v565_v28, 0.0  ;;  %v449_v38 = vpop.f32.mrf.mxu0  ;;  %v577_v39 = vpop.f32.mrf.mxu1 }
  0xe9   :  { %880 = vst.msk [vmem:[%s1580_s3 + $0x178] sm:$0xff] %vm832_vm1, %v815_v32  ;;  %v749_v37 = vmul.f32 0.2, %v565_v28  ;;  %vm658_vm4 = vcmp.gt.f32.partialorder %v458_v34, 0.0  ;;  %v722_v40 = vmul.f32 0.2, %v458_v34  ;;  %v450_v44 = vadd.f32 %v1255_v33, %v449_v38 }
  0xea   :  { %vm690_vm5 = vcmp.gt.f32.partialorder %v586_v35, 0.0  ;;  %v754_v41 = vmul.f32 0.2, %v586_v35  ;;  %v781_v42 = vsel %vm653_vm2, %v437_v27, %v717_v36  ;;  %v578_v45 = vadd.f32 %v1255_v33, %v577_v39  ;;  %v1021_v46 = vpop.f32.mrf.mxu0  ;;  %v1053_v47 = vpop.f32.mrf.mxu1 }
  0xeb   :  { %v813_v43 = vsel %vm685_vm3, %v565_v28, %v749_v37  ;;  %846 = vst.msk [vmem:[%s1580_s3 + $0x68] sm:$0xff] %vm832_vm1, %v781_v42  ;;  %v786_v48 = vsel %vm658_vm4, %v458_v34, %v722_v40  ;;  %v461_v50 = vadd.f32 %v1021_v46, %v1255_v33  ;;  %v589_v51 = vadd.f32 %v1053_v47, %v1255_v33 }
  0xec   :  { %878 = vst.msk [vmem:[%s1580_s3 + $0x168] sm:$0xff] %vm832_vm1, %v813_v43  ;;  %v818_v49 = vsel %vm690_vm5, %v586_v35, %v754_v41  ;;  %851 = vst.msk [vmem:[%s1580_s3 + $0x90] sm:$0xff] %vm832_vm1, %v786_v48  ;;  %vm656_vm6 = vcmp.gt.f32.partialorder %v450_v44, 0.0  ;;  %v720_v52 = vmul.f32 0.2, %v450_v44  ;;  %vm688_vm7 = vcmp.gt.f32.partialorder %v578_v45, 0.0  ;;  %v452_v54 = vpop.f32.mrf.mxu0  ;;  %v580_v55 = vpop.f32.mrf.mxu1 }
  0xed   :  { %883 = vst.msk [vmem:[%s1580_s3 + $0x190] sm:$0xff] %vm832_vm1, %v818_v49  ;;  %v752_v53 = vmul.f32 0.2, %v578_v45  ;;  %vm659_vm8 = vcmp.gt.f32.partialorder %v461_v50, 0.0  ;;  %v723_v56 = vmul.f32 0.2, %v461_v50  ;;  %v453_v60 = vadd.f32 %v1255_v33, %v452_v54 }
  0xee   :  { %vm691_vm9 = vcmp.gt.f32.partialorder %v589_v51, 0.0  ;;  %v755_v57 = vmul.f32 0.2, %v589_v51  ;;  %v784_v58 = vsel %vm656_vm6, %v450_v44, %v720_v52  ;;  %v581_v61 = vadd.f32 %v1255_v33, %v580_v55  ;;  %v1024_v62 = vpop.f32.mrf.mxu0  ;;  %v1056_v63 = vpop.f32.mrf.mxu1 }
  0xef   :  { %v816_v59 = vsel %vm688_vm7, %v578_v45, %v752_v53  ;;  %849 = vst.msk [vmem:[%s1580_s3 + $0x80] sm:$0xff] %vm832_vm1, %v784_v58  ;;  %v787_v0 = vsel %vm659_vm8, %v461_v50, %v723_v56  ;;  %v474_v2 = vadd.f32 %v1024_v62, %v1255_v33  ;;  %v602_v3 = vadd.f32 %v1056_v63, %v1255_v33 }
  0xf0   :  { %881 = vst.msk [vmem:[%s1580_s3 + $0x180] sm:$0xff] %vm832_vm1, %v816_v59  ;;  %v819_v1 = vsel %vm691_vm9, %v589_v51, %v755_v57  ;;  %852 = vst.msk [vmem:[%s1580_s3 + $0x98] sm:$0xff] %vm832_vm1, %v787_v0  ;;  %vm657_vm10 = vcmp.gt.f32.partialorder %v453_v60, 0.0  ;;  %v721_v4 = vmul.f32 0.2, %v453_v60  ;;  %vm689_vm11 = vcmp.gt.f32.partialorder %v581_v61, 0.0  ;;  %v465_v6 = vpop.f32.mrf.mxu0  ;;  %v593_v7 = vpop.f32.mrf.mxu1 }
  0xf1   :  { %884 = vst.msk [vmem:[%s1580_s3 + $0x198] sm:$0xff] %vm832_vm1, %v819_v1  ;;  %v753_v5 = vmul.f32 0.2, %v581_v61  ;;  %vm662_vm12 = vcmp.gt.f32.partialorder %v474_v2, 0.0  ;;  %v726_v8 = vmul.f32 0.2, %v474_v2  ;;  %v466_v12 = vadd.f32 %v1255_v33, %v465_v6 }
  0xf2   :  { %vm694_vm13 = vcmp.gt.f32.partialorder %v602_v3, 0.0  ;;  %v758_v9 = vmul.f32 0.2, %v602_v3  ;;  %v785_v10 = vsel %vm657_vm10, %v453_v60, %v721_v4  ;;  %v594_v13 = vadd.f32 %v1255_v33, %v593_v7  ;;  %v1025_v14 = vpop.f32.mrf.mxu0  ;;  %v1057_v15 = vpop.f32.mrf.mxu1 }
  0xf3   :  { %v817_v11 = vsel %vm689_vm11, %v581_v61, %v753_v5  ;;  %850 = vst.msk [vmem:[%s1580_s3 + $0x88] sm:$0xff] %vm832_vm1, %v785_v10  ;;  %v790_v16 = vsel %vm662_vm12, %v474_v2, %v726_v8  ;;  %v477_v18 = vadd.f32 %v1025_v14, %v1255_v33  ;;  %v605_v19 = vadd.f32 %v1057_v15, %v1255_v33 }
  0xf4   :  { %882 = vst.msk [vmem:[%s1580_s3 + $0x188] sm:$0xff] %vm832_vm1, %v817_v11  ;;  %v822_v17 = vsel %vm694_vm13, %v602_v3, %v758_v9  ;;  %855 = vst.msk [vmem:[%s1580_s3 + $0xb0] sm:$0xff] %vm832_vm1, %v790_v16  ;;  %vm660_vm14 = vcmp.gt.f32.partialorder %v466_v12, 0.0  ;;  %v724_v20 = vmul.f32 0.2, %v466_v12  ;;  %vm692_vm15 = vcmp.gt.f32.partialorder %v594_v13, 0.0  ;;  %v468_v22 = vpop.f32.mrf.mxu0  ;;  %v596_v23 = vpop.f32.mrf.mxu1 }
  0xf5   :  { %887 = vst.msk [vmem:[%s1580_s3 + $0x1b0] sm:$0xff] %vm832_vm1, %v822_v17  ;;  %v756_v21 = vmul.f32 0.2, %v594_v13  ;;  %vm663_vm0 = vcmp.gt.f32.partialorder %v477_v18, 0.0  ;;  %v727_v24 = vmul.f32 0.2, %v477_v18  ;;  %v469_v28 = vadd.f32 %v1255_v33, %v468_v22 }
  0xf6   :  { %vm695_vm2 = vcmp.gt.f32.partialorder %v605_v19, 0.0  ;;  %v759_v25 = vmul.f32 0.2, %v605_v19  ;;  %v788_v26 = vsel %vm660_vm14, %v466_v12, %v724_v20  ;;  %v597_v29 = vadd.f32 %v1255_v33, %v596_v23  ;;  %v1028_v30 = vpop.f32.mrf.mxu0  ;;  %v1060_v31 = vpop.f32.mrf.mxu1 }
  0xf7   :  { %v820_v27 = vsel %vm692_vm15, %v594_v13, %v756_v21  ;;  %853 = vst.msk [vmem:[%s1580_s3 + $0xa0] sm:$0xff] %vm832_vm1, %v788_v26  ;;  %v791_v32 = vsel %vm663_vm0, %v477_v18, %v727_v24  ;;  %v490_v35 = vadd.f32 %v1028_v30, %v1255_v33  ;;  %v618_v36 = vadd.f32 %v1060_v31, %v1255_v33 }
  0xf8   :  { %885 = vst.msk [vmem:[%s1580_s3 + $0x1a0] sm:$0xff] %vm832_vm1, %v820_v27  ;;  %v823_v34 = vsel %vm695_vm2, %v605_v19, %v759_v25  ;;  %856 = vst.msk [vmem:[%s1580_s3 + $0xb8] sm:$0xff] %vm832_vm1, %v791_v32  ;;  %vm661_vm3 = vcmp.gt.f32.partialorder %v469_v28, 0.0  ;;  %v725_v37 = vmul.f32 0.2, %v469_v28  ;;  %vm693_vm4 = vcmp.gt.f32.partialorder %v597_v29, 0.0  ;;  %v481_v39 = vpop.f32.mrf.mxu0  ;;  %v609_v40 = vpop.f32.mrf.mxu1 }
  0xf9   :  { %888 = vst.msk [vmem:[%s1580_s3 + $0x1b8] sm:$0xff] %vm832_vm1, %v823_v34  ;;  %v757_v38 = vmul.f32 0.2, %v597_v29  ;;  %vm666_vm5 = vcmp.gt.f32.partialorder %v490_v35, 0.0  ;;  %v730_v41 = vmul.f32 0.2, %v490_v35  ;;  %v482_v45 = vadd.f32 %v1255_v33, %v481_v39 }
  0xfa   :  { %vm698_vm6 = vcmp.gt.f32.partialorder %v618_v36, 0.0  ;;  %v762_v42 = vmul.f32 0.2, %v618_v36  ;;  %v789_v43 = vsel %vm661_vm3, %v469_v28, %v725_v37  ;;  %v610_v46 = vadd.f32 %v1255_v33, %v609_v40  ;;  %v1029_v47 = vpop.f32.mrf.mxu0  ;;  %v1061_v48 = vpop.f32.mrf.mxu1 }
  0xfb   :  { %v821_v44 = vsel %vm693_vm4, %v597_v29, %v757_v38  ;;  %854 = vst.msk [vmem:[%s1580_s3 + $0xa8] sm:$0xff] %vm832_vm1, %v789_v43  ;;  %v794_v49 = vsel %vm666_vm5, %v490_v35, %v730_v41  ;;  %v493_v51 = vadd.f32 %v1029_v47, %v1255_v33  ;;  %v621_v52 = vadd.f32 %v1061_v48, %v1255_v33 }
  0xfc   :  { %886 = vst.msk [vmem:[%s1580_s3 + $0x1a8] sm:$0xff] %vm832_vm1, %v821_v44  ;;  %v826_v50 = vsel %vm698_vm6, %v618_v36, %v762_v42  ;;  %859 = vst.msk [vmem:[%s1580_s3 + $0xd0] sm:$0xff] %vm832_vm1, %v794_v49  ;;  %vm664_vm7 = vcmp.gt.f32.partialorder %v482_v45, 0.0  ;;  %v728_v53 = vmul.f32 0.2, %v482_v45  ;;  %vm696_vm8 = vcmp.gt.f32.partialorder %v610_v46, 0.0  ;;  %v484_v55 = vpop.f32.mrf.mxu0  ;;  %v612_v56 = vpop.f32.mrf.mxu1 }
  0xfd   :  { %891 = vst.msk [vmem:[%s1580_s3 + $0x1d0] sm:$0xff] %vm832_vm1, %v826_v50  ;;  %v760_v54 = vmul.f32 0.2, %v610_v46  ;;  %vm667_vm9 = vcmp.gt.f32.partialorder %v493_v51, 0.0  ;;  %v731_v57 = vmul.f32 0.2, %v493_v51  ;;  %v485_v61 = vadd.f32 %v1255_v33, %v484_v55 }
  0xfe   :  { %vm699_vm10 = vcmp.gt.f32.partialorder %v621_v52, 0.0  ;;  %v763_v58 = vmul.f32 0.2, %v621_v52  ;;  %v792_v59 = vsel %vm664_vm7, %v482_v45, %v728_v53  ;;  %v613_v62 = vadd.f32 %v1255_v33, %v612_v56  ;;  %v1032_v63 = vpop.f32.mrf.mxu0  ;;  %v1064_v0 = vpop.f32.mrf.mxu1 }
  0xff   :  { %v824_v60 = vsel %vm696_vm8, %v610_v46, %v760_v54  ;;  %857 = vst.msk [vmem:[%s1580_s3 + $0xc0] sm:$0xff] %vm832_vm1, %v792_v59  ;;  %v795_v1 = vsel %vm667_vm9, %v493_v51, %v731_v57  ;;  %v506_v3 = vadd.f32 %v1032_v63, %v1255_v33  ;;  %v634_v4 = vadd.f32 %v1064_v0, %v1255_v33 }
 0x100   :  { %889 = vst.msk [vmem:[%s1580_s3 + $0x1c0] sm:$0xff] %vm832_vm1, %v824_v60  ;;  %v827_v2 = vsel %vm699_vm10, %v621_v52, %v763_v58  ;;  %860 = vst.msk [vmem:[%s1580_s3 + $0xd8] sm:$0xff] %vm832_vm1, %v795_v1  ;;  %vm665_vm11 = vcmp.gt.f32.partialorder %v485_v61, 0.0  ;;  %v729_v5 = vmul.f32 0.2, %v485_v61  ;;  %vm697_vm12 = vcmp.gt.f32.partialorder %v613_v62, 0.0  ;;  %v497_v7 = vpop.f32.mrf.mxu0  ;;  %v625_v8 = vpop.f32.mrf.mxu1 }
 0x101   :  { %892 = vst.msk [vmem:[%s1580_s3 + $0x1d8] sm:$0xff] %vm832_vm1, %v827_v2  ;;  %v761_v6 = vmul.f32 0.2, %v613_v62  ;;  %vm670_vm13 = vcmp.gt.f32.partialorder %v506_v3, 0.0  ;;  %v734_v9 = vmul.f32 0.2, %v506_v3  ;;  %v498_v13 = vadd.f32 %v1255_v33, %v497_v7 }
 0x102   :  { %vm702_vm14 = vcmp.gt.f32.partialorder %v634_v4, 0.0  ;;  %v766_v10 = vmul.f32 0.2, %v634_v4  ;;  %v793_v11 = vsel %vm665_vm11, %v485_v61, %v729_v5  ;;  %v626_v14 = vadd.f32 %v1255_v33, %v625_v8  ;;  %v1033_v15 = vpop.f32.mrf.mxu0  ;;  %v1065_v16 = vpop.f32.mrf.mxu1 }
 0x103   :  { %v825_v12 = vsel %vm697_vm12, %v613_v62, %v761_v6  ;;  %858 = vst.msk [vmem:[%s1580_s3 + $0xc8] sm:$0xff] %vm832_vm1, %v793_v11  ;;  %v798_v17 = vsel %vm670_vm13, %v506_v3, %v734_v9  ;;  %v509_v19 = vadd.f32 %v1033_v15, %v1255_v33  ;;  %v637_v20 = vadd.f32 %v1065_v16, %v1255_v33 }
 0x104   :  { %890 = vst.msk [vmem:[%s1580_s3 + $0x1c8] sm:$0xff] %vm832_vm1, %v825_v12  ;;  %v830_v18 = vsel %vm702_vm14, %v634_v4, %v766_v10  ;;  %863 = vst.msk [vmem:[%s1580_s3 + $0xf0] sm:$0xff] %vm832_vm1, %v798_v17  ;;  %vm668_vm15 = vcmp.gt.f32.partialorder %v498_v13, 0.0  ;;  %v732_v21 = vmul.f32 0.2, %v498_v13  ;;  %vm700_vm0 = vcmp.gt.f32.partialorder %v626_v14, 0.0  ;;  %v500_v23 = vpop.f32.mrf.mxu0  ;;  %v628_v24 = vpop.f32.mrf.mxu1 }
 0x105   :  { %895 = vst.msk [vmem:[%s1580_s3 + $0x1f0] sm:$0xff] %vm832_vm1, %v830_v18  ;;  %v764_v22 = vmul.f32 0.2, %v626_v14  ;;  %vm671_vm2 = vcmp.gt.f32.partialorder %v509_v19, 0.0  ;;  %v735_v25 = vmul.f32 0.2, %v509_v19  ;;  %v501_v29 = vadd.f32 %v1255_v33, %v500_v23 }
 0x106   :  { %vm703_vm3 = vcmp.gt.f32.partialorder %v637_v20, 0.0  ;;  %v767_v26 = vmul.f32 0.2, %v637_v20  ;;  %v796_v27 = vsel %vm668_vm15, %v498_v13, %v732_v21  ;;  %v629_v30 = vadd.f32 %v1255_v33, %v628_v24 }
 0x107   :  { %v828_v28 = vsel %vm700_vm0, %v626_v14, %v764_v22  ;;  %861 = vst.msk [vmem:[%s1580_s3 + $0xe0] sm:$0xff] %vm832_vm1, %v796_v27  ;;  %v799_v31 = vsel %vm671_vm2, %v509_v19, %v735_v25  ;;  %vm669_vm4 = vcmp.gt.f32.partialorder %v501_v29, 0.0  ;;  %v733_v33 = vmul.f32 0.2, %v501_v29 }
 0x108   :  { %893 = vst.msk [vmem:[%s1580_s3 + $0x1e0] sm:$0xff] %vm832_vm1, %v828_v28  ;;  %v831_v32 = vsel %vm703_vm3, %v637_v20, %v767_v26  ;;  %864 = vst.msk [vmem:[%s1580_s3 + $0xf8] sm:$0xff] %vm832_vm1, %v799_v31  ;;  %vm701_vm5 = vcmp.gt.f32.partialorder %v629_v30, 0.0  ;;  %v765_v34 = vmul.f32 0.2, %v629_v30 }
 0x109   :  { %896 = vst.msk [vmem:[%s1580_s3 + $0x1f8] sm:$0xff] %vm832_vm1, %v831_v32  ;;  %v797_v35 = vsel %vm669_vm4, %v501_v29, %v733_v33 }
 0x10a   :  { %v829_v36 = vsel %vm701_vm5, %v629_v30, %v765_v34  ;;  %862 = vst.msk [vmem:[%s1580_s3 + $0xe8] sm:$0xff] %vm832_vm1, %v797_v35 }
 0x10b   :  { %894 = vst.msk [vmem:[%s1580_s3 + $0x1e8] sm:$0xff] %vm832_vm1, %v829_v36 }

// kernel: pose_rnn_forward.5
= control target key start
LH: loop header
LB: loop body
LE: loop exit
PB: predicated region body
PF: predicated region fallthrough
CT: control target
= control target key end

     0   :  { %vm295_vm0 = vcmask 130048   ;;  %s566_s1 = inlined_call_operand.vmem [shape: bf16[128,16], index: 1, kind: input, shape index: {}]   ;;  %s567_s0 = inlined_call_operand.vmem [shape: bf16[128,128], index: 0, kind: input, shape index: {}]   ;;  %s568_s2 = inlined_call_operand.vmem [shape: f32[1,16], index: 2, kind: input, shape index: {}]   ;;  %s569_s3 = inlined_call_operand.vmem [shape: f32[128,16], index: 3, kind: output, shape index: {}]  }
   0x1   :  { %v397_v0 = vld [vmem:[%s566_s1 + $0x38] sm:$0xff]   ;;  %v398_v1 = vld [vmem:[%s566_s1 + $0x30] sm:$0xff]   ;;  %v399_v2 = vld [vmem:[%s566_s1 + $0x28] sm:$0xff]  }
   0x2   :  { %349 = vmatprep.subr.bf16.mxu0 %v397_v0  ;;  %381 = vmatprep.subr.bf16.mxu1 %v397_v0  ;;  %v400_v3 = vld [vmem:[%s566_s1 + $0x20] sm:$0xff]   ;;  %v401_v6 = vld [vmem:[%s566_s1 + $0x18] sm:$0xff]   ;;  %v402_v7 = vld [vmem:[%s566_s1 + $0x10] sm:$0xff]  }
   0x3   :  { %350 = vmatpush3.bf16.msra.mxu0 %v397_v0  ;;  %389 = vmatpush3.bf16.msra.mxu1 %v397_v0  ;;  %v405_v4 = vld [vmem:[%s567_s0] sm:$0xff]   ;;  %v403_v8 = vld [vmem:[%s566_s1 + $0x8] sm:$0xff]   ;;  %v409_v12 = vld [vmem:[%s567_s0 + $0x10] sm:$0xff]  }
   0x4   :  { %351 = vmatprep.subr.bf16.mxu0 %v398_v1  ;;  %382 = vmatprep.subr.bf16.mxu1 %v398_v1  ;;  %v406_v5 = vld [vmem:[%s567_s0 + $0x20] sm:$0xff]   ;;  %v407_v10 = vld [vmem:[%s567_s0 + $0x8] sm:$0xff]   ;;  %v410_v13 = vld [vmem:[%s567_s0 + $0x30] sm:$0xff]  }
   0x5   :  { %365 = vmatprep.mubr.bf16.mxu0 %v405_v4  ;;  %373 = vmatprep.mubr.bf16.mxu1 %v406_v5  ;;  %v404_v9 = vld [vmem:[%s566_s1] sm:$0xff]   ;;  %v408_v11 = vld [vmem:[%s567_s0 + $0x28] sm:$0xff]   ;;  %v411_v14 = vld [vmem:[%s567_s0 + $0x18] sm:$0xff]  }
   0x6   :  { %v412_v15 = vld [vmem:[%s567_s0 + $0x38] sm:$0xff]   ;;  %v484_v16 = vld [vmem:[%s568_s2] ss:$0 sm:$0xff] }
   0x7   :  { %352 = vmatpush3.bf16.msra.mxu0 %v398_v1  ;;  %390 = vmatpush3.bf16.msra.mxu1 %v398_v1 }
   0x8   :  { %353 = vmatprep.subr.bf16.mxu0 %v399_v2  ;;  %383 = vmatprep.subr.bf16.mxu1 %v399_v2 }
   0xb   :  { %354 = vmatpush3.bf16.msra.mxu0 %v399_v2  ;;  %391 = vmatpush3.bf16.msra.mxu1 %v399_v2 }
   0xc   :  { %355 = vmatprep.subr.bf16.mxu0 %v400_v3  ;;  %384 = vmatprep.subr.bf16.mxu1 %v400_v3 }
   0xf   :  { %356 = vmatpush3.bf16.msra.mxu0 %v400_v3  ;;  %392 = vmatpush3.bf16.msra.mxu1 %v400_v3 }
  0x10   :  { %357 = vmatprep.subr.bf16.mxu0 %v401_v6  ;;  %385 = vmatprep.subr.bf16.mxu1 %v401_v6 }
  0x13   :  { %358 = vmatpush3.bf16.msra.mxu0 %v401_v6  ;;  %393 = vmatpush3.bf16.msra.mxu1 %v401_v6 }
  0x14   :  { %359 = vmatprep.subr.bf16.mxu0 %v402_v7  ;;  %386 = vmatprep.subr.bf16.mxu1 %v402_v7 }
  0x17   :  { %360 = vmatpush3.bf16.msra.mxu0 %v402_v7  ;;  %394 = vmatpush3.bf16.msra.mxu1 %v402_v7 }
  0x18   :  { %361 = vmatprep.subr.bf16.mxu0 %v403_v8  ;;  %387 = vmatprep.subr.bf16.mxu1 %v403_v8 }
  0x1b   :  { %362 = vmatpush3.bf16.msra.mxu0 %v403_v8  ;;  %395 = vmatpush3.bf16.msra.mxu1 %v403_v8 }
  0x1c   :  { %363 = vmatprep.subr.bf16.mxu0 %v404_v9  ;;  %388 = vmatprep.subr.bf16.mxu1 %v404_v9 }
  0x1f   :  { %364 = vmatpush3.bf16.msra.mxu0 %v404_v9  ;;  %396 = vmatpush3.bf16.msra.mxu1 %v404_v9 }
  0x22   :  { %366 = vmatmul.mubr.bf16.vlgmr.msra.gmra.mxu0 %v407_v10  ;;  %374 = vmatmul.mubr.bf16.vlgmr.msra.gmra.mxu1 %v408_v11 }
  0x23   :  { %369 = vmatprep.mubr.bf16.mxu0 %v409_v12  ;;  %377 = vmatprep.mubr.bf16.mxu1 %v410_v13 }
  0x2a   :  { %370 = vmatmul.mubr.bf16.gmra.mxu0 %v411_v14  ;;  %378 = vmatmul.mubr.bf16.gmra.mxu1 %v412_v15 }
  0xe2   :  { %v367_v17 = vpop.f32.mrf.mxu0  ;;  %v375_v18 = vpop.f32.mrf.mxu1 }
  0xe3   :  { %v193_v19 = vadd.f32 %v367_v17, %v484_v16  ;;  %v225_v20 = vadd.f32 %v375_v18, %v484_v16 }
  0xe4   :  { %v184_v21 = vpop.f32.mrf.mxu0  ;;  %v216_v22 = vpop.f32.mrf.mxu1 }
  0xe5   :  { %vm249_vm1 = vcmp.gt.f32.partialorder %v193_v19, 0.0  ;;  %v265_v23 = vmul.f32 0.2, %v193_v19  ;;  %vm257_vm2 = vcmp.gt.f32.partialorder %v225_v20, 0.0  ;;  %v273_v24 = vmul.f32 0.2, %v225_v20 }
  0xe6   :  { %v185_v25 = vadd.f32 %v484_v16, %v184_v21  ;;  %v217_v26 = vadd.f32 %v484_v16, %v216_v22  ;;  %v368_v27 = vpop.f32.mrf.mxu0  ;;  %v376_v28 = vpop.f32.mrf.mxu1 }
  0xe7   :  { %v281_v29 = vsel %vm249_vm1, %v193_v19, %v265_v23  ;;  %v289_v30 = vsel %vm257_vm2, %v225_v20, %v273_v24  ;;  %v196_v31 = vadd.f32 %v368_v27, %v484_v16  ;;  %v228_v32 = vadd.f32 %v376_v28, %v484_v16 }
  0xe8   :  { %298 = vst.msk [vmem:[%s569_s3 + $0x10] sm:$0xff] %vm295_vm0, %v281_v29  ;;  %306 = vst.msk [vmem:[%s569_s3 + $0x50] sm:$0xff] %vm295_vm0, %v289_v30  ;;  %vm247_vm3 = vcmp.gt.f32.partialorder %v185_v25, 0.0  ;;  %v263_v33 = vmul.f32 0.2, %v185_v25  ;;  %vm255_vm4 = vcmp.gt.f32.partialorder %v217_v26, 0.0  ;;  %v187_v35 = vpop.f32.mrf.mxu0  ;;  %v219_v36 = vpop.f32.mrf.mxu1 }
  0xe9   :  { %v271_v34 = vmul.f32 0.2, %v217_v26  ;;  %vm250_vm5 = vcmp.gt.f32.partialorder %v196_v31, 0.0  ;;  %v266_v37 = vmul.f32 0.2, %v196_v31  ;;  %vm258_vm6 = vcmp.gt.f32.partialorder %v228_v32, 0.0 }
  0xea   :  { %v274_v38 = vmul.f32 0.2, %v228_v32  ;;  %v279_v39 = vsel %vm247_vm3, %v185_v25, %v263_v33  ;;  %v188_v41 = vadd.f32 %v484_v16, %v187_v35  ;;  %v220_v42 = vadd.f32 %v484_v16, %v219_v36  ;;  %v371_v43 = vpop.f32.mrf.mxu0  ;;  %v379_v44 = vpop.f32.mrf.mxu1 }
  0xeb   :  { %v287_v40 = vsel %vm255_vm4, %v217_v26, %v271_v34  ;;  %296 = vst.msk [vmem:[%s569_s3] sm:$0xff] %vm295_vm0, %v279_v39  ;;  %v282_v45 = vsel %vm250_vm5, %v196_v31, %v266_v37  ;;  %v209_v47 = vadd.f32 %v371_v43, %v484_v16  ;;  %v241_v48 = vadd.f32 %v379_v44, %v484_v16 }
  0xec   :  { %304 = vst.msk [vmem:[%s569_s3 + $0x40] sm:$0xff] %vm295_vm0, %v287_v40  ;;  %v290_v46 = vsel %vm258_vm6, %v228_v32, %v274_v38  ;;  %299 = vst.msk [vmem:[%s569_s3 + $0x18] sm:$0xff] %vm295_vm0, %v282_v45  ;;  %vm248_vm7 = vcmp.gt.f32.partialorder %v188_v41, 0.0  ;;  %v264_v49 = vmul.f32 0.2, %v188_v41  ;;  %vm256_vm8 = vcmp.gt.f32.partialorder %v220_v42, 0.0  ;;  %v200_v51 = vpop.f32.mrf.mxu0  ;;  %v232_v52 = vpop.f32.mrf.mxu1 }
  0xed   :  { %307 = vst.msk [vmem:[%s569_s3 + $0x58] sm:$0xff] %vm295_vm0, %v290_v46  ;;  %v272_v50 = vmul.f32 0.2, %v220_v42  ;;  %vm253_vm9 = vcmp.gt.f32.partialorder %v209_v47, 0.0  ;;  %v269_v53 = vmul.f32 0.2, %v209_v47  ;;  %v201_v57 = vadd.f32 %v484_v16, %v200_v51 }
  0xee   :  { %vm261_vm10 = vcmp.gt.f32.partialorder %v241_v48, 0.0  ;;  %v277_v54 = vmul.f32 0.2, %v241_v48  ;;  %v280_v55 = vsel %vm248_vm7, %v188_v41, %v264_v49  ;;  %v233_v58 = vadd.f32 %v484_v16, %v232_v52  ;;  %v372_v59 = vpop.f32.mrf.mxu0  ;;  %v380_v60 = vpop.f32.mrf.mxu1 }
  0xef   :  { %v288_v56 = vsel %vm256_vm8, %v220_v42, %v272_v50  ;;  %297 = vst.msk [vmem:[%s569_s3 + $0x8] sm:$0xff] %vm295_vm0, %v280_v55  ;;  %v285_v61 = vsel %vm253_vm9, %v209_v47, %v269_v53  ;;  %v212_v63 = vadd.f32 %v372_v59, %v484_v16  ;;  %v244_v0 = vadd.f32 %v380_v60, %v484_v16 }
  0xf0   :  { %305 = vst.msk [vmem:[%s569_s3 + $0x48] sm:$0xff] %vm295_vm0, %v288_v56  ;;  %v293_v62 = vsel %vm261_vm10, %v241_v48, %v277_v54  ;;  %302 = vst.msk [vmem:[%s569_s3 + $0x30] sm:$0xff] %vm295_vm0, %v285_v61  ;;  %vm251_vm11 = vcmp.gt.f32.partialorder %v201_v57, 0.0  ;;  %v267_v1 = vmul.f32 0.2, %v201_v57  ;;  %vm259_vm12 = vcmp.gt.f32.partialorder %v233_v58, 0.0  ;;  %v203_v3 = vpop.f32.mrf.mxu0  ;;  %v235_v4 = vpop.f32.mrf.mxu1 }
  0xf1   :  { %310 = vst.msk [vmem:[%s569_s3 + $0x70] sm:$0xff] %vm295_vm0, %v293_v62  ;;  %v275_v2 = vmul.f32 0.2, %v233_v58  ;;  %vm254_vm13 = vcmp.gt.f32.partialorder %v212_v63, 0.0  ;;  %v270_v5 = vmul.f32 0.2, %v212_v63  ;;  %v204_v9 = vadd.f32 %v484_v16, %v203_v3 }
  0xf2   :  { %vm262_vm14 = vcmp.gt.f32.partialorder %v244_v0, 0.0  ;;  %v278_v6 = vmul.f32 0.2, %v244_v0  ;;  %v283_v7 = vsel %vm251_vm11, %v201_v57, %v267_v1  ;;  %v236_v10 = vadd.f32 %v484_v16, %v235_v4 }
  0xf3   :  { %v291_v8 = vsel %vm259_vm12, %v233_v58, %v275_v2  ;;  %300 = vst.msk [vmem:[%s569_s3 + $0x20] sm:$0xff] %vm295_vm0, %v283_v7  ;;  %v286_v11 = vsel %vm254_vm13, %v212_v63, %v270_v5  ;;  %vm252_vm15 = vcmp.gt.f32.partialorder %v204_v9, 0.0  ;;  %v268_v13 = vmul.f32 0.2, %v204_v9 }
  0xf4   :  { %308 = vst.msk [vmem:[%s569_s3 + $0x60] sm:$0xff] %vm295_vm0, %v291_v8  ;;  %v294_v12 = vsel %vm262_vm14, %v244_v0, %v278_v6  ;;  %303 = vst.msk [vmem:[%s569_s3 + $0x38] sm:$0xff] %vm295_vm0, %v286_v11  ;;  %vm260_vm1 = vcmp.gt.f32.partialorder %v236_v10, 0.0  ;;  %v276_v14 = vmul.f32 0.2, %v236_v10 }
  0xf5   :  { %311 = vst.msk [vmem:[%s569_s3 + $0x78] sm:$0xff] %vm295_vm0, %v294_v12  ;;  %v284_v15 = vsel %vm252_vm15, %v204_v9, %v268_v13 }
  0xf6   :  { %v292_v16 = vsel %vm260_vm1, %v236_v10, %v276_v14  ;;  %301 = vst.msk [vmem:[%s569_s3 + $0x28] sm:$0xff] %vm295_vm0, %v284_v15 }
  0xf7   :  { %309 = vst.msk [vmem:[%s569_s3 + $0x68] sm:$0xff] %vm295_vm0, %v292_v16 }

// kernel: pose_rnn_forward.6
= control target key start
LH: loop header
LB: loop body
LE: loop exit
PB: predicated region body
PF: predicated region fallthrough
CT: control target
= control target key end

     0   :  { %vm198_vm0 = vcmask 130048   ;;  %s340_s1 = inlined_call_operand.vmem [shape: bf16[256,16], index: 1, kind: input, shape index: {}]   ;;  %s341_s0 = inlined_call_operand.vmem [shape: bf16[8,256], index: 0, kind: input, shape index: {}]   ;;  %s342_s2 = inlined_call_operand.vmem [shape: f32[1,16], index: 2, kind: input, shape index: {}]   ;;  %s343_s3 = inlined_call_operand.vmem [shape: f32[8,16], index: 3, kind: output, shape index: {}]  }
   0x1   :  { %v245_v0 = vld [vmem:[%s340_s1 + $0x78] sm:$0xff]   ;;  %v247_v2 = vld [vmem:[%s340_s1 + $0x70] sm:$0xff]   ;;  %v249_v4 = vld [vmem:[%s340_s1 + $0x68] sm:$0xff]  }
   0x2   :  { %v246_v1 = vld [vmem:[%s340_s1 + $0x38] sm:$0xff]   ;;  %223 = vmatprep.subr.bf16.mxu0 %v245_v0  ;;  %v248_v3 = vld [vmem:[%s340_s1 + $0x30] sm:$0xff]   ;;  %v250_v5 = vld [vmem:[%s340_s1 + $0x28] sm:$0xff]  }
   0x3   :  { %224 = vmatpush3.bf16.msra.mxu0 %v246_v1  ;;  %v251_v6 = vld [vmem:[%s340_s1 + $0x60] sm:$0xff]   ;;  %v253_v8 = vld [vmem:[%s340_s1 + $0x58] sm:$0xff]   ;;  %v255_v10 = vld [vmem:[%s340_s1 + $0x50] sm:$0xff]  }
   0x4   :  { %225 = vmatprep.subr.bf16.mxu0 %v247_v2  ;;  %v252_v7 = vld [vmem:[%s340_s1 + $0x20] sm:$0xff]   ;;  %v254_v9 = vld [vmem:[%s340_s1 + $0x18] sm:$0xff]   ;;  %v256_v13 = vld [vmem:[%s340_s1 + $0x10] sm:$0xff]  }
   0x5   :  { %v15_v11 = vld [vmem:[%s341_s0] sm:$0xff]  ;;  %v257_v14 = vld [vmem:[%s340_s1 + $0x48] sm:$0xff]  }
   0x6   :  { %v206_v12 = vcombine.high %v15_v11, %v15_v11  ;;  %v258_v15 = vld [vmem:[%s340_s1 + $0x8] sm:$0xff]   ;;  %v259_v16 = vld [vmem:[%s340_s1 + $0x40] sm:$0xff]   ;;  %v205_v18 = vcombine.low %v15_v11, %v15_v11 }
   0x7   :  { %226 = vmatpush3.bf16.msra.mxu0 %v248_v3  ;;  %v260_v17 = vld [vmem:[%s340_s1] sm:$0xff]  }
   0x8   :  { %227 = vmatprep.subr.bf16.mxu0 %v249_v4  ;;  %190 = vmatprep.mubr.bf16.mxu0 %v206_v12  ;;  %v204_v20 = vld [vmem:[%s342_s2] ss:$0 sm:$0xff] }
   0xb   :  { %228 = vmatpush3.bf16.msra.mxu0 %v250_v5 }
   0xc   :  { %229 = vmatprep.subr.bf16.mxu0 %v251_v6 }
   0xf   :  { %230 = vmatpush3.bf16.msra.mxu0 %v252_v7 }
  0x10   :  { %231 = vmatprep.subr.bf16.mxu0 %v253_v8 }
  0x13   :  { %232 = vmatpush3.bf16.msra.mxu0 %v254_v9 }
  0x14   :  { %233 = vmatprep.subr.bf16.mxu0 %v255_v10 }
  0x17   :  { %234 = vmatpush3.bf16.msra.mxu0 %v256_v13 }
  0x18   :  { %235 = vmatprep.subr.bf16.mxu0 %v257_v14 }
  0x1b   :  { %236 = vmatpush3.bf16.msra.mxu0 %v258_v15 }
  0x1c   :  { %237 = vmatprep.subr.bf16.mxu0 %v259_v16 }
  0x1f   :  { %238 = vmatpush3.bf16.msra.mxu0 %v260_v17 }
  0x22   :  { %191 = vmatmul.mubr.bf16.vlgmr.msra.gmra.mxu0 %v205_v18 }
  0xe2   :  { %v239_v19 = vpop.f32.mrf.mxu0 }
  0xe4   :  { %v240_v21 = vpop.f32.mrf.mxu0 }
  0xe5   :  { %v241_v22 = vadd.f32 %v240_v21, %v239_v19 }
  0xe6   :  { %v242_v23 = vpop.f32.mrf.mxu0 }
  0xe7   :  { %v193_v24 = vadd.f32 %v241_v22, %v204_v20 }
  0xe8   :  { %v243_v25 = vpop.f32.mrf.mxu0 }
  0xe9   :  { %199 = vst.msk [vmem:[%s343_s3] sm:$0xff] %vm198_vm0, %v193_v24 }

// kernel: pose_rnn_forward.7
= control target key start
LH: loop header
LB: loop body
LE: loop exit
PB: predicated region body
PF: predicated region fallthrough
CT: control target
= control target key end

     0   :  { %v2572_v0 = vmov 0.0   ;;  %vm2573_vm0 = vmmov 0   ;;  %vm86_vm1 = vcmask 130048   ;;  %v52_v4 = vlaneseq  ;;  %s2575_s29 = smov 64   ;;  %s3257_s1 = inlined_call_operand.vmem [shape: f32[16,128], index: 1, kind: input, shape index: {}]   ;;  %s3258_s0 = inlined_call_operand.vmem [shape: f32[8,16], index: 0, kind: input, shape index: {}]   ;;  %s3259_s4 = inlined_call_operand.vmem [shape: f32[1,128], index: 4, kind: input, shape index: {}]   ;;  %s3260_s3 = inlined_call_operand.vmem [shape: f32[32,128], index: 3, kind: input, shape index: {}]   ;;  %s3261_s2 = inlined_call_operand.vmem [shape: f32[32,128], index: 2, kind: input, shape index: {}]   ;;  %s3262_s8 = inlined_call_operand.vmem [shape: f32[32,128], index: 8, kind: input, shape index: {}]   ;;  %s3263_s5 = inlined_call_operand.vmem [shape: f32[32,128], index: 5, kind: input, shape index: {}]   ;;  %s3264_s10 = inlined_call_operand.vmem [shape: f32[1,128], index: 10, kind: input, shape index: {}]   ;;  %s3265_s7 = inlined_call_operand.vmem [shape: f32[1,128], index: 7, kind: input, shape index: {}]   ;;  %s3266_s9 = inlined_call_operand.vmem [shape: f32[32,128], index: 9, kind: input, shape index: {}]   ;;  %s3267_s6 = inlined_call_operand.vmem [shape: f32[32,128], index: 6, kind: input, shape index: {}]   ;;  %s3268_s11 = inlined_call_operand.vmem [shape: f32[32,12], index: 11, kind: input, shape index: {}]   ;;  %s3269_s13 = inlined_call_operand.vmem [shape: f32[32,12], index: 13, kind: input, shape index: {}]   ;;  %s3270_s12 = inlined_call_operand.vmem [shape: f32[1,12], index: 12, kind: input, shape index: {}]   ;;  %s3271_s14 = inlined_call_operand.vmem [shape: f32[1,12], index: 14, kind: input, shape index: {}]   ;;  %s3272_s15 = inlined_call_operand.vmem [shape: f32[28,12], index: 15, kind: output, shape index: {0}]   ;;  %s3273_s16 = inlined_call_operand.vmem [shape: f32[4,12], index: 16, kind: output, shape index: {1}]  }
   0x1   :  { %3275 = sst [smem:[#allocation5_spill]] %s3257_s1  ;;  %2275 = vmatprep.subr.mxu0 %v2572_v0  ;;  %2279 = vmatprep.mubr.msk.f32.mxu0 %vm2573_vm0, %v2572_v0  ;;  %v76_v3 = vld [vmem:[%s3258_s0] sm:$0xff]  ;;  %v2574_v7 = vmov 0.5   ;;  %v2703_v22 = vld [vmem:[%s3260_s3 + $0x18] sm:$0xff]  ;;  %v2708_v23 = vld [vmem:[%s3260_s3 + $0x10] sm:$0xff]  ;;  %vm185_vm5 = vcmask 254976  }
   0x2   :  { %s3276_s23 = sld [smem:[#allocation5_spill]]  ;;  %2282 = vmatprep.subr.mxu1 %v2572_v0  ;;  %2290 = vmatprep.mubr.msk.f32.mxu1 %vm2573_vm0, %v2572_v0  ;;  %v2681_v5 = vand.u32 127, %v52_v4  ;;  %v2152_v6 = vld [vmem:[%s3259_s4] ss:$0 sm:$0xff]  ;;  %s2576_s4 = smov 32   ;;  %v2716_v24 = vld [vmem:[%s3260_s3 + $0x8] sm:$0xff] }
   0x3   :  { %2283 = vmatpush3.msra.mxu1 %v2703_v22  ;;  %v2725_v25 = vld [vmem:[%s3260_s3] sm:$0xff]  ;;  %vm188_vm6 = vcmask 261120   ;;  %vm293_vm7 = vcmask 257026   ;;  %vm402_vm8 = vcmask 259076   ;;  %vm511_vm9 = vcmask 261126  }
   0x4   :  { %vm54_vm2 = vcmp.ge.s32.totalorder %v2681_v5, 64  ;;  %vm55_vm3 = vcmp.lt.s32.totalorder %v2681_v5, 96  ;;  %2284 = vmatprep.subr.mxu1 %v2572_v0  ;;  %vm1956_vm11 = vcmp.lt.s32.totalorder %v2681_v5, 6  ;;  %vm2033_vm14 = vcmask 97280  }
   0x5   :  { %vm56_vm4 = vmand %vm54_vm2, %vm55_vm3  ;;  %2285 = vmatpush3.msra.mxu1 %v2708_v23 }
   0x6   :  { %v2688_v8 = vsel %vm56_vm4, 1.0, %v2574_v7  ;;  %v2694_v14 = vsel %vm56_vm4, 0.0, %v2574_v7  ;;  %2286 = vmatprep.subr.mxu1 %v2572_v0 }
   0x7   :  { %2287 = vmatpush3.msra.mxu1 %v2716_v24 }
   0x8   :  { %v78_v1 = vld [vmem:[%s3276_s23 + $0x8] sm:$0xff]  ;;  %v77_v2 = vld [vmem:[%s3276_s23] sm:$0xff]  ;;  %2288 = vmatprep.subr.mxu1 %v2572_v0 }
   0x9   :  { %2276 = vmatpush3.msra.mxu0 %v78_v1  ;;  %2289 = vmatpush3.msra.mxu1 %v2725_v25 }
   0xa   :  { %2277 = vmatprep.subr.mxu0 %v2572_v0  ;;  %2304 = vmatprep.subr.mxu1 %v2572_v0 }
   0xb   :  { %2278 = vmatpush3.msra.mxu0 %v77_v2 }
   0xc   :  { %2280 = vmatmul.mubr.msk.f32.vlgmr.msra.gmra.mxu0 %vm86_vm1, %v76_v3  ;;  %2293 = vmatprep.subr.mxu0 %v2572_v0  ;;  %vm2037_vm1 = vcmask 93184  }
   0xd   :  { %2301 = vmatprep.mubr.msk.f32.mxu0 %vm2573_vm0, %v2572_v0  ;;  %2294 = vmatpush3.msra.mxu0 %v2703_v22 }
   0xe   :  { %2295 = vmatprep.subr.mxu0 %v2572_v0 }
   0xf   :  { %2296 = vmatpush3.msra.mxu0 %v2708_v23 }
  0x10   :  { %2297 = vmatprep.subr.mxu0 %v2572_v0 }
  0x11   :  { %2298 = vmatpush3.msra.mxu0 %v2716_v24 }
  0x12   :  { %2299 = vmatprep.subr.mxu0 %v2572_v0 }
  0x13   :  { %2300 = vmatpush3.msra.mxu0 %v2725_v25 }
  0x14   :  { %2315 = vmatprep.subr.mxu0 %v2572_v0 }
  0xcc   :  { %v156_v9 = vpop.f32.mrf.mxu0 }
  0xcd   :  { %v2690_v10 = vadd.f32 %v2152_v6, %v156_v9 }
  0xce   :  { %v2281_v11 = vpop.f32.mrf.mxu0 }
  0xcf   :  { %v160_v12 = vmul.f32 %v2690_v10, %v2688_v8 }
  0xd1   :  { %2488 = vtanh.f32 %v160_v12 }
  0xde   :  { %v2489_v13 = vpop.eup %2488 }
  0xdf   :  { %v162_v15 = vmul.f32 %v2489_v13, %v2688_v8 }
  0xe1   :  { %v163_v16 = vadd.f32 %v162_v15, %v2694_v14 }
  0xe3   :  { %166 = vrot.lane.b32.xlu0 %v163_v16, %s2575_s29  ;;  %v164_v19 = vmul.f32 0.0, %v163_v16 }
 0x155   :  { %v167_v17 = vpop.permute.xlu0 %166 }
 0x156   :  { %v169_v18 = vmul.f32 %v167_v17, %v163_v16 }
 0x158   :  { %171 = vrot.lane.b32.xlu0 %v169_v18, %s2576_s4 }
 0x1ca   :  { %v172_v20 = vpop.permute.xlu0 %171 }
 0x1cb   :  { %v174_v21 = vadd.f32 %v172_v20, %v164_v19 }
 0x1cd   :  { %2490 = vtanh.f32 %v174_v21  ;;  %v270_v40 = vrot.slane %v174_v21, 6 }
 0x1da   :  { %v2491_v26 = vpop.eup %2490 }
 0x1db   :  { %177 = vrot.lane.b32.xlu1 %v2491_v26, %s2575_s29 }
 0x24d   :  { %v178_v27 = vpop.permute.xlu1 %177 }
 0x24e   :  { %v180_v28 = vmul.f32 %v178_v27, %v163_v16 }
 0x250   :  { %182 = vrot.lane.b32.xlu1 %v180_v28, %s2576_s4 }
 0x2c2   :  { %v183_v29 = vpop.permute.xlu1 %182 }
 0x2c3   :  { %186 = vst.msk [vmem:[#allocation2] sm:$0x3] %vm185_vm5, %v183_v29  ;;  %187 = vst.msk [vmem:[#allocation3] sm:$0x3] %vm185_vm5, %v183_v29  ;;  %2291 = vmatmul.mubr.msk.f32.vlgmr.msra.gmra.mxu1 %vm188_vm6, %v183_v29  ;;  %v62_v29 = vld [vmem:[%s3261_s2 + $0x18] sm:$0xff] }
 0x2c4   :  { %2305 = vmatpush3.msra.mxu1 %v2703_v22  ;;  %2312 = vmatprep.mubr.msk.f32.mxu1 %vm2573_vm0, %v2572_v0 }
 0x2c5   :  { %2306 = vmatprep.subr.mxu1 %v2572_v0 }
 0x2c6   :  { %2307 = vmatpush3.msra.mxu1 %v2708_v23 }
 0x2c7   :  { %2308 = vmatprep.subr.mxu1 %v2572_v0 }
 0x2c8   :  { %2309 = vmatpush3.msra.mxu1 %v2716_v24 }
 0x2c9   :  { %2310 = vmatprep.subr.mxu1 %v2572_v0 }
 0x2ca   :  { %2311 = vmatpush3.msra.mxu1 %v2725_v25 }
 0x2cb   :  { %2326 = vmatprep.subr.mxu1 %v2572_v0 }
 0x383   :  { %v257_v30 = vpop.f32.mrf.mxu1 }
 0x384   :  { %v262_v31 = vrot.slane %v257_v30, 6  ;;  %v61_v30 = vld [vmem:[%s3261_s2 + $0x10] sm:$0xff] }
 0x385   :  { %v2292_v32 = vpop.f32.mrf.mxu1 }
 0x386   :  { %v264_v33 = vadd.f32 %v262_v31, %v2690_v10  ;;  %v60_v31 = vld [vmem:[%s3261_s2 + $0x8] sm:$0xff]  ;;  %v59_v32 = vld [vmem:[%s3261_s2] sm:$0xff] }
 0x388   :  { %v265_v34 = vmul.f32 %v264_v33, %v2688_v8 }
 0x38a   :  { %2492 = vtanh.f32 %v265_v34 }
 0x397   :  { %v2493_v35 = vpop.eup %2492 }
 0x398   :  { %v267_v36 = vmul.f32 %v2493_v35, %v2688_v8 }
 0x39a   :  { %v268_v37 = vadd.f32 %v267_v36, %v2694_v14 }
 0x39c   :  { %274 = vrot.lane.b32.xlu0 %v268_v37, %s2575_s29  ;;  %v272_v41 = vmul.f32 %v270_v40, %v268_v37 }
 0x40e   :  { %v275_v38 = vpop.permute.xlu0 %274 }
 0x40f   :  { %v277_v39 = vmul.f32 %v275_v38, %v268_v37 }
 0x411   :  { %279 = vrot.lane.b32.xlu1 %v277_v39, %s2576_s4 }
 0x483   :  { %v280_v42 = vpop.permute.xlu1 %279 }
 0x484   :  { %v282_v43 = vadd.f32 %v280_v42, %v272_v41 }
 0x486   :  { %2494 = vtanh.f32 %v282_v43  ;;  %v379_v59 = vrot.slane %v282_v43, 6 }
 0x493   :  { %v2495_v44 = vpop.eup %2494 }
 0x494   :  { %285 = vrot.lane.b32.xlu0 %v2495_v44, %s2575_s29 }
 0x506   :  { %v286_v45 = vpop.permute.xlu0 %285 }
 0x507   :  { %v288_v46 = vmul.f32 %v286_v45, %v268_v37 }
 0x509   :  { %v295_v47 = vrot.slane %v288_v46, 2 }
 0x50b   :  { %296 = vrot.lane.b32.xlu1 %v295_v47, %s2576_s4 }
 0x57d   :  { %v297_v48 = vpop.permute.xlu1 %296 }
 0x57e   :  { %2302 = vmatmul.mubr.msk.f32.vlgmr.msra.gmra.mxu0 %vm188_vm6, %v297_v48 }
 0x57f   :  { %2323 = vmatprep.mubr.msk.f32.mxu0 %vm2573_vm0, %v2572_v0  ;;  %2316 = vmatpush3.msra.mxu0 %v62_v29 }
 0x580   :  { %2317 = vmatprep.subr.mxu0 %v2572_v0 }
 0x581   :  { %2318 = vmatpush3.msra.mxu0 %v61_v30  ;;  %v2161_v30 = vld [vmem:[%s3264_s10] ss:$0 sm:$0xff] }
 0x582   :  { %2319 = vmatprep.subr.mxu0 %v2572_v0 }
 0x583   :  { %2320 = vmatpush3.msra.mxu0 %v60_v31 }
 0x584   :  { %2321 = vmatprep.subr.mxu0 %v2572_v0 }
 0x585   :  { %2322 = vmatpush3.msra.mxu0 %v59_v32 }
 0x586   :  { %2337 = vmatprep.subr.mxu0 %v2572_v0 }
 0x63e   :  { %v366_v49 = vpop.f32.mrf.mxu0 }
 0x63f   :  { %v371_v50 = vrot.slane %v366_v49, 4 }
 0x640   :  { %v2303_v51 = vpop.f32.mrf.mxu0 }
 0x641   :  { %v373_v52 = vadd.f32 %v371_v50, %v2690_v10 }
 0x643   :  { %v374_v53 = vmul.f32 %v373_v52, %v2688_v8 }
 0x645   :  { %2496 = vtanh.f32 %v374_v53 }
 0x652   :  { %v2497_v54 = vpop.eup %2496 }
 0x653   :  { %v376_v55 = vmul.f32 %v2497_v54, %v2688_v8 }
 0x655   :  { %v377_v56 = vadd.f32 %v376_v55, %v2694_v14 }
 0x657   :  { %383 = vrot.lane.b32.xlu0 %v377_v56, %s2575_s29  ;;  %v381_v60 = vmul.f32 %v379_v59, %v377_v56 }
 0x6c9   :  { %v384_v57 = vpop.permute.xlu0 %383 }
 0x6ca   :  { %v386_v58 = vmul.f32 %v384_v57, %v377_v56 }
 0x6cc   :  { %388 = vrot.lane.b32.xlu1 %v386_v58, %s2576_s4 }
 0x73e   :  { %v389_v61 = vpop.permute.xlu1 %388 }
 0x73f   :  { %v391_v62 = vadd.f32 %v389_v61, %v381_v60 }
 0x741   :  { %2498 = vtanh.f32 %v391_v62  ;;  %v488_v19 = vrot.slane %v391_v62, 6 }
 0x74e   :  { %v2499_v63 = vpop.eup %2498 }
 0x74f   :  { %394 = vrot.lane.b32.xlu0 %v2499_v63, %s2575_s29 }
 0x7c1   :  { %v395_v1 = vpop.permute.xlu0 %394 }
 0x7c2   :  { %v397_v2 = vmul.f32 %v395_v1, %v377_v56 }
 0x7c4   :  { %v404_v3 = vrot.slane %v397_v2, 4 }
 0x7c6   :  { %405 = vrot.lane.b32.xlu1 %v404_v3, %s2576_s4 }
 0x838   :  { %v406_v4 = vpop.permute.xlu1 %405 }
 0x839   :  { %2313 = vmatmul.mubr.msk.f32.vlgmr.msra.gmra.mxu1 %vm188_vm6, %v406_v4 }
 0x83a   :  { %2327 = vmatpush3.msra.mxu1 %v2703_v22  ;;  %2334 = vmatprep.mubr.msk.f32.mxu1 %vm2573_vm0, %v2572_v0 }
 0x83b   :  { %2328 = vmatprep.subr.mxu1 %v2572_v0 }
 0x83c   :  { %2329 = vmatpush3.msra.mxu1 %v2708_v23 }
 0x83d   :  { %2330 = vmatprep.subr.mxu1 %v2572_v0 }
 0x83e   :  { %2331 = vmatpush3.msra.mxu1 %v2716_v24 }
 0x83f   :  { %2332 = vmatprep.subr.mxu1 %v2572_v0 }
 0x840   :  { %2333 = vmatpush3.msra.mxu1 %v2725_v25 }
 0x841   :  { %2348 = vmatprep.subr.mxu1 %v2572_v0 }
 0x8f9   :  { %v475_v6 = vpop.f32.mrf.mxu1 }
 0x8fa   :  { %v480_v7 = vrot.slane %v475_v6, 2  ;;  %v940_v6 = vld [vmem:[%s3262_s8 + $0x18] sm:$0xff] }
 0x8fb   :  { %v2314_v9 = vpop.f32.mrf.mxu1 }
 0x8fc   :  { %v482_v11 = vadd.f32 %v480_v7, %v2690_v10  ;;  %v939_v9 = vld [vmem:[%s3262_s8 + $0x10] sm:$0xff] }
 0x8fe   :  { %v483_v12 = vmul.f32 %v482_v11, %v2688_v8  ;;  %v938_v11 = vld [vmem:[%s3262_s8 + $0x8] sm:$0xff] }
 0x900   :  { %2500 = vtanh.f32 %v483_v12  ;;  %v937_v12 = vld [vmem:[%s3262_s8] sm:$0xff] }
 0x90d   :  { %v2501_v13 = vpop.eup %2500 }
 0x90e   :  { %v485_v15 = vmul.f32 %v2501_v13, %v2688_v8  ;;  %v2891_v13 = vld [vmem:[%s3263_s5 + $0x18] sm:$0xff] }
 0x910   :  { %v486_v16 = vadd.f32 %v485_v15, %v2694_v14 }
 0x912   :  { %492 = vrot.lane.b32.xlu0 %v486_v16, %s2575_s29  ;;  %v490_v20 = vmul.f32 %v488_v19, %v486_v16 }
 0x984   :  { %v493_v17 = vpop.permute.xlu0 %492 }
 0x985   :  { %v495_v18 = vmul.f32 %v493_v17, %v486_v16  ;;  %v2907_v17 = vld [vmem:[%s3263_s5 + $0x8] sm:$0xff] }
 0x987   :  { %497 = vrot.lane.b32.xlu1 %v495_v18, %s2576_s4  ;;  %v2914_v18 = vld [vmem:[%s3263_s5] sm:$0xff] }
 0x98b   :  { %290 = vrot.lane.b32.xlu1 %v288_v46, %s2576_s4 }
 0x9f9   :  { %v498_v21 = vpop.permute.xlu1 %497 }
 0x9fa   :  { %v2788_v26 = vadd.f32 %v498_v21, %v490_v20 }
 0x9fc   :  { %2502 = vtanh.f32 %v2788_v26 }
 0x9fd   :  { %v291_v27 = vpop.permute.xlu1 %290 }
 0x9fe   :  { %294 = vst.msk [vmem:[#allocation2] sm:$0xc] %vm293_vm7, %v291_v27 }
 0xa09   :  { %v2503_v28 = vpop.eup %2502 }
 0xa0a   :  { %503 = vrot.lane.b32.xlu0 %v2503_v28, %s2575_s29 }
 0xa0e   :  { %399 = vrot.lane.b32.xlu0 %v397_v2, %s2576_s4 }
 0xa7c   :  { %v504_v33 = vpop.permute.xlu0 %503 }
 0xa7d   :  { %v2810_v34 = vmul.f32 %v504_v33, %v486_v16  ;;  %v2898_v16 = vld [vmem:[%s3263_s5 + $0x10] sm:$0xff] }
 0xa7f   :  { %508 = vrot.lane.b32.xlu1 %v2810_v34, %s2576_s4  ;;  %v1162_v1 = vrot.slane %v2810_v34, 6 }
 0xa80   :  { %v400_v35 = vpop.permute.xlu0 %399 }
 0xa81   :  { %403 = vst.msk [vmem:[#allocation2] sm:$0x30] %vm402_vm8, %v400_v35  ;;  %v2943_v35 = vld [vmem:[%s3265_s7] ss:$0 sm:$0xff] }
 0xaf1   :  { %v509_v36 = vpop.permute.xlu1 %508 }
 0xaf2   :  { %512 = vst.msk [vmem:[#allocation2] sm:$0xc0] %vm511_vm9, %v509_v36 }
 0xaf9   :  { %v2816_v37 = vld [vmem:[#allocation2] sm:$0xff] }
 0xafa   :  { %2324 = vmatmul.mubr.msk.f32.vlgmr.msra.gmra.mxu0 %vm188_vm6, %v2816_v37 }
 0xafb   :  { %2338 = vmatpush3.msra.mxu0 %v2703_v22  ;;  %2345 = vmatprep.mubr.msk.f32.mxu0 %vm2573_vm0, %v2572_v0 }
 0xafc   :  { %2339 = vmatprep.subr.mxu0 %v2572_v0 }
 0xafd   :  { %2340 = vmatpush3.msra.mxu0 %v2708_v23 }
 0xafe   :  { %2341 = vmatprep.subr.mxu0 %v2572_v0 }
 0xaff   :  { %2342 = vmatpush3.msra.mxu0 %v2716_v24 }
 0xb00   :  { %2343 = vmatprep.subr.mxu0 %v2572_v0 }
 0xb01   :  { %2344 = vmatpush3.msra.mxu0 %v2725_v25 }
 0xb02   :  { %2359 = vmatprep.subr.mxu0 %v2572_v0 }
 0xbba   :  { %v583_v38 = vpop.f32.mrf.mxu0 }
 0xbbb   :  { %v2831_v39 = vadd.f32 %v583_v38, %v2690_v10 }
 0xbbc   :  { %v2325_v40 = vpop.f32.mrf.mxu0 }
 0xbbd   :  { %v588_v41 = vmul.f32 %v2831_v39, %v2688_v8 }
 0xbbf   :  { %2504 = vtanh.f32 %v588_v41 }
 0xbcc   :  { %v2505_v42 = vpop.eup %2504 }
 0xbcd   :  { %v590_v43 = vmul.f32 %v2505_v42, %v2688_v8 }
 0xbcf   :  { %v591_v44 = vadd.f32 %v590_v43, %v2694_v14 }
 0xbd1   :  { %594 = vrot.lane.b32.xlu0 %v591_v44, %s2575_s29  ;;  %v592_v47 = vmul.f32 0.0, %v591_v44 }
 0xc43   :  { %v595_v45 = vpop.permute.xlu0 %594 }
 0xc44   :  { %v597_v46 = vmul.f32 %v595_v45, %v591_v44 }
 0xc46   :  { %599 = vrot.lane.b32.xlu1 %v597_v46, %s2576_s4 }
 0xcb8   :  { %v600_v48 = vpop.permute.xlu1 %599 }
 0xcb9   :  { %v602_v10 = vadd.f32 %v600_v48, %v592_v47 }
 0xcbb   :  { %2506 = vtanh.f32 %v602_v10 }
 0xcc8   :  { %v2507_v49 = vpop.eup %2506 }
 0xcc9   :  { %605 = vrot.lane.b32.xlu0 %v2507_v49, %s2575_s29 }
 0xd3b   :  { %v606_v50 = vpop.permute.xlu0 %605 }
 0xd3c   :  { %v608_v51 = vmul.f32 %v606_v50, %v591_v44 }
 0xd3e   :  { %610 = vrot.lane.b32.xlu1 %v608_v51, %s2576_s4 }
 0xdb0   :  { %v611_v52 = vpop.permute.xlu1 %610 }
 0xdb1   :  { %613 = vst.msk [vmem:[#allocation2 + $0x8] sm:$0x3] %vm185_vm5, %v611_v52  ;;  %614 = vst.msk [vmem:[#allocation3 + $0x2] sm:$0x3] %vm185_vm5, %v611_v52  ;;  %2335 = vmatmul.mubr.msk.f32.vlgmr.msra.gmra.mxu1 %vm188_vm6, %v611_v52 }
 0xdb2   :  { %2349 = vmatpush3.msra.mxu1 %v2703_v22  ;;  %2356 = vmatprep.mubr.msk.f32.mxu1 %vm2573_vm0, %v2572_v0 }
 0xdb3   :  { %2350 = vmatprep.subr.mxu1 %v2572_v0 }
 0xdb4   :  { %2351 = vmatpush3.msra.mxu1 %v2708_v23 }
 0xdb5   :  { %2352 = vmatprep.subr.mxu1 %v2572_v0 }
 0xdb6   :  { %2353 = vmatpush3.msra.mxu1 %v2716_v24 }
 0xdb7   :  { %2354 = vmatprep.subr.mxu1 %v2572_v0 }
 0xdb8   :  { %2355 = vmatpush3.msra.mxu1 %v2725_v25  ;;  %v696_v25 = vrot.slane %v602_v10, 6  ;;  %v936_v15 = vld [vmem:[#allocation3] sm:$0xf] }
 0xdb9   :  { %2370 = vmatprep.subr.mxu1 %v2572_v0 }
 0xe71   :  { %v683_v53 = vpop.f32.mrf.mxu1 }
 0xe72   :  { %v688_v54 = vrot.slane %v683_v53, 6 }
 0xe73   :  { %v2336_v22 = vpop.f32.mrf.mxu1 }
 0xe74   :  { %v690_v55 = vadd.f32 %v688_v54, %v2831_v39 }
 0xe76   :  { %v691_v56 = vmul.f32 %v690_v55, %v2688_v8 }
 0xe78   :  { %2508 = vtanh.f32 %v691_v56 }
 0xe85   :  { %v2509_v57 = vpop.eup %2508 }
 0xe86   :  { %v693_v23 = vmul.f32 %v2509_v57, %v2688_v8 }
 0xe88   :  { %v694_v58 = vadd.f32 %v693_v23, %v2694_v14 }
 0xe8a   :  { %700 = vrot.lane.b32.xlu0 %v694_v58, %s2575_s29  ;;  %v698_v60 = vmul.f32 %v696_v25, %v694_v58  ;;  %v1242_v25 = vrot.slane %v2788_v26, 6 }
 0xefc   :  { %v701_v24 = vpop.permute.xlu0 %700 }
 0xefd   :  { %v703_v59 = vmul.f32 %v701_v24, %v694_v58 }
 0xeff   :  { %705 = vrot.lane.b32.xlu1 %v703_v59, %s2576_s4 }
 0xf71   :  { %v706_v61 = vpop.permute.xlu1 %705 }
 0xf72   :  { %v2860_v62 = vadd.f32 %v706_v61, %v698_v60 }
 0xf74   :  { %2510 = vtanh.f32 %v2860_v62  ;;  %v804_v55 = vrot.slane %v2860_v62, 6 }
 0xf81   :  { %v2511_v63 = vpop.eup %2510 }
 0xf82   :  { %711 = vrot.lane.b32.xlu0 %v2511_v63, %s2575_s29 }
 0xf86   :  { %1163 = vrot.lane.b32.xlu0 %v1162_v1, %s2576_s4 }
 0xff4   :  { %v712_v2 = vpop.permute.xlu0 %711 }
 0xff5   :  { %v2866_v3 = vmul.f32 %v712_v2, %v694_v58 }
 0xff7   :  { %v720_v4 = vrot.slane %v2866_v3, 2 }
 0xff8   :  { %v1164_v19 = vpop.permute.xlu0 %1163 }
 0xff9   :  { %721 = vrot.lane.b32.xlu1 %v720_v4, %s2576_s4 }
0x106b   :  { %v722_v7 = vpop.permute.xlu1 %721 }
0x106c   :  { %2346 = vmatmul.mubr.msk.f32.vlgmr.msra.gmra.mxu0 %vm188_vm6, %v722_v7 }
0x106d   :  { %2360 = vmatpush3.msra.mxu0 %v940_v6  ;;  %2367 = vmatprep.mubr.msk.f32.mxu0 %vm2573_vm0, %v2572_v0 }
0x106e   :  { %2361 = vmatprep.subr.mxu0 %v2572_v0 }
0x106f   :  { %2362 = vmatpush3.msra.mxu0 %v939_v9 }
0x1070   :  { %2363 = vmatprep.subr.mxu0 %v2572_v0 }
0x1071   :  { %2364 = vmatpush3.msra.mxu0 %v938_v11 }
0x1072   :  { %2365 = vmatprep.subr.mxu0 %v2572_v0 }
0x1073   :  { %2366 = vmatpush3.msra.mxu0 %v937_v12 }
0x1074   :  { %2368 = vmatmul.mubr.msk.f32.vlgmr.msra.gmra.mxu0 %vm188_vm6, %v936_v15  ;;  %2381 = vmatprep.subr.mxu0 %v2572_v0  ;;  %v75_v15 = vld [vmem:[%s3266_s9 + $0x18] sm:$0xff] }
0x1075   :  { %2382 = vmatpush3.msra.mxu0 %v2891_v13  ;;  %2389 = vmatprep.mubr.msk.f32.mxu0 %vm2573_vm0, %v2572_v0 }
0x1076   :  { %2383 = vmatprep.subr.mxu0 %v2572_v0 }
0x1077   :  { %2384 = vmatpush3.msra.mxu0 %v2898_v16 }
0x1078   :  { %2385 = vmatprep.subr.mxu0 %v2572_v0 }
0x1079   :  { %2386 = vmatpush3.msra.mxu0 %v2907_v17 }
0x107a   :  { %2387 = vmatprep.subr.mxu0 %v2572_v0 }
0x107b   :  { %2388 = vmatpush3.msra.mxu0 %v2914_v18 }
0x107c   :  { %2390 = vmatmul.mubr.msk.f32.vlgmr.msra.gmra.mxu0 %vm188_vm6, %v1164_v19  ;;  %2403 = vmatprep.subr.mxu0 %v2572_v0 }
0x107d   :  { %2404 = vmatpush3.msra.mxu0 %v2891_v13  ;;  %2411 = vmatprep.mubr.msk.f32.mxu0 %vm2573_vm0, %v2572_v0 }
0x107e   :  { %2405 = vmatprep.subr.mxu0 %v2572_v0 }
0x107f   :  { %2406 = vmatpush3.msra.mxu0 %v2898_v16 }
0x1080   :  { %2407 = vmatprep.subr.mxu0 %v2572_v0 }
0x1081   :  { %2408 = vmatpush3.msra.mxu0 %v2907_v17 }
0x1082   :  { %2409 = vmatprep.subr.mxu0 %v2572_v0 }
0x1083   :  { %2410 = vmatpush3.msra.mxu0 %v2914_v18 }
0x1084   :  { %2425 = vmatprep.subr.mxu0 %v2572_v0 }
0x112c   :  { %v791_v20 = vpop.f32.mrf.mxu0 }
0x112d   :  { %v796_v21 = vrot.slane %v791_v20, 4  ;;  %v74_v20 = vld [vmem:[%s3266_s9 + $0x10] sm:$0xff] }
0x112e   :  { %v2347_v27 = vpop.f32.mrf.mxu0 }
0x112f   :  { %v798_v28 = vadd.f32 %v796_v21, %v2831_v39  ;;  %v73_v21 = vld [vmem:[%s3266_s9 + $0x8] sm:$0xff] }
0x1131   :  { %v799_v29 = vmul.f32 %v798_v28, %v2688_v8  ;;  %v72_v28 = vld [vmem:[%s3266_s9] sm:$0xff] }
0x1133   :  { %2512 = vtanh.f32 %v799_v29 }
0x1134   :  { %v1017_v31 = vpop.f32.mrf.mxu0 }
0x1135   :  { %v2936_v32 = vadd.f32 %v2161_v30, %v1017_v31 }
0x1136   :  { %v2369_v33 = vpop.f32.mrf.mxu0 }
0x1137   :  { %v1021_v34 = vmul.f32 %v2936_v32, %v2688_v8 }
0x1139   :  { %2514 = vtanh.f32 %v1021_v34 }
0x113c   :  { %v1233_v36 = vpop.f32.mrf.mxu0 }
0x113d   :  { %v1234_v38 = vadd.f32 %v2943_v35, %v1233_v36 }
0x113e   :  { %v2391_v40 = vpop.f32.mrf.mxu0 }
0x113f   :  { %v1237_v41 = vmul.f32 %v1234_v38, %v2688_v8 }
0x1140   :  { %v2513_v42 = vpop.eup %2512 }
0x1141   :  { %2516 = vtanh.f32 %v1237_v41  ;;  %v801_v43 = vmul.f32 %v2513_v42, %v2688_v8 }
0x1143   :  { %v802_v44 = vadd.f32 %v801_v43, %v2694_v14 }
0x1145   :  { %808 = vrot.lane.b32.xlu1 %v802_v44, %s2575_s29  ;;  %v806_v56 = vmul.f32 %v804_v55, %v802_v44 }
0x1146   :  { %v2515_v45 = vpop.eup %2514 }
0x1147   :  { %v1023_v46 = vmul.f32 %v2515_v45, %v2688_v8 }
0x1149   :  { %v1024_v47 = vadd.f32 %v1023_v46, %v2694_v14 }
0x114b   :  { %1027 = vrot.lane.b32.xlu0 %v1024_v47, %s2575_s29  ;;  %v1025_v58 = vmul.f32 0.0, %v1024_v47 }
0x114e   :  { %v2517_v48 = vpop.eup %2516 }
0x114f   :  { %v1239_v10 = vmul.f32 %v2517_v48, %v2688_v8 }
0x1151   :  { %v1240_v49 = vadd.f32 %v1239_v10, %v2694_v14 }
0x1153   :  { %1246 = vrot.lane.b32.xlu1 %v1240_v49, %s2575_s29  ;;  %v1244_v60 = vmul.f32 %v1242_v25, %v1240_v49 }
0x11b7   :  { %v809_v50 = vpop.permute.xlu1 %808 }
0x11b8   :  { %v811_v51 = vmul.f32 %v809_v50, %v802_v44 }
0x11ba   :  { %813 = vrot.lane.b32.xlu0 %v811_v51, %s2576_s4 }
0x11bd   :  { %v1028_v52 = vpop.permute.xlu0 %1027 }
0x11be   :  { %v1030_v53 = vmul.f32 %v1028_v52, %v1024_v47 }
0x11c0   :  { %1032 = vrot.lane.b32.xlu1 %v1030_v53, %s2576_s4 }
0x11c5   :  { %v1247_v54 = vpop.permute.xlu1 %1246 }
0x11c6   :  { %v1249_v22 = vmul.f32 %v1247_v54, %v1240_v49 }
0x11c8   :  { %1251 = vrot.lane.b32.xlu0 %v1249_v22, %s2576_s4 }
0x122c   :  { %v814_v57 = vpop.permute.xlu0 %813 }
0x122d   :  { %v2960_v23 = vadd.f32 %v814_v57, %v806_v56 }
0x122f   :  { %2518 = vtanh.f32 %v2960_v23 }
0x1232   :  { %v1033_v24 = vpop.permute.xlu1 %1032 }
0x1233   :  { %v2963_v59 = vadd.f32 %v1033_v24, %v1025_v58  ;;  %v912_v24 = vrot.slane %v2960_v23, 6 }
0x1235   :  { %2520 = vtanh.f32 %v2963_v59 }
0x123a   :  { %v1252_v61 = vpop.permute.xlu0 %1251 }
0x123b   :  { %v2967_v63 = vadd.f32 %v1252_v61, %v1244_v60 }
0x123c   :  { %v2519_v1 = vpop.eup %2518 }
0x123d   :  { %2522 = vtanh.f32 %v2967_v63  ;;  %819 = vrot.lane.b32.xlu1 %v2519_v1, %s2575_s29 }
0x1242   :  { %v2521_v62 = vpop.eup %2520 }
0x1243   :  { %1038 = vrot.lane.b32.xlu0 %v2521_v62, %s2575_s29 }
0x124a   :  { %v2523_v2 = vpop.eup %2522 }
0x124b   :  { %1257 = vrot.lane.b32.xlu1 %v2523_v2, %s2575_s29 }
0x12af   :  { %v820_v4 = vpop.permute.xlu1 %819 }
0x12b0   :  { %v2973_v6 = vmul.f32 %v820_v4, %v802_v44 }
0x12b2   :  { %v828_v26 = vrot.slane %v2973_v6, 4 }
0x12b4   :  { %829 = vrot.lane.b32.xlu0 %v828_v26, %s2576_s4 }
0x12b5   :  { %v1039_v7 = vpop.permute.xlu0 %1038 }
0x12b6   :  { %v1041_v9 = vmul.f32 %v1039_v7, %v1024_v47 }
0x12b8   :  { %1043 = vrot.lane.b32.xlu1 %v1041_v9, %s2576_s4 }
0x12bd   :  { %v1258_v11 = vpop.permute.xlu1 %1257 }
0x12be   :  { %v1260_v12 = vmul.f32 %v1258_v11, %v1240_v49 }
0x12c0   :  { %1262 = vrot.lane.b32.xlu0 %v1260_v12, %s2576_s4 }
0x1326   :  { %v830_v19 = vpop.permute.xlu0 %829 }
0x1327   :  { %2357 = vmatmul.mubr.msk.f32.vlgmr.msra.gmra.mxu1 %vm188_vm6, %v830_v19 }
0x1328   :  { %2371 = vmatpush3.msra.mxu1 %v75_v15  ;;  %2378 = vmatprep.mubr.msk.f32.mxu1 %vm2573_vm0, %v2572_v0 }
0x1329   :  { %2372 = vmatprep.subr.mxu1 %v2572_v0 }
0x132a   :  { %2373 = vmatpush3.msra.mxu1 %v74_v20  ;;  %v1044_v27 = vpop.permute.xlu1 %1043 }
0x132b   :  { %1046 = vst.msk [vmem:[#allocation4] sm:$0x3] %vm185_vm5, %v1044_v27  ;;  %2374 = vmatprep.subr.mxu1 %v2572_v0 }
0x132c   :  { %2375 = vmatpush3.msra.mxu1 %v73_v21 }
0x132d   :  { %2376 = vmatprep.subr.mxu1 %v2572_v0 }
0x132e   :  { %2377 = vmatpush3.msra.mxu1 %v72_v28 }
0x132f   :  { %2379 = vmatmul.mubr.msk.f32.vlgmr.msra.gmra.mxu1 %vm188_vm6, %v1044_v27  ;;  %2392 = vmatprep.subr.mxu1 %v2572_v0 }
0x1330   :  { %2393 = vmatpush3.msra.mxu1 %v2891_v13  ;;  %2400 = vmatprep.mubr.msk.f32.mxu1 %vm2573_vm0, %v2572_v0 }
0x1331   :  { %2394 = vmatprep.subr.mxu1 %v2572_v0 }
0x1332   :  { %v1263_v29 = vpop.permute.xlu0 %1262  ;;  %2395 = vmatpush3.msra.mxu1 %v2898_v16 }
0x1333   :  { %1265 = vst.msk [vmem:[#allocation2 + $0x10] sm:$0x3] %vm185_vm5, %v1263_v29  ;;  %2396 = vmatprep.subr.mxu1 %v2572_v0 }
0x1334   :  { %2397 = vmatpush3.msra.mxu1 %v2907_v17 }
0x1335   :  { %2398 = vmatprep.subr.mxu1 %v2572_v0 }
0x1336   :  { %2399 = vmatpush3.msra.mxu1 %v2914_v18 }
0x1337   :  { %2401 = vmatmul.mubr.msk.f32.vlgmr.msra.gmra.mxu1 %vm188_vm6, %v1263_v29  ;;  %2414 = vmatprep.subr.mxu1 %v2572_v0 }
0x1338   :  { %2422 = vmatprep.mubr.msk.f32.mxu1 %vm2573_vm0, %v2572_v0 }
0x13e7   :  { %v899_v30 = vpop.f32.mrf.mxu1 }
0x13e8   :  { %v904_v50 = vrot.slane %v899_v30, 2 }
0x13e9   :  { %v2358_v31 = vpop.f32.mrf.mxu1 }
0x13ea   :  { %v906_v51 = vadd.f32 %v904_v50, %v2831_v39 }
0x13ec   :  { %v907_v52 = vmul.f32 %v906_v51, %v2688_v8 }
0x13ef   :  { %v3014_v33 = vpop.f32.mrf.mxu1 }
0x13f1   :  { %v2380_v34 = vpop.f32.mrf.mxu1 }
0x13f2   :  { %v1155_v34 = vld [vmem:[%s3267_s6 + $0x18] sm:$0xff] }
0x13f3   :  { %2415 = vmatpush3.msra.mxu1 %v1155_v34 }
0x13f4   :  { %2416 = vmatprep.subr.mxu1 %v2572_v0 }
0x13f7   :  { %v1334_v36 = vpop.f32.mrf.mxu1 }
0x13f8   :  { %v1335_v38 = vadd.f32 %v2943_v35, %v1334_v36  ;;  %v1154_v36 = vld [vmem:[%s3267_s6 + $0x10] sm:$0xff] }
0x13f9   :  { %v2402_v40 = vpop.f32.mrf.mxu1  ;;  %2417 = vmatpush3.msra.mxu1 %v1154_v36 }
0x13fa   :  { %v1338_v41 = vmul.f32 %v1335_v38, %v2688_v8  ;;  %v1153_v38 = vld [vmem:[%s3267_s6 + $0x8] sm:$0xff]  ;;  %2418 = vmatprep.subr.mxu1 %v2572_v0  ;;  %v1152_v40 = vld [vmem:[%s3267_s6] sm:$0xff] }
0x13fb   :  { %2419 = vmatpush3.msra.mxu1 %v1153_v38 }
0x13fc   :  { %2524 = vtanh.f32 %v1338_v41  ;;  %2420 = vmatprep.subr.mxu1 %v2572_v0 }
0x13fd   :  { %2421 = vmatpush3.msra.mxu1 %v1152_v40 }
0x13fe   :  { %2436 = vmatprep.subr.mxu1 %v2572_v0 }
0x1409   :  { %v2525_v42 = vpop.eup %2524 }
0x140a   :  { %v1340_v43 = vmul.f32 %v2525_v42, %v2688_v8 }
0x140c   :  { %v1341_v44 = vadd.f32 %v1340_v43, %v2694_v14 }
0x140e   :  { %1344 = vrot.lane.b32.xlu1 %v1341_v44, %s2575_s29  ;;  %v1342_v47 = vmul.f32 %v1341_v44, %v2967_v63 }
0x1480   :  { %v1345_v45 = vpop.permute.xlu1 %1344 }
0x1481   :  { %v1347_v46 = vmul.f32 %v1345_v45, %v1341_v44 }
0x1483   :  { %1349 = vrot.lane.b32.xlu0 %v1347_v46, %s2576_s4 }
0x14f5   :  { %v1350_v48 = vpop.permute.xlu0 %1349 }
0x14f6   :  { %v3023_v10 = vadd.f32 %v1350_v48, %v1342_v47 }
0x14f8   :  { %2526 = vtanh.f32 %v3023_v10 }
0x14f9   :  { %2528 = vtanh.f32 %v907_v52 }
0x1505   :  { %v2527_v49 = vpop.eup %2526 }
0x1506   :  { %1355 = vrot.lane.b32.xlu1 %v2527_v49, %s2575_s29  ;;  %v2529_v53 = vpop.eup %2528 }
0x1507   :  { %v909_v55 = vmul.f32 %v2529_v53, %v2688_v8 }
0x1509   :  { %v910_v56 = vadd.f32 %v909_v55, %v2694_v14 }
0x150b   :  { %v914_v25 = vmul.f32 %v912_v24, %v910_v56 }
0x1578   :  { %v1356_v54 = vpop.permute.xlu1 %1355 }
0x1579   :  { %v1358_v22 = vmul.f32 %v1356_v54, %v1341_v44 }
0x157b   :  { %1360 = vrot.lane.b32.xlu0 %v1358_v22, %s2576_s4 }
0x157f   :  { %916 = vrot.lane.b32.xlu0 %v910_v56, %s2575_s29 }
0x15ed   :  { %v1361_v57 = vpop.permute.xlu0 %1360 }
0x15ee   :  { %1363 = vst.msk [vmem:[#allocation2 + $0x12] sm:$0x3] %vm185_vm5, %v1361_v57  ;;  %2412 = vmatmul.mubr.msk.f32.vlgmr.msra.gmra.mxu0 %vm188_vm6, %v1361_v57 }
0x15ef   :  { %2426 = vmatpush3.msra.mxu0 %v2891_v13  ;;  %2433 = vmatprep.mubr.msk.f32.mxu0 %vm2573_vm0, %v2572_v0 }
0x15f0   :  { %2427 = vmatprep.subr.mxu0 %v2572_v0 }
0x15f1   :  { %v917_v39 = vpop.permute.xlu0 %916  ;;  %2428 = vmatpush3.msra.mxu0 %v2898_v16 }
0x15f2   :  { %v919_v58 = vmul.f32 %v917_v39, %v910_v56  ;;  %2429 = vmatprep.subr.mxu0 %v2572_v0 }
0x15f3   :  { %2430 = vmatpush3.msra.mxu0 %v2907_v17 }
0x15f4   :  { %921 = vrot.lane.b32.xlu0 %v919_v58, %s2576_s4  ;;  %2431 = vmatprep.subr.mxu0 %v2572_v0 }
0x15f5   :  { %2432 = vmatpush3.msra.mxu0 %v2914_v18 }
0x15f6   :  { %2447 = vmatprep.subr.mxu0 %v2572_v0 }
0x1666   :  { %v922_v60 = vpop.permute.xlu0 %921 }
0x1667   :  { %v3047_v61 = vadd.f32 %v922_v60, %v914_v25 }
0x1669   :  { %2530 = vtanh.f32 %v3047_v61 }
0x1676   :  { %v2531_v63 = vpop.eup %2530 }
0x1677   :  { %927 = vrot.lane.b32.xlu0 %v2531_v63, %s2575_s29 }
0x16ae   :  { %v1432_v1 = vpop.f32.mrf.mxu0 }
0x16af   :  { %v1433_v62 = vadd.f32 %v2943_v35, %v1432_v1 }
0x16b0   :  { %v2413_v2 = vpop.f32.mrf.mxu0 }
0x16b1   :  { %v1436_v4 = vmul.f32 %v1433_v62, %v2688_v8 }
0x16b3   :  { %2532 = vtanh.f32 %v1436_v4 }
0x16c0   :  { %v2533_v26 = vpop.eup %2532 }
0x16c1   :  { %v1438_v7 = vmul.f32 %v2533_v26, %v2688_v8 }
0x16c3   :  { %v1439_v23 = vadd.f32 %v1438_v7, %v2694_v14 }
0x16c5   :  { %1442 = vrot.lane.b32.xlu1 %v1439_v23, %s2575_s29  ;;  %v1440_v21 = vmul.f32 %v1439_v23, %v3023_v10 }
0x16e9   :  { %v928_v9 = vpop.permute.xlu0 %927 }
0x16ea   :  { %v3056_v11 = vmul.f32 %v928_v9, %v910_v56 }
0x16ec   :  { %v1536_v12 = vrot.slane %v3056_v11, 6 }
0x16ee   :  { %1537 = vrot.lane.b32.xlu0 %v1536_v12, %s2576_s4 }
0x1737   :  { %v1443_v15 = vpop.permute.xlu1 %1442 }
0x1738   :  { %v1445_v19 = vmul.f32 %v1443_v15, %v1439_v23 }
0x173a   :  { %1447 = vrot.lane.b32.xlu1 %v1445_v19, %s2576_s4 }
0x1760   :  { %v1538_v20 = vpop.permute.xlu0 %1537 }
0x1761   :  { %2434 = vmatmul.mubr.msk.f32.vlgmr.msra.gmra.mxu0 %vm188_vm6, %v1538_v20 }
0x1762   :  { %2448 = vmatpush3.msra.mxu0 %v2891_v13  ;;  %2455 = vmatprep.mubr.msk.f32.mxu0 %vm2573_vm0, %v2572_v0 }
0x1763   :  { %2449 = vmatprep.subr.mxu0 %v2572_v0 }
0x1764   :  { %2450 = vmatpush3.msra.mxu0 %v2898_v16 }
0x1765   :  { %2451 = vmatprep.subr.mxu0 %v2572_v0 }
0x1766   :  { %2452 = vmatpush3.msra.mxu0 %v2907_v17 }
0x1767   :  { %2453 = vmatprep.subr.mxu0 %v2572_v0 }
0x1768   :  { %2454 = vmatpush3.msra.mxu0 %v2914_v18 }
0x1769   :  { %2472 = vmatprep.subr.mxu0 %v2572_v0 }
0x17ac   :  { %v1448_v27 = vpop.permute.xlu1 %1447 }
0x17ad   :  { %v1450_v28 = vadd.f32 %v1448_v27, %v1440_v21 }
0x17af   :  { %2534 = vtanh.f32 %v1450_v28 }
0x17bc   :  { %v2535_v29 = vpop.eup %2534 }
0x17bd   :  { %1453 = vrot.lane.b32.xlu1 %v2535_v29, %s2575_s29  ;;  %v1128_v29 = vrot.slane %v2963_v59, 6 }
0x1821   :  { %v1607_v30 = vpop.f32.mrf.mxu0 }
0x1822   :  { %v1608_v45 = vadd.f32 %v2943_v35, %v1607_v30 }
0x1823   :  { %v2435_v31 = vpop.f32.mrf.mxu0 }
0x182f   :  { %v1454_v41 = vpop.permute.xlu1 %1453 }
0x1830   :  { %v1456_v42 = vmul.f32 %v1454_v41, %v1439_v23  ;;  %v1120_v23 = vrot.slane %v3014_v33, 6 }
0x1832   :  { %1458 = vrot.lane.b32.xlu1 %v1456_v42, %s2576_s4  ;;  %v1122_v9 = vadd.f32 %v1120_v23, %v2936_v32 }
0x1834   :  { %v1123_v12 = vmul.f32 %v1122_v9, %v2688_v8 }
0x18a4   :  { %v1459_v43 = vpop.permute.xlu1 %1458 }
0x18a5   :  { %1461 = vst.msk [vmem:[#allocation2 + $0x14] sm:$0x3] %vm185_vm5, %v1459_v43 }
0x18ac   :  { %v1462_v44 = vld [vmem:[#allocation2 + $0x10] sm:$0x3f] }
0x18ad   :  { %2423 = vmatmul.mubr.msk.f32.vlgmr.msra.gmra.mxu1 %vm188_vm6, %v1462_v44 }
0x18ae   :  { %2437 = vmatpush3.msra.mxu1 %v2891_v13  ;;  %2444 = vmatprep.mubr.msk.f32.mxu1 %vm2573_vm0, %v2572_v0 }
0x18af   :  { %2438 = vmatprep.subr.mxu1 %v2572_v0 }
0x18b0   :  { %2439 = vmatpush3.msra.mxu1 %v2898_v16 }
0x18b1   :  { %2440 = vmatprep.subr.mxu1 %v2572_v0 }
0x18b2   :  { %2441 = vmatpush3.msra.mxu1 %v2907_v17 }
0x18b3   :  { %2442 = vmatprep.subr.mxu1 %v2572_v0 }
0x18b4   :  { %2443 = vmatpush3.msra.mxu1 %v2914_v18  ;;  %v1617_v18 = vrot.slane %v3047_v61, 6 }
0x196d   :  { %v3103_v46 = vpop.f32.mrf.mxu1 }
0x196e   :  { %v1611_v13 = vadd.f32 %v1608_v45, %v3103_v46  ;;  %v1714_v39 = vrot.slane %v3103_v46, 2  ;;  %v1815_v40 = vrot.slane %v3103_v46, 4 }
0x196f   :  { %v2424_v47 = vpop.f32.mrf.mxu1 }
0x1970   :  { %v1612_v48 = vmul.f32 %v1611_v13, %v2688_v8 }
0x1972   :  { %2536 = vtanh.f32 %v1612_v48 }
0x197f   :  { %v2537_v10 = vpop.eup %2536 }
0x1980   :  { %v1614_v16 = vmul.f32 %v2537_v10, %v2688_v8 }
0x1982   :  { %v1615_v49 = vadd.f32 %v1614_v16, %v2694_v14 }
0x1984   :  { %1621 = vrot.lane.b32.xlu1 %v1615_v49, %s2575_s29  ;;  %v1619_v51 = vmul.f32 %v1617_v18, %v1615_v49  ;;  %v1848_v18 = vld [vmem:[%s3268_s11] sm:$0xff] }
0x19f6   :  { %v1622_v17 = vpop.permute.xlu1 %1621 }
0x19f7   :  { %v1624_v50 = vmul.f32 %v1622_v17, %v1615_v49 }
0x19f9   :  { %1626 = vrot.lane.b32.xlu0 %v1624_v50, %s2576_s4  ;;  %v2043_v50 = vld [vmem:[%s3269_s13 + $0x18] sm:$0xff] }
0x1a6b   :  { %v1627_v52 = vpop.permute.xlu0 %1626 }
0x1a6c   :  { %v1629_v53 = vadd.f32 %v1627_v52, %v1619_v51  ;;  %v2042_v51 = vld [vmem:[%s3269_s13 + $0x10] sm:$0xff]  ;;  %v2041_v52 = vld [vmem:[%s3269_s13 + $0x8] sm:$0xff] }
0x1a6e   :  { %2538 = vtanh.f32 %v1629_v53 }
0x1a7b   :  { %v2539_v54 = vpop.eup %2538 }
0x1a7c   :  { %1632 = vrot.lane.b32.xlu1 %v2539_v54, %s2575_s29 }
0x1aee   :  { %v1633_v22 = vpop.permute.xlu1 %1632 }
0x1aef   :  { %v1635_v55 = vmul.f32 %v1633_v22, %v1615_v49  ;;  %v1849_v49 = vld [vmem:[%s3268_s11 + $0x8] sm:$0xff] }
0x1af1   :  { %1637 = vrot.lane.b32.xlu0 %v1635_v55, %s2576_s4 }
0x1b63   :  { %v1638_v56 = vpop.permute.xlu0 %1637 }
0x1b64   :  { %1640 = vst.msk [vmem:[#allocation2 + $0x16] sm:$0x3] %vm185_vm5, %v1638_v56  ;;  %2445 = vmatmul.mubr.msk.f32.vlgmr.msra.gmra.mxu1 %vm188_vm6, %v1638_v56 }
0x1b65   :  { %2466 = vmatprep.mubr.msk.f32.mxu1 %vm188_vm6, %v2816_v37 }
0x1c24   :  { %v1709_v57 = vpop.f32.mrf.mxu1 }
0x1c25   :  { %v1710_v58 = vadd.f32 %v2943_v35, %v1709_v57 }
0x1c26   :  { %v2446_v24 = vpop.f32.mrf.mxu1 }
0x1c27   :  { %v1716_v25 = vadd.f32 %v1714_v39, %v1710_v58 }
0x1c29   :  { %v1717_v60 = vmul.f32 %v1716_v25, %v2688_v8  ;;  %v3201_v25 = vld [vmem:[%s3270_s12] ss:$0 sm:$0xff] }
0x1c2b   :  { %2540 = vtanh.f32 %v1717_v60 }
0x1c38   :  { %v2541_v61 = vpop.eup %2540 }
0x1c39   :  { %v1719_v63 = vmul.f32 %v2541_v61, %v2688_v8 }
0x1c3b   :  { %v1720_v1 = vadd.f32 %v1719_v63, %v2694_v14 }
0x1c3d   :  { %1723 = vrot.lane.b32.xlu1 %v1720_v1, %s2575_s29  ;;  %v1721_v37 = vmul.f32 %v1720_v1, %v1629_v53  ;;  %v2040_v53 = vld [vmem:[%s3269_s13] sm:$0xff] }
0x1caf   :  { %v1724_v62 = vpop.permute.xlu1 %1723 }
0x1cb0   :  { %v1726_v2 = vmul.f32 %v1724_v62, %v1720_v1 }
0x1cb2   :  { %1728 = vrot.lane.b32.xlu0 %v1726_v2, %s2576_s4  ;;  %v2177_v2 = vld [vmem:[%s3271_s14] ss:$0 sm:$0xff] }
0x1d24   :  { %v1729_v4 = vpop.permute.xlu0 %1728 }
0x1d25   :  { %v1731_v26 = vadd.f32 %v1729_v4, %v1721_v37 }
0x1d27   :  { %2542 = vtanh.f32 %v1731_v26 }
0x1d28   :  { %2544 = vtanh.f32 %v1123_v12 }
0x1d34   :  { %v2543_v7 = vpop.eup %2542 }
0x1d35   :  { %1734 = vrot.lane.b32.xlu1 %v2543_v7, %s2575_s29  ;;  %v2545_v15 = vpop.eup %2544 }
0x1d36   :  { %v1125_v21 = vmul.f32 %v2545_v15, %v2688_v8 }
0x1d38   :  { %v3132_v27 = vadd.f32 %v1125_v21, %v2694_v14 }
0x1d3a   :  { %v1130_v30 = vmul.f32 %v1128_v29, %v3132_v27 }
0x1da7   :  { %v1735_v19 = vpop.permute.xlu1 %1734 }
0x1da8   :  { %v1737_v20 = vmul.f32 %v1735_v19, %v1720_v1 }
0x1daa   :  { %1739 = vrot.lane.b32.xlu0 %v1737_v20, %s2576_s4 }
0x1dae   :  { %1132 = vrot.lane.b32.xlu0 %v3132_v27, %s2575_s29 }
0x1e1c   :  { %v1740_v28 = vpop.permute.xlu0 %1739 }
0x1e1d   :  { %1742 = vst.msk [vmem:[#allocation2 + $0x18] sm:$0x3] %vm185_vm5, %v1740_v28  ;;  %2456 = vmatmul.mubr.msk.f32.vlgmr.msra.gmra.mxu0 %vm188_vm6, %v1740_v28 }
0x1e1e   :  { %2480 = vmatprep.mubr.msk.f32.mxu0 %vm2573_vm0, %v2572_v0  ;;  %2473 = vmatpush3.msra.mxu0 %v2043_v50 }
0x1e1f   :  { %2474 = vmatprep.subr.mxu0 %v2572_v0 }
0x1e20   :  { %v1133_v32 = vpop.permute.xlu0 %1132  ;;  %2475 = vmatpush3.msra.mxu0 %v2042_v51 }
0x1e21   :  { %v1135_v33 = vmul.f32 %v1133_v32, %v3132_v27  ;;  %2476 = vmatprep.subr.mxu0 %v2572_v0 }
0x1e22   :  { %2477 = vmatpush3.msra.mxu0 %v2041_v52 }
0x1e23   :  { %1137 = vrot.lane.b32.xlu0 %v1135_v33, %s2576_s4  ;;  %2478 = vmatprep.subr.mxu0 %v2572_v0 }
0x1e24   :  { %2479 = vmatpush3.msra.mxu0 %v2040_v53 }
0x1e95   :  { %v1138_v31 = vpop.permute.xlu0 %1137 }
0x1e96   :  { %v1140_v34 = vadd.f32 %v1138_v31, %v1130_v30 }
0x1e98   :  { %2546 = vtanh.f32 %v1140_v34 }
0x1ea5   :  { %v2547_v36 = vpop.eup %2546 }
0x1ea6   :  { %1143 = vrot.lane.b32.xlu0 %v2547_v36, %s2575_s29 }
0x1eaa   :  { %824 = vrot.lane.b32.xlu0 %v2973_v6, %s2576_s4 }
0x1edd   :  { %v1811_v38 = vpop.f32.mrf.mxu0 }
0x1ede   :  { %v1812_v41 = vadd.f32 %v2943_v35, %v1811_v38 }
0x1edf   :  { %v2457_v42 = vpop.f32.mrf.mxu0 }
0x1ee0   :  { %v1817_v43 = vadd.f32 %v1815_v40, %v1812_v41 }
0x1ee2   :  { %v1818_v59 = vmul.f32 %v1817_v43, %v2688_v8 }
0x1ee4   :  { %2548 = vtanh.f32 %v1818_v59 }
0x1ef1   :  { %v2549_v44 = vpop.eup %2548 }
0x1ef2   :  { %v1820_v45 = vmul.f32 %v2549_v44, %v2688_v8  ;;  %v1851_v8 = vld [vmem:[%s3268_s11 + $0x18] sm:$0xff] }
0x1ef3   :  { %2458 = vmatprep.subr.mxu1 %v1851_v8 }
0x1ef4   :  { %v1821_v13 = vadd.f32 %v1820_v45, %v2694_v14  ;;  %v1850_v14 = vld [vmem:[%s3268_s11 + $0x10] sm:$0xff]  ;;  %2459 = vmatpush3.msra.mxu1 %v1851_v8 }
0x1ef5   :  { %2460 = vmatprep.subr.mxu1 %v1850_v14 }
0x1ef6   :  { %1824 = vrot.lane.b32.xlu1 %v1821_v13, %s2575_s29  ;;  %v1822_v35 = vmul.f32 %v1821_v13, %v1731_v26  ;;  %2461 = vmatpush3.msra.mxu1 %v1850_v14 }
0x1ef7   :  { %2462 = vmatprep.subr.mxu1 %v1849_v49 }
0x1ef8   :  { %2463 = vmatpush3.msra.mxu1 %v1849_v49 }
0x1ef9   :  { %2464 = vmatprep.subr.mxu1 %v1848_v18 }
0x1efa   :  { %2465 = vmatpush3.msra.mxu1 %v1848_v18 }
0x1f18   :  { %v1144_v47 = vpop.permute.xlu0 %1143 }
0x1f19   :  { %v1146_v54 = vmul.f32 %v1144_v47, %v3132_v27 }
0x1f1c   :  { %v825_v48 = vpop.permute.xlu0 %824 }
0x1f1d   :  { %827 = vst.msk [vmem:[#allocation2 + $0x8] sm:$0x30] %vm402_vm8, %v825_v48 }
0x1f68   :  { %v1825_v6 = vpop.permute.xlu1 %1824 }
0x1f69   :  { %v1827_v46 = vmul.f32 %v1825_v6, %v1821_v13 }
0x1f6b   :  { %1829 = vrot.lane.b32.xlu1 %v1827_v46, %s2576_s4 }
0x1fdd   :  { %v1830_v10 = vpop.permute.xlu1 %1829 }
0x1fde   :  { %v1832_v16 = vadd.f32 %v1830_v10, %v1822_v35 }
0x1fe0   :  { %2550 = vtanh.f32 %v1832_v16 }
0x1fed   :  { %v2551_v17 = vpop.eup %2550 }
0x1fee   :  { %1835 = vrot.lane.b32.xlu1 %v2551_v17, %s2575_s29 }
0x1ff2   :  { %716 = vrot.lane.b32.xlu1 %v2866_v3, %s2576_s4 }
0x1ff6   :  { %932 = vrot.lane.b32.xlu1 %v3056_v11, %s2576_s4  ;;  %v1846_v11 = vld [vmem:[#allocation2 + $0x10] sm:$0xff] }
0x1ffa   :  { %1148 = vrot.lane.b32.xlu1 %v1146_v54, %s2576_s4 }
0x2060   :  { %v1836_v22 = vpop.permute.xlu1 %1835 }
0x2061   :  { %v1838_v55 = vmul.f32 %v1836_v22, %v1821_v13 }
0x2063   :  { %1840 = vrot.lane.b32.xlu0 %v1838_v55, %s2576_s4 }
0x2064   :  { %v717_v3 = vpop.permute.xlu1 %716 }
0x2065   :  { %719 = vst.msk [vmem:[#allocation2 + $0x8] sm:$0xc] %vm293_vm7, %v717_v3 }
0x2068   :  { %v933_v56 = vpop.permute.xlu1 %932 }
0x2069   :  { %935 = vst.msk [vmem:[#allocation2 + $0x8] sm:$0xc0] %vm511_vm9, %v933_v56 }
0x206c   :  { %v1149_v57 = vpop.permute.xlu1 %1148 }
0x206d   :  { %1151 = vst.msk [vmem:[#allocation4] sm:$0xc] %vm293_vm7, %v1149_v57 }
0x2070   :  { %v1845_v0 = vld [vmem:[#allocation2 + $0x8] sm:$0xff] }
0x2071   :  { %2467 = vmatmul.mubr.msk.f32.vlgmr.msra.gmra.mxu1 %vm188_vm6, %v1845_v0 }
0x2072   :  { %2469 = vmatprep.mubr.msk.f32.mxu1 %vm188_vm6, %v1846_v11 }
0x2074   :  { %v2039_v39 = vld [vmem:[#allocation4] sm:$0xf] }
0x2075   :  { %2481 = vmatmul.mubr.msk.f32.vlgmr.msra.gmra.mxu0 %vm188_vm6, %v2039_v39 }
0x20d5   :  { %v1841_v58 = vpop.permute.xlu0 %1840 }
0x20d6   :  { %1843 = vst.msk [vmem:[#allocation2 + $0x1a] sm:$0x3] %vm185_vm5, %v1841_v58 }
0x20dd   :  { %v1847_v24 = vld [vmem:[#allocation2 + $0x18] sm:$0xf] }
0x20de   :  { %2470 = vmatmul.mubr.msk.f32.gmra.mxu1 %vm188_vm6, %v1847_v24 }
0x2131   :  { %v2468_v60 = vpop.f32.mrf.mxu1 }
0x2132   :  { %v1943_v61 = vadd.f32 %v2468_v60, %v3201_v25 }
0x2133   :  { %v1937_v63 = vpop.f32.mrf.mxu1 }
0x2134   :  { %v1970_v1 = vand.u32 2147483647, %v1943_v61  ;;  %v3205_v62 = vadd.f32 %v3201_v25, %v1937_v63  ;;  %v1958_v13 = vmax.f32 %v1943_v61, 0.0  ;;  %vm1962_vm13 = vcmp.ne.f32.partialorder %v1943_v61, %v1943_v61 }
0x2135   :  { %v2120_v37 = vpop.f32.mrf.mxu0 }
0x2136   :  { %v1974_v4 = vsub.f32 0.0, %v1970_v1  ;;  %v1969_v26 = vand.u32 2147483647, %v3205_v62  ;;  %v3211_v7 = vadd.f32 %v2177_v2, %v2120_v37  ;;  %v1957_v16 = vmax.f32 %v3205_v62, 0.0 }
0x2137   :  { %v2482_v23 = vpop.f32.mrf.mxu0  ;;  %vm1961_vm15 = vcmp.ne.f32.partialorder %v3205_v62, %v3205_v62 }
0x2138   :  { %v1979_v9 = vmul.f32 1.442695, %v1974_v4  ;;  %v1973_v12 = vsub.f32 0.0, %v1969_v26  ;;  %v2127_v15 = vand.u32 2147483647, %v3211_v7  ;;  %v2124_v52 = vmax.f32 %v3211_v7, 0.0 }
0x2139   :  { %vm2125_vm2 = vcmp.ne.f32.partialorder %v3211_v7, %v3211_v7 }
0x213a   :  { %2552 = vpow2.f32 %v1979_v9  ;;  %v1977_v19 = vmul.f32 1.442695, %v1973_v12  ;;  %v2128_v20 = vsub.f32 0.0, %v2127_v15 }
0x213c   :  { %2554 = vpow2.f32 %v1977_v19  ;;  %v2129_v21 = vmul.f32 1.442695, %v2128_v20 }
0x213e   :  { %2556 = vpow2.f32 %v2129_v21 }
0x2147   :  { %v2553_v27 = vpop.eup %2552 }
0x2148   :  { %v1994_v28 = vadd.f32 1.0, %v2553_v27  ;;  %v1997_v31 = vmul.f32 -0.5, %v2553_v27  ;;  %v2000_v38 = vand.u32 2147483647, %v2553_v27 }
0x2149   :  { %v2555_v32 = vpop.eup %2554 }
0x214a   :  { %2558 = vlog2.f32 %v1994_v28  ;;  %v1985_v33 = vadd.f32 1.0, %v2555_v32  ;;  %v1988_v34 = vmul.f32 -0.5, %v2555_v32  ;;  %v1998_v36 = vadd.f32 1.0, %v1997_v31 }
0x214b   :  { %v2557_v29 = vpop.eup %2556  ;;  %v1991_v43 = vand.u32 2147483647, %v2555_v32  ;;  %vm2001_vm10 = vcmp.lt.f32.partialorder %v2000_v38, 0.0004427343 }
0x214c   :  { %2560 = vlog2.f32 %v1985_v33  ;;  %v2131_v30 = vadd.f32 1.0, %v2557_v29  ;;  %v2134_v40 = vmul.f32 -0.5, %v2557_v29  ;;  %v1989_v41 = vadd.f32 1.0, %v1988_v34 }
0x214d   :  { %v1999_v44 = vmul.f32 %v2553_v27, %v1998_v36  ;;  %v2137_v35 = vand.u32 2147483647, %v2557_v29  ;;  %vm1992_vm12 = vcmp.lt.f32.partialorder %v1991_v43, 0.0004427343 }
0x214e   :  { %2562 = vlog2.f32 %v2131_v30  ;;  %v2135_v47 = vadd.f32 1.0, %v2134_v40  ;;  %v1990_v46 = vmul.f32 %v2555_v32, %v1989_v41 }
0x214f   :  { %vm2138_vm0 = vcmp.lt.f32.partialorder %v2137_v35, 0.0004427343 }
0x2150   :  { %v2136_v18 = vmul.f32 %v2557_v29, %v2135_v47 }
0x2157   :  { %v2559_v42 = vpop.eup %2558 }
0x2158   :  { %v1996_v59 = vmul.f32 0.6931472, %v2559_v42 }
0x2159   :  { %v2561_v45 = vpop.eup %2560 }
0x215a   :  { %v2002_v48 = vsel %vm2001_vm10, %v1999_v44, %v1996_v59  ;;  %v1987_v6 = vmul.f32 0.6931472, %v2561_v45 }
0x215b   :  { %v2022_v10 = vadd.f32 %v2002_v48, %v1958_v13  ;;  %v2563_v8 = vpop.eup %2562 }
0x215c   :  { %v1993_v14 = vsel %vm1992_vm12, %v1990_v46, %v1987_v6  ;;  %v2133_v50 = vmul.f32 0.6931472, %v2563_v8 }
0x215d   :  { %v2026_v49 = vsel %vm1962_vm13, %v1943_v61, %v2022_v10  ;;  %v2021_v17 = vadd.f32 %v1993_v14, %v1957_v16 }
0x215e   :  { %v2030_v51 = vsel %vm1956_vm11, %v1943_v61, %v2026_v49  ;;  %v2139_v54 = vsel %vm2138_vm0, %v2136_v18, %v2133_v50 }
0x215f   :  { %2035 = vst.msk [vmem:[%s3272_s15 + $0x8] sm:$0xff] %vm2033_vm14, %v2030_v51  ;;  %v2025_v53 = vsel %vm1961_vm15, %v3205_v62, %v2021_v17  ;;  %v2140_v55 = vadd.f32 %v2139_v54, %v2124_v52 }
0x2160   :  { %v2029_v22 = vsel %vm1956_vm11, %v3205_v62, %v2025_v53 }
0x2161   :  { %2034 = vst.msk [vmem:[%s3272_s15] sm:$0xff] %vm2033_vm14, %v2029_v22  ;;  %v2141_v3 = vsel %vm2125_vm2, %v3211_v7, %v2140_v55 }
0x2162   :  { %v2142_v56 = vsel %vm1956_vm11, %v3211_v7, %v2141_v3 }
0x2163   :  { %2143 = vst.msk [vmem:[%s3273_s16] sm:$0xf] %vm2037_vm1, %v2142_v56 }
0x219e   :  { %v2471_v57 = vpop.f32.mrf.mxu1 }
0x219f   :  { %v1953_v0 = vadd.f32 %v2471_v57, %v3201_v25 }
0x21a0   :  { %v1947_v11 = vpop.f32.mrf.mxu1 }
0x21a1   :  { %v1972_v39 = vand.u32 2147483647, %v1953_v0  ;;  %v1948_v58 = vadd.f32 %v3201_v25, %v1947_v11  ;;  %v1960_v27 = vmax.f32 %v1953_v0, 0.0  ;;  %vm1964_vm5 = vcmp.ne.f32.partialorder %v1953_v0, %v1953_v0 }
0x21a3   :  { %v1976_v24 = vsub.f32 0.0, %v1972_v39  ;;  %v1971_v60 = vand.u32 2147483647, %v1948_v58  ;;  %v1959_v30 = vmax.f32 %v1948_v58, 0.0  ;;  %vm1963_vm6 = vcmp.ne.f32.partialorder %v1948_v58, %v1948_v58 }
0x21a5   :  { %v1983_v61 = vmul.f32 1.442695, %v1976_v24  ;;  %v1975_v63 = vsub.f32 0.0, %v1971_v60 }
0x21a7   :  { %2564 = vpow2.f32 %v1983_v61  ;;  %v1981_v1 = vmul.f32 1.442695, %v1975_v63 }
0x21a9   :  { %2566 = vpow2.f32 %v1981_v1 }
0x21b4   :  { %v2565_v62 = vpop.eup %2564 }
0x21b5   :  { %v2012_v2 = vadd.f32 1.0, %v2565_v62  ;;  %v2015_v26 = vmul.f32 -0.5, %v2565_v62  ;;  %v2018_v9 = vand.u32 2147483647, %v2565_v62 }
0x21b6   :  { %v2567_v37 = vpop.eup %2566 }
0x21b7   :  { %2568 = vlog2.f32 %v2012_v2  ;;  %v2003_v4 = vadd.f32 1.0, %v2567_v37  ;;  %v2006_v7 = vmul.f32 -0.5, %v2567_v37  ;;  %v2016_v23 = vadd.f32 1.0, %v2015_v26 }
0x21b8   :  { %v2009_v25 = vand.u32 2147483647, %v2567_v37  ;;  %vm2019_vm3 = vcmp.lt.f32.partialorder %v2018_v9, 0.0004427343 }
0x21b9   :  { %2570 = vlog2.f32 %v2003_v4  ;;  %v2007_v12 = vadd.f32 1.0, %v2006_v7  ;;  %v2017_v20 = vmul.f32 %v2565_v62, %v2016_v23 }
0x21ba   :  { %vm2010_vm4 = vcmp.lt.f32.partialorder %v2009_v25, 0.0004427343 }
0x21bb   :  { %v2008_v33 = vmul.f32 %v2567_v37, %v2007_v12 }
0x21c4   :  { %v2569_v15 = vpop.eup %2568 }
0x21c5   :  { %v2014_v19 = vmul.f32 0.6931472, %v2569_v15 }
0x21c6   :  { %v2571_v21 = vpop.eup %2570 }
0x21c7   :  { %v2020_v28 = vsel %vm2019_vm3, %v2017_v20, %v2014_v19  ;;  %v2005_v32 = vmul.f32 0.6931472, %v2571_v21 }
0x21c8   :  { %v2024_v29 = vadd.f32 %v2020_v28, %v1960_v27 }
0x21c9   :  { %v2011_v31 = vsel %vm2010_vm4, %v2008_v33, %v2005_v32 }
0x21ca   :  { %v2028_v34 = vsel %vm1964_vm5, %v1953_v0, %v2024_v29  ;;  %v2023_v36 = vadd.f32 %v2011_v31, %v1959_v30 }
0x21cb   :  { %v2032_v38 = vsel %vm1956_vm11, %v1953_v0, %v2028_v34 }
0x21cc   :  { %2038 = vst.msk [vmem:[%s3272_s15 + $0x18] sm:$0xf] %vm2037_vm1, %v2032_v38  ;;  %v2027_v40 = vsel %vm1963_vm6, %v1948_v58, %v2023_v36 }
0x21cd   :  { %v2031_v41 = vsel %vm1956_vm11, %v1948_v58, %v2027_v40 }
0x21ce   :  { %2036 = vst.msk [vmem:[%s3272_s15 + $0x10] sm:$0xff] %vm2033_vm14, %v2031_v41 }

</bundles_post_ra>
